<compile_context>
chip_gen: v7x
topology: tpu7x:2x2x1
jax: 0.10.0
libtpu: 0.0.40
codegen_flags: <defaults>
</compile_context>

<pallas_src>
import functools

import jax
import jax.numpy as jnp
import numpy as np
from jax.experimental import pallas as pl
from jax.experimental.pallas import tpu as pltpu


_PAD_L = 8  # interior column offset inside the halo scratch (sublane-aligned store)


# ----------------------------------------------------------------------------
# In-kernel helpers
# ----------------------------------------------------------------------------
def _maskblock_math(avg, w1, w2, b2, clamp_max, thre):
    """fc1 -> relu -> fc2(+bias) -> relu -> clamp -> (mask, mask_before)."""
    y = jnp.maximum(jnp.dot(avg, w1, preferred_element_type=jnp.float32), 0.0)
    y = jnp.dot(y, w2, preferred_element_type=jnp.float32) + b2
    mb = jnp.minimum(jnp.maximum(y, 0.0), clamp_max)        # relu + clamp(max=clamp_max)
    mask = jnp.where(mb < thre, 0.0, mb)                    # hard threshold
    return mask, mb


def _conv3x3_from_halo(halo_ref, w_ref, H, W):
    """3x3 stride-1 conv read from a zero-halo VMEM scratch.

    halo_ref: (H+2, W+2*_PAD_L, Cin) with the feature stored at
              [1:H+1, _PAD_L:_PAD_L+W, :] and zeros everywhere else.
    Single running f32 accumulator over the 9 taps; per-tap windows are read
    directly from the scratch ref (no big padded value held live).
    """
    Cin = halo_ref.shape[-1]
    acc = None
    for kh in range(3):
        for kw in range(3):
            c = _PAD_L - 1 + kw                              # 7, 8, 9
            patch = halo_ref[kh:kh + H, c:c + W, :].reshape(H * W, Cin)
            d = jnp.dot(patch, w_ref[kh, kw], preferred_element_type=jnp.float32)
            acc = d if acc is None else acc + d
    return acc                                               # (H*W, Cout) f32


# ----------------------------------------------------------------------------
# Fused kernel: mb1 + conv_a/bn_a/relu + avg1 + mask1*bb + mb2
#               + conv_b/bn_b + avg2 + residual + mask2*y + relu
# ----------------------------------------------------------------------------
def _masked_basicblock_kernel(x_ref, wa_ref, sa_ref, ta_ref, wb_ref, sb_ref, tb_ref,
                              m1w1_ref, m1w2_ref, m1b2_ref,
                              m2w1_ref, m2w2_ref, m2b2_ref,
                              out_ref, stats_ref,
                              xh_ref, bh_ref,
                              *, H, W, clamp_max, thre):
    Cin = x_ref.shape[-1]
    Cout = wa_ref.shape[-1]

    x = x_ref[0]                                             # (H, W, Cin)

    # ---- in-kernel zero halo for conv_a (aligned interior store, no wrapper pad) ----
    xh_ref[...] = jnp.zeros_like(xh_ref)
    xh_ref[1:H + 1, _PAD_L:_PAD_L + W, :] = x

    # ---- mb1: global average pool -> fc1/relu/fc2 -> relu/clamp/threshold ----
    avg_x = jnp.mean(x.reshape(H * W, Cin), axis=0, keepdims=True)      # (1, Cin)
    mask1, mb1 = _maskblock_math(avg_x, m1w1_ref[...], m1w2_ref[...],
                                 m1b2_ref[...], clamp_max, thre)

    # ---- conv_a + folded BN (eval) + ReLU ----
    acc_a = _conv3x3_from_halo(xh_ref, wa_ref, H, W)
    bb = jnp.maximum(acc_a * sa_ref[...] + ta_ref[...], 0.0)            # (H*W, Cout)
    avg1 = jnp.mean(bb, axis=0, keepdims=True)               # adaptive_avg_pool2d(., 1)
    bb = bb * mask1                                          # fused mask_mul epilogue

    # ---- mb2: its pooled input == avg1 * mask1 exactly (channel mask is H,W-constant) --
    mask2, mb2 = _maskblock_math(avg1 * mask1, m2w1_ref[...], m2w2_ref[...],
                                 m2b2_ref[...], clamp_max, thre)

    # ---- stage bb into VMEM halo scratch (no HBM round trip) -> conv_b + folded BN ----
    bh_ref[...] = jnp.zeros_like(bh_ref)
    bh_ref[1:H + 1, _PAD_L:_PAD_L + W, :] = bb.reshape(H, W, Cout)
    acc_b = _conv3x3_from_halo(bh_ref, wb_ref, H, W)
    y = acc_b * sb_ref[...] + tb_ref[...]                    # no ReLU here
    avg2 = jnp.mean(y, axis=0, keepdims=True)                # adaptive_avg_pool2d(., 1)

    # ---- residual + mask2 * y + ReLU  (downsample=None => Cin == Cout) ----
    res = x.reshape(H * W, Cin)
    out = jnp.maximum(res + y * mask2, 0.0)
    out_ref[0] = out.reshape(H, W, Cout)

    # ---- packed per-image stats: one lane-dense (8, 128) block -> one output DMA ----
    # rows: 0 mask1, 1 mask1_before, 2 mask2, 3 mask2_before, 4 avg_fea1, 5 avg_fea2
    stats_ref[...] = jnp.zeros_like(stats_ref)
    stats_ref[0, 0:1, 0:Cout] = mask1
    stats_ref[0, 1:2, 0:Cout] = mb1
    stats_ref[0, 2:3, 0:Cout] = mask2
    stats_ref[0, 3:4, 0:Cout] = mb2
    stats_ref[0, 4:5, 0:Cout] = avg1
    stats_ref[0, 5:6, 0:Cout] = avg2


# ----------------------------------------------------------------------------
# Module forward (glue) — mirrors MaskedBasicblock.forward (eval mode)
# ----------------------------------------------------------------------------
def masked_basicblock_forward(state, params, clamp_max, thre):
    x, mask_list, lasso_list, mask_before_list, avg_fea_list = state
    N, H, W, Cin = x.shape
    Cout = params["conv_a_w"].shape[-1]
    hid = params["mb1_w1"].shape[0]
    assert Cin == Cout, "downsample=None path requires inplanes == planes"
    eps = 1e-5
    stat_w = max(128, ((Cout + 127) // 128) * 128)
    wp = W + 2 * _PAD_L                                      # halo scratch width

    def fold_bn(g, b, m, v):                                 # BN(eval) -> y*scale + shift
        s = g / jnp.sqrt(v + eps)
        return s.reshape(1, -1), (b - m * s).reshape(1, -1)

    sa, ta = fold_bn(params["bn_a_gamma"], params["bn_a_beta"],
                     params["bn_a_mean"], params["bn_a_var"])
    sb, tb = fold_bn(params["bn_b_gamma"], params["bn_b_beta"],
                     params["bn_b_mean"], params["bn_b_var"])

    rep2 = lambda n: (0, 0)
    rep4 = lambda n: (0, 0, 0, 0)

    flops = N * (2 * 2 * 9 * H * W * Cin * Cout + 4 * (Cin * hid + hid * Cout))
    bytes_accessed = 4 * (N * H * W * (Cin + Cout) + N * 8 * stat_w
                          + 9 * Cin * Cout + 9 * Cout * Cout
                          + 2 * (Cin * hid + hid * Cout) + 8 * Cout)

    kern = functools.partial(_masked_basicblock_kernel, H=H, W=W,
                             clamp_max=clamp_max, thre=thre)
    out, stats = pl.pallas_call(
        kern,
        out_shape=(
            jax.ShapeDtypeStruct((N, H, W, Cout), jnp.float32),   # block output
            jax.ShapeDtypeStruct((N, 8, stat_w), jnp.float32),    # packed stats
        ),
        grid=(N,),
        in_specs=[
            pl.BlockSpec((1, H, W, Cin), lambda n: (n, 0, 0, 0)),
            pl.BlockSpec((3, 3, Cin, Cout), rep4),                # conv_a weight
            pl.BlockSpec((1, Cout), rep2),                        # bn_a scale
            pl.BlockSpec((1, Cout), rep2),                        # bn_a shift
            pl.BlockSpec((3, 3, Cout, Cout), rep4),               # conv_b weight
            pl.BlockSpec((1, Cout), rep2),                        # bn_b scale
            pl.BlockSpec((1, Cout), rep2),                        # bn_b shift
            pl.BlockSpec((Cin, hid), rep2),                       # mb1 fc1 (in, hid)
            pl.BlockSpec((hid, Cout), rep2),                      # mb1 fc2 (hid, out)
            pl.BlockSpec((1, Cout), rep2),                        # mb1 fc2 bias
            pl.BlockSpec((Cout, hid), rep2),                      # mb2 fc1
            pl.BlockSpec((hid, Cout), rep2),                      # mb2 fc2
            pl.BlockSpec((1, Cout), rep2),                        # mb2 fc2 bias
        ],
        out_specs=(
            pl.BlockSpec((1, H, W, Cout), lambda n: (n, 0, 0, 0)),
            pl.BlockSpec((1, 8, stat_w), lambda n: (n, 0, 0)),
        ),
        scratch_shapes=[
            pltpu.VMEM((H + 2, wp, Cin), jnp.float32),            # x zero-halo buffer
            pltpu.VMEM((H + 2, wp, Cout), jnp.float32),           # bb zero-halo buffer
        ],
        compiler_params=pltpu.CompilerParams(
            dimension_semantics=("parallel",)),
        cost_estimate=pl.CostEstimate(flops=flops, transcendentals=0,
                                      bytes_accessed=bytes_accessed),
    )(x, params["conv_a_w"], sa, ta, params["conv_b_w"], sb, tb,
      params["mb1_w1"].T, params["mb1_w2"].T, params["mb1_b2"].reshape(1, Cout),
      params["mb2_w1"].T, params["mb2_w2"].T, params["mb2_b2"].reshape(1, Cout))

    mask1 = stats[:, 0, :Cout]
    mb1 = stats[:, 1, :Cout]
    mask2 = stats[:, 2, :Cout]
    mb2 = stats[:, 3, :Cout]
    avg1 = stats[:, 4, :Cout]
    avg2 = stats[:, 5, :Cout]

    mask_list = mask_list + [mask1, mask2]
    lasso_list = lasso_list + [mb1.mean(axis=-1), mb2.mean(axis=-1)]   # lasso = mean(mb)
    mask_before_list = mask_before_list + [mb1, mb2]
    avg_fea_list = avg_fea_list + [avg1, avg2]               # (N, C) pooled features
    return [out, mask_list, lasso_list, mask_before_list, avg_fea_list]


# ----------------------------------------------------------------------------
# Pure-JAX reference (for validation)
# ----------------------------------------------------------------------------
def ref_forward(x, params, clamp_max, thre):
    eps = 1e-5

    def ref_mb(feat, w1, w2, b2):
        avg = feat.mean(axis=(1, 2))
        y = jnp.maximum(avg @ w1.T, 0.0)
        y = y @ w2.T + b2
        mb = jnp.minimum(jnp.maximum(y, 0.0), clamp_max)
        return jnp.where(mb < thre, 0.0, mb), mb.mean(-1), mb

    def ref_conv_bn(feat, w, g, b, m, v, relu):
        y = jax.lax.conv_general_dilated(
            feat, w, (1, 1), "SAME", dimension_numbers=("NHWC", "HWIO", "NHWC"))
        y = (y - m) / jnp.sqrt(v + eps) * g + b
        return jnp.maximum(y, 0.0) if relu else y

    residual = x
    mask1, _, _ = ref_mb(x, params["mb1_w1"], params["mb1_w2"], params["mb1_b2"])
    bb = ref_conv_bn(x, params["conv_a_w"], params["bn_a_gamma"], params["bn_a_beta"],
                     params["bn_a_mean"], params["bn_a_var"], True)
    bb = bb * mask1[:, None, None, :]
    mask2, _, _ = ref_mb(bb, params["mb2_w1"], params["mb2_w2"], params["mb2_b2"])
    bb = ref_conv_bn(bb, params["conv_b_w"], params["bn_b_gamma"], params["bn_b_beta"],
                     params["bn_b_mean"], params["bn_b_var"], False)
    bb = bb * mask2[:, None, None, :]
    return jnp.maximum(residual + bb, 0.0)


# ----------------------------------------------------------------------------
# Deterministic parameter init (shapes from MaskedBasicblock.__init__)
# ----------------------------------------------------------------------------
def init_params(key, inplanes, planes, squeeze_rate):
    sq = squeeze_rate // 2 if planes < 80 else squeeze_rate
    hidden = planes // sq
    ks = jax.random.split(key, 10)

    def kaiming(k, shape, fan_in):
        return jax.random.normal(k, shape, jnp.float32) * np.sqrt(2.0 / fan_in)

    params = {
        # convs in HWIO
        "conv_a_w": kaiming(ks[0], (3, 3, inplanes, planes), 9 * inplanes),
        "conv_b_w": kaiming(ks[1], (3, 3, planes, planes), 9 * planes),
        # BN (eval-mode stats)
        "bn_a_gamma": 1.0 + 0.1 * jax.random.normal(ks[2], (planes,), jnp.float32),
        "bn_a_beta": 0.1 * jax.random.normal(ks[3], (planes,), jnp.float32),
        "bn_a_mean": 0.1 * jax.random.normal(ks[4], (planes,), jnp.float32),
        "bn_a_var": 1.0 + jax.random.uniform(ks[5], (planes,), jnp.float32),
        "bn_b_gamma": 1.0 + 0.1 * jax.random.normal(ks[6], (planes,), jnp.float32),
        "bn_b_beta": 0.1 * jax.random.normal(ks[7], (planes,), jnp.float32),
        "bn_b_mean": 0.1 * jax.random.normal(ks[8], (planes,), jnp.float32),
        "bn_b_var": 1.0 + jax.random.uniform(ks[9], (planes,), jnp.float32),
        # MaskBlock 1: fc1 (hidden, inplanes) no bias, fc2 (planes, hidden) + bias=1
        "mb1_w1": kaiming(jax.random.fold_in(key, 101), (hidden, inplanes), inplanes),
        "mb1_w2": kaiming(jax.random.fold_in(key, 102), (planes, hidden), hidden),
        "mb1_b2": jnp.ones((planes,), jnp.float32),
        # MaskBlock 2
        "mb2_w1": kaiming(jax.random.fold_in(key, 103), (hidden, planes), planes),
        "mb2_w2": kaiming(jax.random.fold_in(key, 104), (planes, hidden), hidden),
        "mb2_b2": jnp.ones((planes,), jnp.float32),
    }
    return params


if __name__ == "__main__":
    # args: clamp_max=1.0, squeeze_rate=4, thre_init=0.1; stride=1, downsample=None
    N, C, H, W = 2, 16, 16, 16          # inplanes = planes = 16 (CIFAR ResNet)
    clamp_max, squeeze_rate, thre = 1.0, 4, 0.1

    key = jax.random.PRNGKey(0)
    kx, kp = jax.random.split(key)
    x = jax.random.normal(kx, (N, H, W, C), jnp.float32)    # NHWC
    params = init_params(kp, C, C, squeeze_rate)

    state = [x, [], [], [], []]
    out_state = masked_basicblock_forward(state, params, clamp_max, thre)
    out = jax.block_until_ready(out_state[0])

    ref = ref_forward(x, params, clamp_max, thre)
    np.testing.assert_allclose(np.asarray(out), np.asarray(ref), rtol=1e-4, atol=1e-4)

    print("KERNEL_OK")
</pallas_src>

<mosaic_0001>
module attributes {stable_mosaic.version = 11 : i64} {
  func.func @_masked_basicblock_kernel(%arg0: i32, %arg1: memref<1x16x16x16xf32, #tpu.memory_space<vmem>>, %arg2: memref<3x3x16x16xf32, #tpu.memory_space<vmem>>, %arg3: memref<1x16xf32, #tpu.memory_space<vmem>>, %arg4: memref<1x16xf32, #tpu.memory_space<vmem>>, %arg5: memref<3x3x16x16xf32, #tpu.memory_space<vmem>>, %arg6: memref<1x16xf32, #tpu.memory_space<vmem>>, %arg7: memref<1x16xf32, #tpu.memory_space<vmem>>, %arg8: memref<16x8xf32, #tpu.memory_space<vmem>>, %arg9: memref<8x16xf32, #tpu.memory_space<vmem>>, %arg10: memref<1x16xf32, #tpu.memory_space<vmem>>, %arg11: memref<16x8xf32, #tpu.memory_space<vmem>>, %arg12: memref<8x16xf32, #tpu.memory_space<vmem>>, %arg13: memref<1x16xf32, #tpu.memory_space<vmem>>, %arg14: memref<1x16x16x16xf32, #tpu.memory_space<vmem>>, %arg15: memref<1x8x128xf32, #tpu.memory_space<vmem>>, %arg16: memref<18x32x16xf32, #tpu.memory_space<vmem>>, %arg17: memref<18x32x16xf32, #tpu.memory_space<vmem>>) attributes {dimension_semantics = [#tpu.dimension_semantics<parallel>], iteration_bounds = array<i64: 2>, scalar_prefetch = 0 : i64, scratch_operands = 2 : i64, tpu.core_type = #tpu.core_type<tc>, window_params = [{transform_indices = @transform_0, window_bounds = array<i64: 1, 16, 16, 16>}, {pipeline_mode = #tpu.pipeline_mode<synchronous>, transform_indices = @transform_1, window_bounds = array<i64: 3, 3, 16, 16>}, {pipeline_mode = #tpu.pipeline_mode<synchronous>, transform_indices = @transform_2, window_bounds = array<i64: 1, 16>}, {pipeline_mode = #tpu.pipeline_mode<synchronous>, transform_indices = @transform_3, window_bounds = array<i64: 1, 16>}, {pipeline_mode = #tpu.pipeline_mode<synchronous>, transform_indices = @transform_4, window_bounds = array<i64: 3, 3, 16, 16>}, {pipeline_mode = #tpu.pipeline_mode<synchronous>, transform_indices = @transform_5, window_bounds = array<i64: 1, 16>}, {pipeline_mode = #tpu.pipeline_mode<synchronous>, transform_indices = @transform_6, window_bounds = array<i64: 1, 16>}, {pipeline_mode = #tpu.pipeline_mode<synchronous>, transform_indices = @transform_7, window_bounds = array<i64: 16, 8>}, {pipeline_mode = #tpu.pipeline_mode<synchronous>, transform_indices = @transform_8, window_bounds = array<i64: 8, 16>}, {pipeline_mode = #tpu.pipeline_mode<synchronous>, transform_indices = @transform_9, window_bounds = array<i64: 1, 16>}, {pipeline_mode = #tpu.pipeline_mode<synchronous>, transform_indices = @transform_10, window_bounds = array<i64: 16, 8>}, {pipeline_mode = #tpu.pipeline_mode<synchronous>, transform_indices = @transform_11, window_bounds = array<i64: 8, 16>}, {pipeline_mode = #tpu.pipeline_mode<synchronous>, transform_indices = @transform_12, window_bounds = array<i64: 1, 16>}, {transform_indices = @transform_13, window_bounds = array<i64: 1, 16, 16, 16>}, {transform_indices = @transform_14, window_bounds = array<i64: 1, 8, 128>}]} {
    %c0 = arith.constant 0 : index
    %c0_0 = arith.constant 0 : index
    %c0_1 = arith.constant 0 : index
    %c0_2 = arith.constant 0 : index
    %0 = vector.load %arg1[%c0, %c0_0, %c0_1, %c0_2] : memref<1x16x16x16xf32, #tpu.memory_space<vmem>>, vector<1x16x16x16xf32>
    %1 = vector.shape_cast %0 : vector<1x16x16x16xf32> to vector<16x16x16xf32>
    %cst = arith.constant 0.000000e+00 : f32
    %2 = vector.broadcast %cst : f32 to vector<18x32x16xf32>
    %c0_3 = arith.constant 0 : index
    %c0_4 = arith.constant 0 : index
    %c0_5 = arith.constant 0 : index
    %3 = vector.load %arg16[%c0_3, %c0_4, %c0_5] : memref<18x32x16xf32, #tpu.memory_space<vmem>>, vector<18x32x16xf32>
    tpu.vector_store %arg16[%c0_3, %c0_4, %c0_5], %2 {strides = array<i32>} : memref<18x32x16xf32, #tpu.memory_space<vmem>>, vector<18x32x16xf32>,
    %c1 = arith.constant 1 : index
    %c8 = arith.constant 8 : index
    %c0_6 = arith.constant 0 : index
    %4 = vector.load %arg16[%c1, %c8, %c0_6] : memref<18x32x16xf32, #tpu.memory_space<vmem>>, vector<16x16x16xf32>
    tpu.vector_store %arg16[%c1, %c8, %c0_6], %1 {strides = array<i32>} : memref<18x32x16xf32, #tpu.memory_space<vmem>>, vector<16x16x16xf32>,
    %5 = vector.shape_cast %1 : vector<16x16x16xf32> to vector<256x16xf32>
    %cst_7 = arith.constant dense<0.000000e+00> : vector<16xf32>
    %6 = vector.multi_reduction <add>, %5, %cst_7 [0] : vector<256x16xf32> to vector<16xf32>
    %7 = vector.shape_cast %6 : vector<16xf32> to vector<1x16xf32>
    %cst_8 = arith.constant 2.560000e+02 : f32
    %8 = vector.broadcast %cst_8 : f32 to vector<1x16xf32>
    %9 = arith.divf %7, %8 : vector<1x16xf32>
    %c0_9 = arith.constant 0 : index
    %c0_10 = arith.constant 0 : index
    %10 = vector.load %arg8[%c0_9, %c0_10] : memref<16x8xf32, #tpu.memory_space<vmem>>, vector<16x8xf32>
    %c0_11 = arith.constant 0 : index
    %c0_12 = arith.constant 0 : index
    %11 = vector.load %arg9[%c0_11, %c0_12] : memref<8x16xf32, #tpu.memory_space<vmem>>, vector<8x16xf32>
    %c0_13 = arith.constant 0 : index
    %c0_14 = arith.constant 0 : index
    %12 = vector.load %arg10[%c0_13, %c0_14] : memref<1x16xf32, #tpu.memory_space<vmem>>, vector<1x16xf32>
    %cst_15 = arith.constant dense<0.000000e+00> : vector<1x8xf32>
    %13 = tpu.matmul %9, %10, %cst_15 {dimension_numbers = #tpu.dot_dimension_numbers<[1], [0], [0], [1], [0, 0, 1, 1], [], []>} : vector<1x16xf32>, vector<16x8xf32>, vector<1x8xf32> -> vector<1x8xf32>
    %cst_16 = arith.constant 0.000000e+00 : f32
    %14 = vector.broadcast %cst_16 : f32 to vector<1x8xf32>
    %15 = arith.maximumf %13, %14 : vector<1x8xf32>
    %cst_17 = arith.constant dense<0.000000e+00> : vector<1x16xf32>
    %16 = tpu.matmul %15, %11, %cst_17 {dimension_numbers = #tpu.dot_dimension_numbers<[1], [0], [0], [1], [0, 0, 1, 1], [], []>} : vector<1x8xf32>, vector<8x16xf32>, vector<1x16xf32> -> vector<1x16xf32>
    %17 = arith.addf %16, %12 : vector<1x16xf32>
    %cst_18 = arith.constant 0.000000e+00 : f32
    %18 = vector.broadcast %cst_18 : f32 to vector<1x16xf32>
    %19 = arith.maximumf %17, %18 : vector<1x16xf32>
    %cst_19 = arith.constant 1.000000e+00 : f32
    %20 = vector.broadcast %cst_19 : f32 to vector<1x16xf32>
    %21 = arith.minimumf %19, %20 : vector<1x16xf32>
    %cst_20 = arith.constant 1.000000e-01 : f32
    %22 = vector.broadcast %cst_20 : f32 to vector<1x16xf32>
    %23 = arith.cmpf olt, %21, %22 : vector<1x16xf32>
    %cst_21 = arith.constant 0.000000e+00 : f32
    %24 = vector.broadcast %cst_21 : f32 to vector<1x16xf32>
    %25 = arith.select %23, %24, %21 : vector<1x16xi1>, vector<1x16xf32>
    %c0_22 = arith.constant 0 : index
    %c7 = arith.constant 7 : index
    %c0_23 = arith.constant 0 : index
    %26 = vector.load %arg16[%c0_22, %c7, %c0_23] : memref<18x32x16xf32, #tpu.memory_space<vmem>>, vector<16x16x16xf32>
    %27 = vector.shape_cast %26 : vector<16x16x16xf32> to vector<256x16xf32>
    %c0_24 = arith.constant 0 : index
    %c0_25 = arith.constant 0 : index
    %c0_26 = arith.constant 0 : index
    %c0_27 = arith.constant 0 : index
    %28 = vector.load %arg2[%c0_24, %c0_25, %c0_26, %c0_27] : memref<3x3x16x16xf32, #tpu.memory_space<vmem>>, vector<1x1x16x16xf32>
    %29 = vector.shape_cast %28 : vector<1x1x16x16xf32> to vector<16x16xf32>
    %cst_28 = arith.constant dense<0.000000e+00> : vector<256x16xf32>
    %30 = tpu.matmul %27, %29, %cst_28 {dimension_numbers = #tpu.dot_dimension_numbers<[1], [0], [0], [1], [0, 0, 1, 1], [], []>} : vector<256x16xf32>, vector<16x16xf32>, vector<256x16xf32> -> vector<256x16xf32>
    %c0_29 = arith.constant 0 : index
    %c8_30 = arith.constant 8 : index
    %c0_31 = arith.constant 0 : index
    %31 = vector.load %arg16[%c0_29, %c8_30, %c0_31] : memref<18x32x16xf32, #tpu.memory_space<vmem>>, vector<16x16x16xf32>
    %32 = vector.shape_cast %31 : vector<16x16x16xf32> to vector<256x16xf32>
    %c0_32 = arith.constant 0 : index
    %c1_33 = arith.constant 1 : index
    %c0_34 = arith.constant 0 : index
    %c0_35 = arith.constant 0 : index
    %33 = vector.load %arg2[%c0_32, %c1_33, %c0_34, %c0_35] : memref<3x3x16x16xf32, #tpu.memory_space<vmem>>, vector<1x1x16x16xf32>
    %34 = vector.shape_cast %33 : vector<1x1x16x16xf32> to vector<16x16xf32>
    %cst_36 = arith.constant dense<0.000000e+00> : vector<256x16xf32>
    %35 = tpu.matmul %32, %34, %cst_36 {dimension_numbers = #tpu.dot_dimension_numbers<[1], [0], [0], [1], [0, 0, 1, 1], [], []>} : vector<256x16xf32>, vector<16x16xf32>, vector<256x16xf32> -> vector<256x16xf32>
    %36 = arith.addf %30, %35 : vector<256x16xf32>
    %c0_37 = arith.constant 0 : index
    %c9 = arith.constant 9 : index
    %c0_38 = arith.constant 0 : index
    %37 = vector.load %arg16[%c0_37, %c9, %c0_38] : memref<18x32x16xf32, #tpu.memory_space<vmem>>, vector<16x16x16xf32>
    %38 = vector.shape_cast %37 : vector<16x16x16xf32> to vector<256x16xf32>
    %c0_39 = arith.constant 0 : index
    %c2 = arith.constant 2 : index
    %c0_40 = arith.constant 0 : index
    %c0_41 = arith.constant 0 : index
    %39 = vector.load %arg2[%c0_39, %c2, %c0_40, %c0_41] : memref<3x3x16x16xf32, #tpu.memory_space<vmem>>, vector<1x1x16x16xf32>
    %40 = vector.shape_cast %39 : vector<1x1x16x16xf32> to vector<16x16xf32>
    %cst_42 = arith.constant dense<0.000000e+00> : vector<256x16xf32>
    %41 = tpu.matmul %38, %40, %cst_42 {dimension_numbers = #tpu.dot_dimension_numbers<[1], [0], [0], [1], [0, 0, 1, 1], [], []>} : vector<256x16xf32>, vector<16x16xf32>, vector<256x16xf32> -> vector<256x16xf32>
    %42 = arith.addf %36, %41 : vector<256x16xf32>
    %c1_43 = arith.constant 1 : index
    %c7_44 = arith.constant 7 : index
    %c0_45 = arith.constant 0 : index
    %43 = vector.load %arg16[%c1_43, %c7_44, %c0_45] : memref<18x32x16xf32, #tpu.memory_space<vmem>>, vector<16x16x16xf32>
    %44 = vector.shape_cast %43 : vector<16x16x16xf32> to vector<256x16xf32>
    %c1_46 = arith.constant 1 : index
    %c0_47 = arith.constant 0 : index
    %c0_48 = arith.constant 0 : index
    %c0_49 = arith.constant 0 : index
    %45 = vector.load %arg2[%c1_46, %c0_47, %c0_48, %c0_49] : memref<3x3x16x16xf32, #tpu.memory_space<vmem>>, vector<1x1x16x16xf32>
    %46 = vector.shape_cast %45 : vector<1x1x16x16xf32> to vector<16x16xf32>
    %cst_50 = arith.constant dense<0.000000e+00> : vector<256x16xf32>
    %47 = tpu.matmul %44, %46, %cst_50 {dimension_numbers = #tpu.dot_dimension_numbers<[1], [0], [0], [1], [0, 0, 1, 1], [], []>} : vector<256x16xf32>, vector<16x16xf32>, vector<256x16xf32> -> vector<256x16xf32>
    %48 = arith.addf %42, %47 : vector<256x16xf32>
    %c1_51 = arith.constant 1 : index
    %c8_52 = arith.constant 8 : index
    %c0_53 = arith.constant 0 : index
    %49 = vector.load %arg16[%c1_51, %c8_52, %c0_53] : memref<18x32x16xf32, #tpu.memory_space<vmem>>, vector<16x16x16xf32>
    %50 = vector.shape_cast %49 : vector<16x16x16xf32> to vector<256x16xf32>
    %c1_54 = arith.constant 1 : index
    %c1_55 = arith.constant 1 : index
    %c0_56 = arith.constant 0 : index
    %c0_57 = arith.constant 0 : index
    %51 = vector.load %arg2[%c1_54, %c1_55, %c0_56, %c0_57] : memref<3x3x16x16xf32, #tpu.memory_space<vmem>>, vector<1x1x16x16xf32>
    %52 = vector.shape_cast %51 : vector<1x1x16x16xf32> to vector<16x16xf32>
    %cst_58 = arith.constant dense<0.000000e+00> : vector<256x16xf32>
    %53 = tpu.matmul %50, %52, %cst_58 {dimension_numbers = #tpu.dot_dimension_numbers<[1], [0], [0], [1], [0, 0, 1, 1], [], []>} : vector<256x16xf32>, vector<16x16xf32>, vector<256x16xf32> -> vector<256x16xf32>
    %54 = arith.addf %48, %53 : vector<256x16xf32>
    %c1_59 = arith.constant 1 : index
    %c9_60 = arith.constant 9 : index
    %c0_61 = arith.constant 0 : index
    %55 = vector.load %arg16[%c1_59, %c9_60, %c0_61] : memref<18x32x16xf32, #tpu.memory_space<vmem>>, vector<16x16x16xf32>
    %56 = vector.shape_cast %55 : vector<16x16x16xf32> to vector<256x16xf32>
    %c1_62 = arith.constant 1 : index
    %c2_63 = arith.constant 2 : index
    %c0_64 = arith.constant 0 : index
    %c0_65 = arith.constant 0 : index
    %57 = vector.load %arg2[%c1_62, %c2_63, %c0_64, %c0_65] : memref<3x3x16x16xf32, #tpu.memory_space<vmem>>, vector<1x1x16x16xf32>
    %58 = vector.shape_cast %57 : vector<1x1x16x16xf32> to vector<16x16xf32>
    %cst_66 = arith.constant dense<0.000000e+00> : vector<256x16xf32>
    %59 = tpu.matmul %56, %58, %cst_66 {dimension_numbers = #tpu.dot_dimension_numbers<[1], [0], [0], [1], [0, 0, 1, 1], [], []>} : vector<256x16xf32>, vector<16x16xf32>, vector<256x16xf32> -> vector<256x16xf32>
    %60 = arith.addf %54, %59 : vector<256x16xf32>
    %c2_67 = arith.constant 2 : index
    %c7_68 = arith.constant 7 : index
    %c0_69 = arith.constant 0 : index
    %61 = vector.load %arg16[%c2_67, %c7_68, %c0_69] : memref<18x32x16xf32, #tpu.memory_space<vmem>>, vector<16x16x16xf32>
    %62 = vector.shape_cast %61 : vector<16x16x16xf32> to vector<256x16xf32>
    %c2_70 = arith.constant 2 : index
    %c0_71 = arith.constant 0 : index
    %c0_72 = arith.constant 0 : index
    %c0_73 = arith.constant 0 : index
    %63 = vector.load %arg2[%c2_70, %c0_71, %c0_72, %c0_73] : memref<3x3x16x16xf32, #tpu.memory_space<vmem>>, vector<1x1x16x16xf32>
    %64 = vector.shape_cast %63 : vector<1x1x16x16xf32> to vector<16x16xf32>
    %cst_74 = arith.constant dense<0.000000e+00> : vector<256x16xf32>
    %65 = tpu.matmul %62, %64, %cst_74 {dimension_numbers = #tpu.dot_dimension_numbers<[1], [0], [0], [1], [0, 0, 1, 1], [], []>} : vector<256x16xf32>, vector<16x16xf32>, vector<256x16xf32> -> vector<256x16xf32>
    %66 = arith.addf %60, %65 : vector<256x16xf32>
    %c2_75 = arith.constant 2 : index
    %c8_76 = arith.constant 8 : index
    %c0_77 = arith.constant 0 : index
    %67 = vector.load %arg16[%c2_75, %c8_76, %c0_77] : memref<18x32x16xf32, #tpu.memory_space<vmem>>, vector<16x16x16xf32>
    %68 = vector.shape_cast %67 : vector<16x16x16xf32> to vector<256x16xf32>
    %c2_78 = arith.constant 2 : index
    %c1_79 = arith.constant 1 : index
    %c0_80 = arith.constant 0 : index
    %c0_81 = arith.constant 0 : index
    %69 = vector.load %arg2[%c2_78, %c1_79, %c0_80, %c0_81] : memref<3x3x16x16xf32, #tpu.memory_space<vmem>>, vector<1x1x16x16xf32>
    %70 = vector.shape_cast %69 : vector<1x1x16x16xf32> to vector<16x16xf32>
    %cst_82 = arith.constant dense<0.000000e+00> : vector<256x16xf32>
    %71 = tpu.matmul %68, %70, %cst_82 {dimension_numbers = #tpu.dot_dimension_numbers<[1], [0], [0], [1], [0, 0, 1, 1], [], []>} : vector<256x16xf32>, vector<16x16xf32>, vector<256x16xf32> -> vector<256x16xf32>
    %72 = arith.addf %66, %71 : vector<256x16xf32>
    %c2_83 = arith.constant 2 : index
    %c9_84 = arith.constant 9 : index
    %c0_85 = arith.constant 0 : index
    %73 = vector.load %arg16[%c2_83, %c9_84, %c0_85] : memref<18x32x16xf32, #tpu.memory_space<vmem>>, vector<16x16x16xf32>
    %74 = vector.shape_cast %73 : vector<16x16x16xf32> to vector<256x16xf32>
    %c2_86 = arith.constant 2 : index
    %c2_87 = arith.constant 2 : index
    %c0_88 = arith.constant 0 : index
    %c0_89 = arith.constant 0 : index
    %75 = vector.load %arg2[%c2_86, %c2_87, %c0_88, %c0_89] : memref<3x3x16x16xf32, #tpu.memory_space<vmem>>, vector<1x1x16x16xf32>
    %76 = vector.shape_cast %75 : vector<1x1x16x16xf32> to vector<16x16xf32>
    %cst_90 = arith.constant dense<0.000000e+00> : vector<256x16xf32>
    %77 = tpu.matmul %74, %76, %cst_90 {dimension_numbers = #tpu.dot_dimension_numbers<[1], [0], [0], [1], [0, 0, 1, 1], [], []>} : vector<256x16xf32>, vector<16x16xf32>, vector<256x16xf32> -> vector<256x16xf32>
    %78 = arith.addf %72, %77 : vector<256x16xf32>
    %c0_91 = arith.constant 0 : index
    %c0_92 = arith.constant 0 : index
    %79 = vector.load %arg3[%c0_91, %c0_92] : memref<1x16xf32, #tpu.memory_space<vmem>>, vector<1x16xf32>
    %80 = vector.broadcast %79 : vector<1x16xf32> to vector<256x16xf32>
    %81 = arith.mulf %78, %80 : vector<256x16xf32>
    %c0_93 = arith.constant 0 : index
    %c0_94 = arith.constant 0 : index
    %82 = vector.load %arg4[%c0_93, %c0_94] : memref<1x16xf32, #tpu.memory_space<vmem>>, vector<1x16xf32>
    %83 = vector.broadcast %82 : vector<1x16xf32> to vector<256x16xf32>
    %84 = arith.addf %81, %83 : vector<256x16xf32>
    %cst_95 = arith.constant 0.000000e+00 : f32
    %85 = vector.broadcast %cst_95 : f32 to vector<256x16xf32>
    %86 = arith.maximumf %84, %85 : vector<256x16xf32>
    %cst_96 = arith.constant dense<0.000000e+00> : vector<16xf32>
    %87 = vector.multi_reduction <add>, %86, %cst_96 [0] : vector<256x16xf32> to vector<16xf32>
    %88 = vector.shape_cast %87 : vector<16xf32> to vector<1x16xf32>
    %cst_97 = arith.constant 2.560000e+02 : f32
    %89 = vector.broadcast %cst_97 : f32 to vector<1x16xf32>
    %90 = arith.divf %88, %89 : vector<1x16xf32>
    %91 = vector.broadcast %25 : vector<1x16xf32> to vector<256x16xf32>
    %92 = arith.mulf %86, %91 : vector<256x16xf32>
    %93 = arith.mulf %90, %25 : vector<1x16xf32>
    %c0_98 = arith.constant 0 : index
    %c0_99 = arith.constant 0 : index
    %94 = vector.load %arg11[%c0_98, %c0_99] : memref<16x8xf32, #tpu.memory_space<vmem>>, vector<16x8xf32>
    %c0_100 = arith.constant 0 : index
    %c0_101 = arith.constant 0 : index
    %95 = vector.load %arg12[%c0_100, %c0_101] : memref<8x16xf32, #tpu.memory_space<vmem>>, vector<8x16xf32>
    %c0_102 = arith.constant 0 : index
    %c0_103 = arith.constant 0 : index
    %96 = vector.load %arg13[%c0_102, %c0_103] : memref<1x16xf32, #tpu.memory_space<vmem>>, vector<1x16xf32>
    %cst_104 = arith.constant dense<0.000000e+00> : vector<1x8xf32>
    %97 = tpu.matmul %93, %94, %cst_104 {dimension_numbers = #tpu.dot_dimension_numbers<[1], [0], [0], [1], [0, 0, 1, 1], [], []>} : vector<1x16xf32>, vector<16x8xf32>, vector<1x8xf32> -> vector<1x8xf32>
    %cst_105 = arith.constant 0.000000e+00 : f32
    %98 = vector.broadcast %cst_105 : f32 to vector<1x8xf32>
    %99 = arith.maximumf %97, %98 : vector<1x8xf32>
    %cst_106 = arith.constant dense<0.000000e+00> : vector<1x16xf32>
    %100 = tpu.matmul %99, %95, %cst_106 {dimension_numbers = #tpu.dot_dimension_numbers<[1], [0], [0], [1], [0, 0, 1, 1], [], []>} : vector<1x8xf32>, vector<8x16xf32>, vector<1x16xf32> -> vector<1x16xf32>
    %101 = arith.addf %100, %96 : vector<1x16xf32>
    %cst_107 = arith.constant 0.000000e+00 : f32
    %102 = vector.broadcast %cst_107 : f32 to vector<1x16xf32>
    %103 = arith.maximumf %101, %102 : vector<1x16xf32>
    %cst_108 = arith.constant 1.000000e+00 : f32
    %104 = vector.broadcast %cst_108 : f32 to vector<1x16xf32>
    %105 = arith.minimumf %103, %104 : vector<1x16xf32>
    %cst_109 = arith.constant 1.000000e-01 : f32
    %106 = vector.broadcast %cst_109 : f32 to vector<1x16xf32>
    %107 = arith.cmpf olt, %105, %106 : vector<1x16xf32>
    %cst_110 = arith.constant 0.000000e+00 : f32
    %108 = vector.broadcast %cst_110 : f32 to vector<1x16xf32>
    %109 = arith.select %107, %108, %105 : vector<1x16xi1>, vector<1x16xf32>
    %cst_111 = arith.constant 0.000000e+00 : f32
    %110 = vector.broadcast %cst_111 : f32 to vector<18x32x16xf32>
    %c0_112 = arith.constant 0 : index
    %c0_113 = arith.constant 0 : index
    %c0_114 = arith.constant 0 : index
    %111 = vector.load %arg17[%c0_112, %c0_113, %c0_114] : memref<18x32x16xf32, #tpu.memory_space<vmem>>, vector<18x32x16xf32>
    tpu.vector_store %arg17[%c0_112, %c0_113, %c0_114], %110 {strides = array<i32>} : memref<18x32x16xf32, #tpu.memory_space<vmem>>, vector<18x32x16xf32>,
    %112 = vector.shape_cast %92 : vector<256x16xf32> to vector<16x16x16xf32>
    %c1_115 = arith.constant 1 : index
    %c8_116 = arith.constant 8 : index
    %c0_117 = arith.constant 0 : index
    %113 = vector.load %arg17[%c1_115, %c8_116, %c0_117] : memref<18x32x16xf32, #tpu.memory_space<vmem>>, vector<16x16x16xf32>
    tpu.vector_store %arg17[%c1_115, %c8_116, %c0_117], %112 {strides = array<i32>} : memref<18x32x16xf32, #tpu.memory_space<vmem>>, vector<16x16x16xf32>,
    %c0_118 = arith.constant 0 : index
    %c7_119 = arith.constant 7 : index
    %c0_120 = arith.constant 0 : index
    %114 = vector.load %arg17[%c0_118, %c7_119, %c0_120] : memref<18x32x16xf32, #tpu.memory_space<vmem>>, vector<16x16x16xf32>
    %115 = vector.shape_cast %114 : vector<16x16x16xf32> to vector<256x16xf32>
    %c0_121 = arith.constant 0 : index
    %c0_122 = arith.constant 0 : index
    %c0_123 = arith.constant 0 : index
    %c0_124 = arith.constant 0 : index
    %116 = vector.load %arg5[%c0_121, %c0_122, %c0_123, %c0_124] : memref<3x3x16x16xf32, #tpu.memory_space<vmem>>, vector<1x1x16x16xf32>
    %117 = vector.shape_cast %116 : vector<1x1x16x16xf32> to vector<16x16xf32>
    %cst_125 = arith.constant dense<0.000000e+00> : vector<256x16xf32>
    %118 = tpu.matmul %115, %117, %cst_125 {dimension_numbers = #tpu.dot_dimension_numbers<[1], [0], [0], [1], [0, 0, 1, 1], [], []>} : vector<256x16xf32>, vector<16x16xf32>, vector<256x16xf32> -> vector<256x16xf32>
    %c0_126 = arith.constant 0 : index
    %c8_127 = arith.constant 8 : index
    %c0_128 = arith.constant 0 : index
    %119 = vector.load %arg17[%c0_126, %c8_127, %c0_128] : memref<18x32x16xf32, #tpu.memory_space<vmem>>, vector<16x16x16xf32>
    %120 = vector.shape_cast %119 : vector<16x16x16xf32> to vector<256x16xf32>
    %c0_129 = arith.constant 0 : index
    %c1_130 = arith.constant 1 : index
    %c0_131 = arith.constant 0 : index
    %c0_132 = arith.constant 0 : index
    %121 = vector.load %arg5[%c0_129, %c1_130, %c0_131, %c0_132] : memref<3x3x16x16xf32, #tpu.memory_space<vmem>>, vector<1x1x16x16xf32>
    %122 = vector.shape_cast %121 : vector<1x1x16x16xf32> to vector<16x16xf32>
    %cst_133 = arith.constant dense<0.000000e+00> : vector<256x16xf32>
    %123 = tpu.matmul %120, %122, %cst_133 {dimension_numbers = #tpu.dot_dimension_numbers<[1], [0], [0], [1], [0, 0, 1, 1], [], []>} : vector<256x16xf32>, vector<16x16xf32>, vector<256x16xf32> -> vector<256x16xf32>
    %124 = arith.addf %118, %123 : vector<256x16xf32>
    %c0_134 = arith.constant 0 : index
    %c9_135 = arith.constant 9 : index
    %c0_136 = arith.constant 0 : index
    %125 = vector.load %arg17[%c0_134, %c9_135, %c0_136] : memref<18x32x16xf32, #tpu.memory_space<vmem>>, vector<16x16x16xf32>
    %126 = vector.shape_cast %125 : vector<16x16x16xf32> to vector<256x16xf32>
    %c0_137 = arith.constant 0 : index
    %c2_138 = arith.constant 2 : index
    %c0_139 = arith.constant 0 : index
    %c0_140 = arith.constant 0 : index
    %127 = vector.load %arg5[%c0_137, %c2_138, %c0_139, %c0_140] : memref<3x3x16x16xf32, #tpu.memory_space<vmem>>, vector<1x1x16x16xf32>
    %128 = vector.shape_cast %127 : vector<1x1x16x16xf32> to vector<16x16xf32>
    %cst_141 = arith.constant dense<0.000000e+00> : vector<256x16xf32>
    %129 = tpu.matmul %126, %128, %cst_141 {dimension_numbers = #tpu.dot_dimension_numbers<[1], [0], [0], [1], [0, 0, 1, 1], [], []>} : vector<256x16xf32>, vector<16x16xf32>, vector<256x16xf32> -> vector<256x16xf32>
    %130 = arith.addf %124, %129 : vector<256x16xf32>
    %c1_142 = arith.constant 1 : index
    %c7_143 = arith.constant 7 : index
    %c0_144 = arith.constant 0 : index
    %131 = vector.load %arg17[%c1_142, %c7_143, %c0_144] : memref<18x32x16xf32, #tpu.memory_space<vmem>>, vector<16x16x16xf32>
    %132 = vector.shape_cast %131 : vector<16x16x16xf32> to vector<256x16xf32>
    %c1_145 = arith.constant 1 : index
    %c0_146 = arith.constant 0 : index
    %c0_147 = arith.constant 0 : index
    %c0_148 = arith.constant 0 : index
    %133 = vector.load %arg5[%c1_145, %c0_146, %c0_147, %c0_148] : memref<3x3x16x16xf32, #tpu.memory_space<vmem>>, vector<1x1x16x16xf32>
    %134 = vector.shape_cast %133 : vector<1x1x16x16xf32> to vector<16x16xf32>
    %cst_149 = arith.constant dense<0.000000e+00> : vector<256x16xf32>
    %135 = tpu.matmul %132, %134, %cst_149 {dimension_numbers = #tpu.dot_dimension_numbers<[1], [0], [0], [1], [0, 0, 1, 1], [], []>} : vector<256x16xf32>, vector<16x16xf32>, vector<256x16xf32> -> vector<256x16xf32>
    %136 = arith.addf %130, %135 : vector<256x16xf32>
    %c1_150 = arith.constant 1 : index
    %c8_151 = arith.constant 8 : index
    %c0_152 = arith.constant 0 : index
    %137 = vector.load %arg17[%c1_150, %c8_151, %c0_152] : memref<18x32x16xf32, #tpu.memory_space<vmem>>, vector<16x16x16xf32>
    %138 = vector.shape_cast %137 : vector<16x16x16xf32> to vector<256x16xf32>
    %c1_153 = arith.constant 1 : index
    %c1_154 = arith.constant 1 : index
    %c0_155 = arith.constant 0 : index
    %c0_156 = arith.constant 0 : index
    %139 = vector.load %arg5[%c1_153, %c1_154, %c0_155, %c0_156] : memref<3x3x16x16xf32, #tpu.memory_space<vmem>>, vector<1x1x16x16xf32>
    %140 = vector.shape_cast %139 : vector<1x1x16x16xf32> to vector<16x16xf32>
    %cst_157 = arith.constant dense<0.000000e+00> : vector<256x16xf32>
    %141 = tpu.matmul %138, %140, %cst_157 {dimension_numbers = #tpu.dot_dimension_numbers<[1], [0], [0], [1], [0, 0, 1, 1], [], []>} : vector<256x16xf32>, vector<16x16xf32>, vector<256x16xf32> -> vector<256x16xf32>
    %142 = arith.addf %136, %141 : vector<256x16xf32>
    %c1_158 = arith.constant 1 : index
    %c9_159 = arith.constant 9 : index
    %c0_160 = arith.constant 0 : index
    %143 = vector.load %arg17[%c1_158, %c9_159, %c0_160] : memref<18x32x16xf32, #tpu.memory_space<vmem>>, vector<16x16x16xf32>
    %144 = vector.shape_cast %143 : vector<16x16x16xf32> to vector<256x16xf32>
    %c1_161 = arith.constant 1 : index
    %c2_162 = arith.constant 2 : index
    %c0_163 = arith.constant 0 : index
    %c0_164 = arith.constant 0 : index
    %145 = vector.load %arg5[%c1_161, %c2_162, %c0_163, %c0_164] : memref<3x3x16x16xf32, #tpu.memory_space<vmem>>, vector<1x1x16x16xf32>
    %146 = vector.shape_cast %145 : vector<1x1x16x16xf32> to vector<16x16xf32>
    %cst_165 = arith.constant dense<0.000000e+00> : vector<256x16xf32>
    %147 = tpu.matmul %144, %146, %cst_165 {dimension_numbers = #tpu.dot_dimension_numbers<[1], [0], [0], [1], [0, 0, 1, 1], [], []>} : vector<256x16xf32>, vector<16x16xf32>, vector<256x16xf32> -> vector<256x16xf32>
    %148 = arith.addf %142, %147 : vector<256x16xf32>
    %c2_166 = arith.constant 2 : index
    %c7_167 = arith.constant 7 : index
    %c0_168 = arith.constant 0 : index
    %149 = vector.load %arg17[%c2_166, %c7_167, %c0_168] : memref<18x32x16xf32, #tpu.memory_space<vmem>>, vector<16x16x16xf32>
    %150 = vector.shape_cast %149 : vector<16x16x16xf32> to vector<256x16xf32>
    %c2_169 = arith.constant 2 : index
    %c0_170 = arith.constant 0 : index
    %c0_171 = arith.constant 0 : index
    %c0_172 = arith.constant 0 : index
    %151 = vector.load %arg5[%c2_169, %c0_170, %c0_171, %c0_172] : memref<3x3x16x16xf32, #tpu.memory_space<vmem>>, vector<1x1x16x16xf32>
    %152 = vector.shape_cast %151 : vector<1x1x16x16xf32> to vector<16x16xf32>
    %cst_173 = arith.constant dense<0.000000e+00> : vector<256x16xf32>
    %153 = tpu.matmul %150, %152, %cst_173 {dimension_numbers = #tpu.dot_dimension_numbers<[1], [0], [0], [1], [0, 0, 1, 1], [], []>} : vector<256x16xf32>, vector<16x16xf32>, vector<256x16xf32> -> vector<256x16xf32>
    %154 = arith.addf %148, %153 : vector<256x16xf32>
    %c2_174 = arith.constant 2 : index
    %c8_175 = arith.constant 8 : index
    %c0_176 = arith.constant 0 : index
    %155 = vector.load %arg17[%c2_174, %c8_175, %c0_176] : memref<18x32x16xf32, #tpu.memory_space<vmem>>, vector<16x16x16xf32>
    %156 = vector.shape_cast %155 : vector<16x16x16xf32> to vector<256x16xf32>
    %c2_177 = arith.constant 2 : index
    %c1_178 = arith.constant 1 : index
    %c0_179 = arith.constant 0 : index
    %c0_180 = arith.constant 0 : index
    %157 = vector.load %arg5[%c2_177, %c1_178, %c0_179, %c0_180] : memref<3x3x16x16xf32, #tpu.memory_space<vmem>>, vector<1x1x16x16xf32>
    %158 = vector.shape_cast %157 : vector<1x1x16x16xf32> to vector<16x16xf32>
    %cst_181 = arith.constant dense<0.000000e+00> : vector<256x16xf32>
    %159 = tpu.matmul %156, %158, %cst_181 {dimension_numbers = #tpu.dot_dimension_numbers<[1], [0], [0], [1], [0, 0, 1, 1], [], []>} : vector<256x16xf32>, vector<16x16xf32>, vector<256x16xf32> -> vector<256x16xf32>
    %160 = arith.addf %154, %159 : vector<256x16xf32>
    %c2_182 = arith.constant 2 : index
    %c9_183 = arith.constant 9 : index
    %c0_184 = arith.constant 0 : index
    %161 = vector.load %arg17[%c2_182, %c9_183, %c0_184] : memref<18x32x16xf32, #tpu.memory_space<vmem>>, vector<16x16x16xf32>
    %162 = vector.shape_cast %161 : vector<16x16x16xf32> to vector<256x16xf32>
    %c2_185 = arith.constant 2 : index
    %c2_186 = arith.constant 2 : index
    %c0_187 = arith.constant 0 : index
    %c0_188 = arith.constant 0 : index
    %163 = vector.load %arg5[%c2_185, %c2_186, %c0_187, %c0_188] : memref<3x3x16x16xf32, #tpu.memory_space<vmem>>, vector<1x1x16x16xf32>
    %164 = vector.shape_cast %163 : vector<1x1x16x16xf32> to vector<16x16xf32>
    %cst_189 = arith.constant dense<0.000000e+00> : vector<256x16xf32>
    %165 = tpu.matmul %162, %164, %cst_189 {dimension_numbers = #tpu.dot_dimension_numbers<[1], [0], [0], [1], [0, 0, 1, 1], [], []>} : vector<256x16xf32>, vector<16x16xf32>, vector<256x16xf32> -> vector<256x16xf32>
    %166 = arith.addf %160, %165 : vector<256x16xf32>
    %c0_190 = arith.constant 0 : index
    %c0_191 = arith.constant 0 : index
    %167 = vector.load %arg6[%c0_190, %c0_191] : memref<1x16xf32, #tpu.memory_space<vmem>>, vector<1x16xf32>
    %168 = vector.broadcast %167 : vector<1x16xf32> to vector<256x16xf32>
    %169 = arith.mulf %166, %168 : vector<256x16xf32>
    %c0_192 = arith.constant 0 : index
    %c0_193 = arith.constant 0 : index
    %170 = vector.load %arg7[%c0_192, %c0_193] : memref<1x16xf32, #tpu.memory_space<vmem>>, vector<1x16xf32>
    %171 = vector.broadcast %170 : vector<1x16xf32> to vector<256x16xf32>
    %172 = arith.addf %169, %171 : vector<256x16xf32>
    %cst_194 = arith.constant dense<0.000000e+00> : vector<16xf32>
    %173 = vector.multi_reduction <add>, %172, %cst_194 [0] : vector<256x16xf32> to vector<16xf32>
    %174 = vector.shape_cast %173 : vector<16xf32> to vector<1x16xf32>
    %cst_195 = arith.constant 2.560000e+02 : f32
    %175 = vector.broadcast %cst_195 : f32 to vector<1x16xf32>
    %176 = arith.divf %174, %175 : vector<1x16xf32>
    %177 = vector.shape_cast %1 : vector<16x16x16xf32> to vector<256x16xf32>
    %178 = vector.broadcast %109 : vector<1x16xf32> to vector<256x16xf32>
    %179 = arith.mulf %172, %178 : vector<256x16xf32>
    %180 = arith.addf %177, %179 : vector<256x16xf32>
    %cst_196 = arith.constant 0.000000e+00 : f32
    %181 = vector.broadcast %cst_196 : f32 to vector<256x16xf32>
    %182 = arith.maximumf %180, %181 : vector<256x16xf32>
    %183 = vector.shape_cast %182 : vector<256x16xf32> to vector<16x16x16xf32>
    %c0_197 = arith.constant 0 : index
    %c0_198 = arith.constant 0 : index
    %c0_199 = arith.constant 0 : index
    %c0_200 = arith.constant 0 : index
    %184 = vector.load %arg14[%c0_197, %c0_198, %c0_199, %c0_200] : memref<1x16x16x16xf32, #tpu.memory_space<vmem>>, vector<1x16x16x16xf32>
    %185 = vector.shape_cast %184 : vector<1x16x16x16xf32> to vector<16x16x16xf32>
    %186 = vector.shape_cast %183 : vector<16x16x16xf32> to vector<1x16x16x16xf32>
    tpu.vector_store %arg14[%c0_197, %c0_198, %c0_199, %c0_200], %186 {strides = array<i32>} : memref<1x16x16x16xf32, #tpu.memory_space<vmem>>, vector<1x16x16x16xf32>,
    %cst_201 = arith.constant 0.000000e+00 : f32
    %187 = vector.broadcast %cst_201 : f32 to vector<1x8x128xf32>
    %c0_202 = arith.constant 0 : index
    %c0_203 = arith.constant 0 : index
    %c0_204 = arith.constant 0 : index
    %188 = vector.load %arg15[%c0_202, %c0_203, %c0_204] : memref<1x8x128xf32, #tpu.memory_space<vmem>>, vector<1x8x128xf32>
    tpu.vector_store %arg15[%c0_202, %c0_203, %c0_204], %187 {strides = array<i32>} : memref<1x8x128xf32, #tpu.memory_space<vmem>>, vector<1x8x128xf32>,
    %c0_205 = arith.constant 0 : index
    %c0_206 = arith.constant 0 : index
    %c0_207 = arith.constant 0 : index
    %189 = vector.load %arg15[%c0_205, %c0_206, %c0_207] : memref<1x8x128xf32, #tpu.memory_space<vmem>>, vector<1x1x16xf32>
    %190 = vector.shape_cast %189 : vector<1x1x16xf32> to vector<1x16xf32>
    %191 = vector.shape_cast %25 : vector<1x16xf32> to vector<1x1x16xf32>
    tpu.vector_store %arg15[%c0_205, %c0_206, %c0_207], %191 {strides = array<i32>} : memref<1x8x128xf32, #tpu.memory_space<vmem>>, vector<1x1x16xf32>,
    %c0_208 = arith.constant 0 : index
    %c1_209 = arith.constant 1 : index
    %c0_210 = arith.constant 0 : index
    %192 = vector.load %arg15[%c0_208, %c1_209, %c0_210] : memref<1x8x128xf32, #tpu.memory_space<vmem>>, vector<1x1x16xf32>
    %193 = vector.shape_cast %192 : vector<1x1x16xf32> to vector<1x16xf32>
    %194 = vector.shape_cast %21 : vector<1x16xf32> to vector<1x1x16xf32>
    tpu.vector_store %arg15[%c0_208, %c1_209, %c0_210], %194 {strides = array<i32>} : memref<1x8x128xf32, #tpu.memory_space<vmem>>, vector<1x1x16xf32>,
    %c0_211 = arith.constant 0 : index
    %c2_212 = arith.constant 2 : index
    %c0_213 = arith.constant 0 : index
    %195 = vector.load %arg15[%c0_211, %c2_212, %c0_213] : memref<1x8x128xf32, #tpu.memory_space<vmem>>, vector<1x1x16xf32>
    %196 = vector.shape_cast %195 : vector<1x1x16xf32> to vector<1x16xf32>
    %197 = vector.shape_cast %109 : vector<1x16xf32> to vector<1x1x16xf32>
    tpu.vector_store %arg15[%c0_211, %c2_212, %c0_213], %197 {strides = array<i32>} : memref<1x8x128xf32, #tpu.memory_space<vmem>>, vector<1x1x16xf32>,
    %c0_214 = arith.constant 0 : index
    %c3 = arith.constant 3 : index
    %c0_215 = arith.constant 0 : index
    %198 = vector.load %arg15[%c0_214, %c3, %c0_215] : memref<1x8x128xf32, #tpu.memory_space<vmem>>, vector<1x1x16xf32>
    %199 = vector.shape_cast %198 : vector<1x1x16xf32> to vector<1x16xf32>
    %200 = vector.shape_cast %105 : vector<1x16xf32> to vector<1x1x16xf32>
    tpu.vector_store %arg15[%c0_214, %c3, %c0_215], %200 {strides = array<i32>} : memref<1x8x128xf32, #tpu.memory_space<vmem>>, vector<1x1x16xf32>,
    %c0_216 = arith.constant 0 : index
    %c4 = arith.constant 4 : index
    %c0_217 = arith.constant 0 : index
    %201 = vector.load %arg15[%c0_216, %c4, %c0_217] : memref<1x8x128xf32, #tpu.memory_space<vmem>>, vector<1x1x16xf32>
    %202 = vector.shape_cast %201 : vector<1x1x16xf32> to vector<1x16xf32>
    %203 = vector.shape_cast %90 : vector<1x16xf32> to vector<1x1x16xf32>
    tpu.vector_store %arg15[%c0_216, %c4, %c0_217], %203 {strides = array<i32>} : memref<1x8x128xf32, #tpu.memory_space<vmem>>, vector<1x1x16xf32>,
    %c0_218 = arith.constant 0 : index
    %c5 = arith.constant 5 : index
    %c0_219 = arith.constant 0 : index
    %204 = vector.load %arg15[%c0_218, %c5, %c0_219] : memref<1x8x128xf32, #tpu.memory_space<vmem>>, vector<1x1x16xf32>
    %205 = vector.shape_cast %204 : vector<1x1x16xf32> to vector<1x16xf32>
    %206 = vector.shape_cast %176 : vector<1x16xf32> to vector<1x1x16xf32>
    tpu.vector_store %arg15[%c0_218, %c5, %c0_219], %206 {strides = array<i32>} : memref<1x8x128xf32, #tpu.memory_space<vmem>>, vector<1x1x16xf32>,
    return
  }
  func.func @transform_0(%arg0: i32) -> (i32, i32, i32, i32) {
    %c0_i32 = arith.constant 0 : i32
    %c0_i32_0 = arith.constant 0 : i32
    %c0_i32_1 = arith.constant 0 : i32
    %c0_i32_2 = arith.constant 0 : i32
    return %arg0, %c0_i32, %c0_i32_0, %c0_i32_1 : i32, i32, i32, i32
  }
  func.func @transform_1(%arg0: i32) -> (i32, i32, i32, i32) {
    %c0_i32 = arith.constant 0 : i32
    %c0_i32_0 = arith.constant 0 : i32
    %c0_i32_1 = arith.constant 0 : i32
    %c0_i32_2 = arith.constant 0 : i32
    %c0_i32_3 = arith.constant 0 : i32
    return %c0_i32, %c0_i32_0, %c0_i32_1, %c0_i32_2 : i32, i32, i32, i32
  }
  func.func @transform_2(%arg0: i32) -> (i32, i32) {
    %c0_i32 = arith.constant 0 : i32
    %c0_i32_0 = arith.constant 0 : i32
    %c0_i32_1 = arith.constant 0 : i32
    return %c0_i32, %c0_i32_0 : i32, i32
  }
  func.func @transform_3(%arg0: i32) -> (i32, i32) {
    %c0_i32 = arith.constant 0 : i32
    %c0_i32_0 = arith.constant 0 : i32
    %c0_i32_1 = arith.constant 0 : i32
    return %c0_i32, %c0_i32_0 : i32, i32
  }
  func.func @transform_4(%arg0: i32) -> (i32, i32, i32, i32) {
    %c0_i32 = arith.constant 0 : i32
    %c0_i32_0 = arith.constant 0 : i32
    %c0_i32_1 = arith.constant 0 : i32
    %c0_i32_2 = arith.constant 0 : i32
    %c0_i32_3 = arith.constant 0 : i32
    return %c0_i32, %c0_i32_0, %c0_i32_1, %c0_i32_2 : i32, i32, i32, i32
  }
  func.func @transform_5(%arg0: i32) -> (i32, i32) {
    %c0_i32 = arith.constant 0 : i32
    %c0_i32_0 = arith.constant 0 : i32
    %c0_i32_1 = arith.constant 0 : i32
    return %c0_i32, %c0_i32_0 : i32, i32
  }
  func.func @transform_6(%arg0: i32) -> (i32, i32) {
    %c0_i32 = arith.constant 0 : i32
    %c0_i32_0 = arith.constant 0 : i32
    %c0_i32_1 = arith.constant 0 : i32
    return %c0_i32, %c0_i32_0 : i32, i32
  }
  func.func @transform_7(%arg0: i32) -> (i32, i32) {
    %c0_i32 = arith.constant 0 : i32
    %c0_i32_0 = arith.constant 0 : i32
    %c0_i32_1 = arith.constant 0 : i32
    return %c0_i32, %c0_i32_0 : i32, i32
  }
  func.func @transform_8(%arg0: i32) -> (i32, i32) {
    %c0_i32 = arith.constant 0 : i32
    %c0_i32_0 = arith.constant 0 : i32
    %c0_i32_1 = arith.constant 0 : i32
    return %c0_i32, %c0_i32_0 : i32, i32
  }
  func.func @transform_9(%arg0: i32) -> (i32, i32) {
    %c0_i32 = arith.constant 0 : i32
    %c0_i32_0 = arith.constant 0 : i32
    %c0_i32_1 = arith.constant 0 : i32
    return %c0_i32, %c0_i32_0 : i32, i32
  }
  func.func @transform_10(%arg0: i32) -> (i32, i32) {
    %c0_i32 = arith.constant 0 : i32
    %c0_i32_0 = arith.constant 0 : i32
    %c0_i32_1 = arith.constant 0 : i32
    return %c0_i32, %c0_i32_0 : i32, i32
  }
  func.func @transform_11(%arg0: i32) -> (i32, i32) {
    %c0_i32 = arith.constant 0 : i32
    %c0_i32_0 = arith.constant 0 : i32
    %c0_i32_1 = arith.constant 0 : i32
    return %c0_i32, %c0_i32_0 : i32, i32
  }
  func.func @transform_12(%arg0: i32) -> (i32, i32) {
    %c0_i32 = arith.constant 0 : i32
    %c0_i32_0 = arith.constant 0 : i32
    %c0_i32_1 = arith.constant 0 : i32
    return %c0_i32, %c0_i32_0 : i32, i32
  }
  func.func @transform_13(%arg0: i32) -> (i32, i32, i32, i32) {
    %c0_i32 = arith.constant 0 : i32
    %c0_i32_0 = arith.constant 0 : i32
    %c0_i32_1 = arith.constant 0 : i32
    %c0_i32_2 = arith.constant 0 : i32
    return %arg0, %c0_i32, %c0_i32_0, %c0_i32_1 : i32, i32, i32, i32
  }
  func.func @transform_14(%arg0: i32) -> (i32, i32, i32) {
    %c0_i32 = arith.constant 0 : i32
    %c0_i32_0 = arith.constant 0 : i32
    %c0_i32_1 = arith.constant 0 : i32
    return %arg0, %c0_i32, %c0_i32_0 : i32, i32, i32
  }
}

</mosaic_0001>

<bundles_post_ra>
// kernel: tpu_custom_call.1
= control target key start
LH: loop header
LB: loop body
LE: loop exit
PB: predicated region body
PF: predicated region fallthrough
CT: control target
= control target key end

     0   :  { %s14615_s0 = inlined_call_operand.hbm [shape: f32[2,16,16,16], index: 0, kind: input, shape index: {}]   ;;  %s14616_s1 = inlined_call_operand.hbm [shape: f32[3,3,16,16], index: 1, kind: input, shape index: {}]   ;;  %s14617_s2 = inlined_call_operand.vmem [shape: f32[1,16], index: 2, kind: input, shape index: {}]   ;;  %s14618_s3 = inlined_call_operand.vmem [shape: f32[1,16], index: 3, kind: input, shape index: {}]   ;;  %s14619_s4 = inlined_call_operand.hbm [shape: f32[3,3,16,16], index: 4, kind: input, shape index: {}]   ;;  %s14620_s5 = inlined_call_operand.vmem [shape: f32[1,16], index: 5, kind: input, shape index: {}]   ;;  %s14621_s6 = inlined_call_operand.vmem [shape: f32[1,16], index: 6, kind: input, shape index: {}]   ;;  %s14622_s7 = inlined_call_operand.vmem [shape: f32[16,8], index: 7, kind: input, shape index: {}]   ;;  %s14623_s8 = inlined_call_operand.vmem [shape: f32[8,16], index: 8, kind: input, shape index: {}]   ;;  %s14624_s9 = inlined_call_operand.vmem [shape: f32[1,16], index: 9, kind: input, shape index: {}]   ;;  %s14625_s10 = inlined_call_operand.vmem [shape: f32[16,8], index: 10, kind: input, shape index: {}]   ;;  %s14626_s11 = inlined_call_operand.vmem [shape: f32[8,16], index: 11, kind: input, shape index: {}]   ;;  %s14627_s12 = inlined_call_operand.vmem [shape: f32[1,16], index: 12, kind: input, shape index: {}]   ;;  %s14628_s13 = inlined_call_operand.hbm [shape: f32[2,16,16,16], index: 13, kind: output, shape index: {0}]   ;;  %s14629_s14 = inlined_call_operand.hbm [shape: f32[2,8,128], index: 14, kind: output, shape index: {1}]  }
   0x1   :  { %14815 = sst [smem:[#allocation92_spill]] %s14615_s0 }
   0x2   :  { %14816 = sst [smem:[#allocation93_spill]] %s14620_s5 }
   0x3   :  { %14817 = sst [smem:[#allocation94_spill]] %s14621_s6 }
   0x4   :  { %14818 = sst [smem:[#allocation95_spill]] %s14628_s13 }
   0x5   :  { %14819 = sst [smem:[#allocation96_spill]] %s14629_s14 }
   0x6   :  { %20 = vsyncpa [#allocation5], 0 }
   0x7   :  { %22 = vsyncpa [#allocation5 + $0x1], 0 }
   0x8   :  { %23 = vsyncpa [#allocation8], 0 }
   0x9   :  { %24 = vsyncpa [#allocation6], 0 }
   0xa   :  { %26 = vsyncpa [#allocation6 + $0x1], 0 }
   0xb   :  { %27 = vsyncpa [#allocation12], 0 }
   0xc   :  { %29 = vsyncpa [#allocation12 + $0x1], 0  ;;  %s11803_s29 = smov 0   ;;  %s11805_s30 = smov 0  }
   0xd   :  { %s11807_s15 = smov 0   ;;  %s11809_s16 = smov 0  }
   0xe LB: > { %14820 = sst [smem:[#allocation17_spill]] %s11702_s29  ;;  %s11824_s17 = sadd.s32 4294967295, %s11714_s16   ;;  %s11714_s16 = sphi %s11809_s16, %s15124_s16   ;;  %s11710_s15 = sphi %s11807_s15, %s15123_s15   ;;  %s11706_s30 = sphi %s11805_s30, %s15122_s30   ;;  %s11702_s29 = sphi %s11803_s29, %s15121_s29  }
   0xf   : > { %s8668_s18 = sadd.s32 4294967294, %s11714_s16   ;;  %p55_p0 = scmp.ne.s32.totalorder %s11706_s30, %s11702_s29 }
  0x10   : > { %p14633_p1 = scmp.eq.s32.totalorder %s11824_s17, 0  ;;  %p337_p3 = scmp.eq.s32.totalorder %s8668_s18, 1 }
  0x11   : > { %p8669_p5 = scmp.ge.s32.totalorder %s11714_s16, 1  ;;  %p370_p7 = scmp.lt.s32.totalorder %s11714_s16, 3 }
  0x12   : > { %p11833_p4 = por %p14633_p1, %p55_p0  ;;  %p11838_p6 = por %p337_p3, %p55_p0 }
  0x13   : > { %p11843_p8 = pnand %p8669_p5, %p370_p7  ;;  %s11716_s22 = smov [#allocation7]  }
  0x14   : > { %s14821_s19 = scalar_select %p11833_p4, 1, 0 }
  0x15   : > { %s14822_s20 = scalar_select %p11838_p6, 1, 0 }
  0x16   : > { %s382_s23 = sshll.u32 %s11716_s22, 4  ;;  %p11461_p9 = pneg %p11843_p8  ;;  %s11847_s23 = int_to_ptr.vmem [resolvable:$true] %s382_s23 }
  0x17   : > { %14823 = sst [smem:[#allocation18_spill]] %s14822_s20  ;;  %s11717_s25 = smov [#allocation9]  }
  0x18   : > { %p11854_p11 = pnand %p11461_p9, %p14633_p1  ;;  %s401_s26 = sshll.u32 %s11717_s25, 4  ;;  %s11858_s26 = int_to_ptr.vmem [resolvable:$true] %s401_s26 }
  0x19   : > { %s11526_s18 = scalar_lea.hbm %s14616_s1, 2304 }
  0x1a   : > { %p11527_p12 = scmp.ne.s32.totalorder %s14616_s1, %s11526_s18  ;;  %p11528_p13 = pneg %p11854_p11 }
  0x1b   : > { %p11533_p5 = scmp.lt.u32.totalorder %s11526_s18, %s14616_s1 }
  0x1c   : > { %p11529_p0 = pnand %p11528_p13, %p11527_p12 }
  0x1e   : > { %p11530_p3 = pneg %p11529_p0 }
  0x20   : > { %p11535_p7 = pnand %p11533_p5, %p11530_p3 }
  0x22   : > { %11538 = shalt.err (!%p11535_p7)
}
  0x23   : > { %s11539_s25 = scalar_lea.vmem %s11847_s23, 2304  ;;  %p11547_p2 = scmp.lt.s32.totalorder %s11847_s23, %s11847_s23 }
  0x24   : > { %p11540_p9 = scmp.ne.s32.totalorder %s11847_s23, %s11539_s25  ;;  %p11548_p12 = scmp.lt.s32.totalorder %s11539_s25, %s11539_s25 }
  0x26   : > { %p11542_p10 = pnand %p11540_p9, %p11528_p13  ;;  %p11549_p0 = por %p11548_p12, %p11547_p2 }
  0x28   : > { %p11543_p1 = pneg %p11542_p10 }
  0x2a   : > { %p11550_p6 = pnand %p11549_p0, %p11543_p1 }
  0x2c   : > { %11553 = shalt.err (!%p11550_p6)
}
  0x2d   : > { %s14635_s14 = smov 128   ;;  %s14636_s29 = smov 8  }
  0x2e   : > { %11464 = dma.hbm_to_vmem [thread:$0]  (!%p11854_p11), %s14616_s1, 2304, %s11847_s23, [#allocation8], %s14635_s14, %s14635_s14, %s14636_s29  }
  0x2f   : > { %s11554_s22 = scalar_lea.hbm %s14619_s4, 2304 }
  0x30   : > { %p11555_p1 = scmp.ne.s32.totalorder %s14619_s4, %s11554_s22  ;;  %p11561_p10 = scmp.lt.u32.totalorder %s11554_s22, %s14619_s4 }
  0x32   : > { %p11557_p2 = pnand %p11555_p1, %p11528_p13 }
  0x34   : > { %p11558_p6 = pneg %p11557_p2 }
  0x36   : > { %p11563_p3 = pnand %p11561_p10, %p11558_p6 }
  0x38   : > { %11566 = shalt.err (!%p11563_p3)
}
  0x39   : > { %s11567_s23 = scalar_lea.vmem %s11858_s26, 2304  ;;  %p11575_p12 = scmp.lt.s32.totalorder %s11858_s26, %s11858_s26 }
  0x3a   : > { %p11568_p5 = scmp.ne.s32.totalorder %s11858_s26, %s11567_s23  ;;  %p11576_p0 = scmp.lt.s32.totalorder %s11567_s23, %s11567_s23 }
  0x3c   : > { %p11570_p7 = pnand %p11568_p5, %p11528_p13  ;;  %p11577_p1 = por %p11576_p0, %p11575_p12 }
  0x3e   : > { %p11571_p9 = pneg %p11570_p7 }
  0x40   : > { %p11578_p2 = pnand %p11577_p1, %p11571_p9 }
  0x42   : > { %11581 = shalt.err (!%p11578_p2)
}
  0x43   : > { %11467 = dma.hbm_to_vmem [thread:$0]  (!%p11854_p11), %s14619_s4, 2304, %s11858_s26, [#allocation8], %s14635_s14, %s14635_s14, %s14636_s29  }
  0x44   : > { %s11919_s13 = sadd.s32 1, %s11714_s16   ;;  %s42_s24 = sadd.s32 1, %s11710_s15 }
  0x45   : > { %s39_s20 = ssub.s32 %s11714_s16, %s11919_s13  ;;  %p49_p13 = scmp.ne.s32.totalorder %s11710_s15, %s11706_s30 }
  0x46   : > { %p40_p6 = scmp.eq.s32.totalorder %s39_s20, 0  ;;  %p50_p10 = scmp.eq.s32.totalorder %s11714_s16, 0 }
  0x47   : > { %p14826_p3 = scmp.eq.s32.totalorder %s11824_s17, 1  ;;  %p11481_p7 = scmp.lt.s32.totalorder %s11714_s16, 2 }
  0x48   : > { %s11935_s28 = scalar_select %p40_p6, %s11710_s15, %s42_s24  }
  0x49   : > { %p11929_p5 = por %p14826_p3, %p49_p13  ;;  %p51_p9 = por %p50_p10, %p49_p13 }
  0x4a   : > { %s439_s18 = sand.u32 1, %s11710_s15   ;;  %s9273_s26 = sshll.u32 %s11714_s16, 12 }
  0x4b   : > { %s14827_s27 = scalar_select %p11929_p5, 1, 0 }
  0x4c   : > { %s8673_s22 = sshll.u32 %s439_s18, 8  ;;  %s14828_s0 = sld [smem:[#allocation92_spill]] }
  0x4d   : > { %s443_s6 = scalar_lea.vmem [#allocation4], %s8673_s22  ;;  %p11946_p11 = pnand %p11481_p7, %p51_p9 }
  0x4e   : > { %s450_s20 = sshll.u32 %s443_s6, 4  ;;  %s11950_s14 = scalar_lea.sflag [#allocation5], %s439_s18  ;;  %s11944_s20 = int_to_ptr.vmem [resolvable:$true] %s450_s20 }
  0x4f   : > { %p11584_p0 = pneg %p11946_p11 }
  0x52   : > { %s11942_s5 = scalar_lea.hbm %s14828_s0, %s9273_s26  ;;  %s11587_s25 = scalar_lea.hbm %s14828_s0, 8192 }
  0x53   : > { %s11582_s29 = scalar_lea.hbm %s11942_s5, 4096  ;;  %p11588_p13 = scmp.lt.u32.totalorder %s11942_s5, %s14828_s0 }
  0x54   : > { %p11583_p12 = scmp.ne.s32.totalorder %s11942_s5, %s11582_s29  ;;  %p11589_p6 = scmp.lt.u32.totalorder %s11587_s25, %s11582_s29 }
  0x55   : > { %p11591_p3 = scmp.lt.u32.totalorder %s11582_s29, %s11942_s5 }
  0x56   : > { %p11585_p1 = pnand %p11584_p0, %p11583_p12  ;;  %p11590_p10 = por %p11589_p6, %p11588_p13 }
  0x58   : > { %p11586_p2 = pneg %p11585_p1  ;;  %p11592_p7 = por %p11591_p3, %p11590_p10 }
  0x5a   : > { %p11593_p9 = pnand %p11592_p7, %p11586_p2 }
  0x5c   : > { %11596 = shalt.err (!%p11593_p9)
}
  0x5d   : > { %s11597_s18 = scalar_lea.vmem %s11944_s20, 4096  ;;  %s11720_s22 = smov [#allocation4]  }
  0x5e   : > { %p11598_p12 = scmp.ne.s32.totalorder %s11944_s20, %s11597_s18  ;;  %s11602_s26 = sshll.u32 %s11720_s22, 4  ;;  %s11603_s26 = int_to_ptr.vmem [resolvable:$false] %s11602_s26 }
  0x5f   : > { %s11604_s23 = scalar_lea.vmem %s11603_s26, 8192  ;;  %p11605_p4 = scmp.lt.s32.totalorder %s11944_s20, %s11603_s26 }
  0x60   : > { %p11600_p1 = pnand %p11598_p12, %p11584_p0  ;;  %p11606_p13 = scmp.lt.s32.totalorder %s11604_s23, %s11597_s18 }
  0x62   : > { %p11601_p5 = pneg %p11600_p1  ;;  %p11607_p6 = por %p11606_p13, %p11605_p4 }
  0x64   : > { %p11608_p10 = pnand %p11607_p6, %p11601_p5 }
  0x66   : > { %11611 = shalt.err (!%p11608_p10)
}
  0x67   : > { %s14830_s29 = smov 8   ;;  %s14831_s25 = smov 128  }
  0x68   : > { %11471 = dma.hbm_to_vmem [thread:$0]  (!%p11946_p11), %s11942_s5, 4096, %s11944_s20, %s11950_s14, %s14831_s25, %s14831_s25, %s14830_s29  }
  0x69   : > { %462 = sbr.rel (%p11843_p8) target bundleno = 2282 (0x8ea), region = 72 }
  0x70   : > { %s11984_s6 = sand.u32 1, %s11706_s30   ;;  %p14832_p4 = scmp.ne.s32.totalorder %s14821_s19, 0 }
  0x71   : > { %s8677_s18 = sshll.u32 %s11984_s6, 8  ;;  %s465_s22 = scalar_lea.sflag [#allocation5], %s11984_s6 }
  0x72   : > { %s11990_s24 = scalar_lea.vmem [#allocation4], %s8677_s18 }
  0x73   : > { %11685 = dma.done.wait (%p14832_p4), %s465_s22, 4096  }
  0x74   : > { %11687 = vsyncadd (%p14832_p4), %s465_s22, 4294963200  ;;  %p14833_p5 = scmp.eq.s32.totalorder %s11824_s17, 0 }
  0x76   : > { %11689 = dma.done.wait (%p14833_p5), [#allocation8], 4608   ;;  %p14834_p8 = pmov %p14833_p5 }
  0x77   : > { %vm558_vm0 = vcmask 130048   ;;  %v11721_v0 = vmov 0.0|0.0   ;;  %vm11722_vm1 = vmmov 0   ;;  %v14639_v1 = vmov 0.0   ;;  %v735_v2 = vld [vmem:[%s14622_s7] sm:$0xff]  ;;  %v736_v3 = vld [vmem:[%s14622_s7 + $0x8] sm:$0xff] }
  0x78   : > { %11691 = vsyncadd (%p14834_p8), [#allocation8], 4294962688  ;;  %10857 = vmatprep.subr.bf16.mxu1 %v11721_v0  ;;  %9901 = vmatprep.mubr.msk.f32.mxu1 %vm11722_vm1, %v14639_v1  ;;  %612 = vst.msk [vmem:[#allocation2 + $0x1a8] sm:$0xff] %vm558_vm0, %v14639_v1  ;;  %v12301_v4 = vld [vmem:[%s11990_s24] sm:$0xff]  ;;  %v10858_v5 = vpack.c.bf16 %v736_v3, %v735_v2  ;;  %v12304_v6 = vld [vmem:[%s11990_s24 + $0x8] sm:$0xff]  ;;  %vm813_vm2 = vcmask 64512  }
  0x79   : > { %613 = vst.msk [vmem:[#allocation2 + $0x1b0] sm:$0xff] %vm558_vm0, %v14639_v1  ;;  %616 = vst.msk [vmem:[#allocation2 + $0x1c8] sm:$0xff] %vm558_vm0, %v14639_v1  ;;  %10896 = vmatprep.subr.bf16.mxu0 %v11721_v0  ;;  %10381 = vmatprep.mubr.msk.f32.mxu0 %vm11722_vm1, %v14639_v1  ;;  %v12307_v7 = vld [vmem:[%s11990_s24 + $0x10] sm:$0xff]  ;;  %v12310_v8 = vld [vmem:[%s11990_s24 + $0x18] sm:$0xff]  ;;  %v664_v9 = vsel %vm558_vm0, %v12301_v4, 0.0  ;;  %v665_v13 = vsel %vm558_vm0, %v12304_v6, 0.0 }
  0x7a   : > { %617 = vst.msk [vmem:[#allocation2 + $0x1d0] sm:$0xff] %vm558_vm0, %v14639_v1  ;;  %620 = vst.msk [vmem:[#allocation2 + $0x1e8] sm:$0xff] %vm558_vm0, %v14639_v1  ;;  %v12317_v10 = vld [vmem:[%s11990_s24 + $0x20] sm:$0xff]  ;;  %v12320_v11 = vld [vmem:[%s11990_s24 + $0x28] sm:$0xff]  ;;  %v667_v14 = vsel %vm558_vm0, %v12307_v7, 0.0  ;;  %10859 = vmatpush3.bf16.msra.mxu1 %v10858_v5  ;;  %v666_v18 = vadd.f32 %v665_v13, %v664_v9  ;;  %v669_v22 = vsel %vm558_vm0, %v12310_v8, 0.0 }
  0x7b   : > { %621 = vst.msk [vmem:[#allocation2 + $0x1f0] sm:$0xff] %vm558_vm0, %v14639_v1  ;;  %624 = vst.msk [vmem:[#allocation2 + $0x208] sm:$0xff] %vm558_vm0, %v14639_v1  ;;  %v12323_v12 = vld [vmem:[%s11990_s24 + $0x30] sm:$0xff]  ;;  %v12336_v15 = vld [vmem:[%s11990_s24 + $0x38] sm:$0xff]  ;;  %9904 = vmatprep.subr.mxu1 %v14639_v1  ;;  %v671_v30 = vsel %vm558_vm0, %v12317_v10, 0.0  ;;  %v673_v38 = vsel %vm558_vm0, %v12320_v11, 0.0 }
  0x7c   : > { %625 = vst.msk [vmem:[#allocation2 + $0x210] sm:$0xff] %vm558_vm0, %v14639_v1  ;;  %559 = vst.msk [vmem:[#allocation2] sm:$0xff] %vm558_vm0, %v14639_v1  ;;  %v12339_v16 = vld [vmem:[%s11990_s24 + $0x40] sm:$0xff]  ;;  %v12342_v17 = vld [vmem:[%s11990_s24 + $0x48] sm:$0xff]  ;;  %v668_v26 = vadd.f32 %v667_v14, %v666_v18  ;;  %v675_v46 = vsel %vm558_vm0, %v12323_v12, 0.0  ;;  %v677_v49 = vsel %vm558_vm0, %v12336_v15, 0.0 }
  0x7d   : > { %560 = vst.msk [vmem:[#allocation2 + $0x8] sm:$0xff] %vm558_vm0, %v14639_v1  ;;  %561 = vst.msk [vmem:[#allocation2 + $0x10] sm:$0xff] %vm558_vm0, %v14639_v1  ;;  %v12351_v19 = vld [vmem:[%s11990_s24 + $0x50] sm:$0xff]  ;;  %v12354_v20 = vld [vmem:[%s11990_s24 + $0x58] sm:$0xff]  ;;  %v679_v51 = vsel %vm558_vm0, %v12339_v16, 0.0  ;;  %v681_v53 = vsel %vm558_vm0, %v12342_v17, 0.0 }
  0x7e   : > { %562 = vst.msk [vmem:[#allocation2 + $0x18] sm:$0xff] %vm558_vm0, %v14639_v1  ;;  %563 = vst.msk [vmem:[#allocation2 + $0x20] sm:$0xff] %vm558_vm0, %v14639_v1  ;;  %v12357_v21 = vld [vmem:[%s11990_s24 + $0x60] sm:$0xff]  ;;  %v12369_v23 = vld [vmem:[%s11990_s24 + $0x68] sm:$0xff]  ;;  %v670_v34 = vadd.f32 %v669_v22, %v668_v26  ;;  %v683_v55 = vsel %vm558_vm0, %v12351_v19, 0.0  ;;  %v685_v57 = vsel %vm558_vm0, %v12354_v20, 0.0 }
  0x7f   : > { %564 = vst.msk [vmem:[#allocation2 + $0x28] sm:$0xff] %vm558_vm0, %v14639_v1  ;;  %565 = vst.msk [vmem:[#allocation2 + $0x30] sm:$0xff] %vm558_vm0, %v14639_v1  ;;  %v12372_v24 = vld [vmem:[%s11990_s24 + $0x70] sm:$0xff]  ;;  %v12375_v25 = vld [vmem:[%s11990_s24 + $0x78] sm:$0xff]  ;;  %v687_v59 = vsel %vm558_vm0, %v12357_v21, 0.0  ;;  %v689_v61 = vsel %vm558_vm0, %v12369_v23, 0.0 }
  0x80   : > { %566 = vst.msk [vmem:[#allocation2 + $0x38] sm:$0xff] %vm558_vm0, %v14639_v1  ;;  %567 = vst.msk [vmem:[#allocation2 + $0x40] sm:$0xff] %vm558_vm0, %v14639_v1  ;;  %v12384_v27 = vld [vmem:[%s11990_s24 + $0x80] sm:$0xff]  ;;  %v12387_v28 = vld [vmem:[%s11990_s24 + $0x88] sm:$0xff]  ;;  %v672_v42 = vadd.f32 %v671_v30, %v670_v34  ;;  %v691_v63 = vsel %vm558_vm0, %v12372_v24, 0.0  ;;  %v693_v2 = vsel %vm558_vm0, %v12375_v25, 0.0 }
  0x81   : > { %568 = vst.msk [vmem:[#allocation2 + $0x48] sm:$0xff] %vm558_vm0, %v14639_v1  ;;  %569 = vst.msk [vmem:[#allocation2 + $0x50] sm:$0xff] %vm558_vm0, %v14639_v1  ;;  %v12390_v29 = vld [vmem:[%s11990_s24 + $0x90] sm:$0xff]  ;;  %v12401_v31 = vld [vmem:[%s11990_s24 + $0x98] sm:$0xff]  ;;  %v695_v5 = vsel %vm558_vm0, %v12384_v27, 0.0  ;;  %v697_v13 = vsel %vm558_vm0, %v12387_v28, 0.0 }
  0x82   : > { %570 = vst.msk [vmem:[#allocation2 + $0x58] sm:$0xff] %vm558_vm0, %v14639_v1  ;;  %571 = vst.msk [vmem:[#allocation2 + $0x60] sm:$0xff] %vm558_vm0, %v14639_v1  ;;  %v12404_v32 = vld [vmem:[%s11990_s24 + $0xa0] sm:$0xff]  ;;  %v12407_v33 = vld [vmem:[%s11990_s24 + $0xa8] sm:$0xff]  ;;  %v674_v48 = vadd.f32 %v673_v38, %v672_v42  ;;  %v699_v18 = vsel %vm558_vm0, %v12390_v29, 0.0  ;;  %v701_v26 = vsel %vm558_vm0, %v12401_v31, 0.0 }
  0x83   : > { %572 = vst.msk [vmem:[#allocation2 + $0x68] sm:$0xff] %vm558_vm0, %v14639_v1  ;;  %573 = vst.msk [vmem:[#allocation2 + $0x70] sm:$0xff] %vm558_vm0, %v14639_v1  ;;  %v12416_v35 = vld [vmem:[%s11990_s24 + $0xb0] sm:$0xff]  ;;  %v12419_v36 = vld [vmem:[%s11990_s24 + $0xb8] sm:$0xff]  ;;  %v703_v34 = vsel %vm558_vm0, %v12404_v32, 0.0  ;;  %v705_v42 = vsel %vm558_vm0, %v12407_v33, 0.0 }
  0x84   : > { %574 = vst.msk [vmem:[#allocation2 + $0x78] sm:$0xff] %vm558_vm0, %v14639_v1  ;;  %575 = vst.msk [vmem:[#allocation2 + $0x80] sm:$0xff] %vm558_vm0, %v14639_v1  ;;  %v12422_v37 = vld [vmem:[%s11990_s24 + $0xc0] sm:$0xff]  ;;  %v12433_v39 = vld [vmem:[%s11990_s24 + $0xc8] sm:$0xff]  ;;  %v676_v50 = vadd.f32 %v675_v46, %v674_v48  ;;  %v707_v48 = vsel %vm558_vm0, %v12416_v35, 0.0  ;;  %s8681_s23 = sshll.u32 %s11984_s6, 3 }
  0x85   : > { %576 = vst.msk [vmem:[#allocation2 + $0x88] sm:$0xff] %vm558_vm0, %v14639_v1  ;;  %577 = vst.msk [vmem:[#allocation2 + $0x90] sm:$0xff] %vm558_vm0, %v14639_v1  ;;  %v12436_v40 = vld [vmem:[%s11990_s24 + $0xd0] sm:$0xff]  ;;  %v12439_v41 = vld [vmem:[%s11990_s24 + $0xd8] sm:$0xff]  ;;  %s12696_s29 = scalar_lea.vmem [#allocation11], %s8681_s23  ;;  %vm8505_vm3 = vcmask 122880  }
  0x86   : > { %578 = vst.msk [vmem:[#allocation2 + $0x98] sm:$0xff] %vm558_vm0, %v14639_v1  ;;  %579 = vst.msk [vmem:[#allocation2 + $0xa0] sm:$0xff] %vm558_vm0, %v14639_v1  ;;  %v12448_v43 = vld [vmem:[%s11990_s24 + $0xe0] sm:$0xff]  ;;  %v12451_v44 = vld [vmem:[%s11990_s24 + $0xe8] sm:$0xff]  ;;  %v678_v52 = vadd.f32 %v677_v49, %v676_v50  ;;  %v709_v50 = vsel %vm558_vm0, %v12419_v36, 0.0  ;;  %s15076_s5 = sld [smem:[#allocation93_spill]] }
  0x87   : > { %580 = vst.msk [vmem:[#allocation2 + $0xa8] sm:$0xff] %vm558_vm0, %v14639_v1  ;;  %581 = vst.msk [vmem:[#allocation2 + $0xb0] sm:$0xff] %vm558_vm0, %v14639_v1  ;;  %v12454_v45 = vld [vmem:[%s11990_s24 + $0xf0] sm:$0xff]  ;;  %v12465_v47 = vld [vmem:[%s11990_s24 + $0xf8] sm:$0xff]  ;;  %s15077_s23 = sld [smem:[#allocation94_spill]]  ;;  %s14324_s25 = scalar_lea.vmem [#allocation10], %s8677_s18 }
  0x88   : > { %582 = vst.msk [vmem:[#allocation2 + $0xb8] sm:$0xff] %vm558_vm0, %v14639_v1  ;;  %583 = vst.msk [vmem:[#allocation2 + $0xc0] sm:$0xff] %vm558_vm0, %v14639_v1  ;;  %v680_v54 = vadd.f32 %v679_v51, %v678_v52  ;;  %v711_v52 = vsel %vm558_vm0, %v12422_v37, 0.0  ;;  %s9274_s18 = sshll.u32 %s11824_s17, 12  ;;  %s8531_s22 = sshll.u32 %s14324_s25, 4  ;;  %s14534_s22 = int_to_ptr.vmem [resolvable:$true] %s8531_s22 }
  0x89   : > { %584 = vst.msk [vmem:[#allocation2 + $0xc8] sm:$0xff] %vm558_vm0, %v14639_v1  ;;  %585 = vst.msk [vmem:[#allocation2 + $0xd0] sm:$0xff] %vm558_vm0, %v14639_v1  ;;  %s15113_s21 = sld [smem:[#allocation95_spill]]  ;;  %s11612_s20 = scalar_lea.vmem %s14534_s22, 4096 }
  0x8a   : > { %586 = vst.msk [vmem:[#allocation2 + $0xd8] sm:$0xff] %vm558_vm0, %v14639_v1  ;;  %587 = vst.msk [vmem:[#allocation2 + $0xe0] sm:$0xff] %vm558_vm0, %v14639_v1  ;;  %v682_v56 = vadd.f32 %v681_v53, %v680_v54  ;;  %v713_v54 = vsel %vm558_vm0, %v12433_v39, 0.0  ;;  %p11613_p11 = scmp.ne.s32.totalorder %s14534_s22, %s11612_s20  ;;  %p15114_p0 = scmp.ne.s32.totalorder %s14827_s27, 0 }
  0x8b   : > { %588 = vst.msk [vmem:[#allocation2 + $0xe8] sm:$0xff] %vm558_vm0, %v14639_v1  ;;  %589 = vst.msk [vmem:[#allocation2 + $0xf0] sm:$0xff] %vm558_vm0, %v14639_v1  ;;  %s11724_s26 = smov [#allocation10]  }
  0x8c   : > { %590 = vst.msk [vmem:[#allocation2 + $0xf8] sm:$0xff] %vm558_vm0, %v14639_v1  ;;  %591 = vst.msk [vmem:[#allocation2 + $0x100] sm:$0xff] %vm558_vm0, %v14639_v1  ;;  %v684_v58 = vadd.f32 %v683_v55, %v682_v56  ;;  %v715_v56 = vsel %vm558_vm0, %v12436_v40, 0.0  ;;  %p11614_p2 = pnand %p11613_p11, %p15114_p0 }
  0x8d   : > { %592 = vst.msk [vmem:[#allocation2 + $0x108] sm:$0xff] %vm558_vm0, %v14639_v1  ;;  %593 = vst.msk [vmem:[#allocation2 + $0x110] sm:$0xff] %vm558_vm0, %v14639_v1 }
  0x8e   : > { %594 = vst.msk [vmem:[#allocation2 + $0x118] sm:$0xff] %vm558_vm0, %v14639_v1  ;;  %595 = vst.msk [vmem:[#allocation2 + $0x120] sm:$0xff] %vm558_vm0, %v14639_v1  ;;  %v686_v60 = vadd.f32 %v685_v57, %v684_v58  ;;  %v717_v58 = vsel %vm558_vm0, %v12439_v41, 0.0  ;;  %p11615_p3 = pneg %p11614_p2 }
  0x8f   : > { %596 = vst.msk [vmem:[#allocation2 + $0x128] sm:$0xff] %vm558_vm0, %v14639_v1  ;;  %597 = vst.msk [vmem:[#allocation2 + $0x130] sm:$0xff] %vm558_vm0, %v14639_v1  ;;  %s14532_s14 = scalar_lea.hbm %s15113_s21, %s9274_s18 }
  0x90   : > { %598 = vst.msk [vmem:[#allocation2 + $0x138] sm:$0xff] %vm558_vm0, %v14639_v1  ;;  %599 = vst.msk [vmem:[#allocation2 + $0x140] sm:$0xff] %vm558_vm0, %v14639_v1  ;;  %v688_v62 = vadd.f32 %v687_v59, %v686_v60  ;;  %v719_v60 = vsel %vm558_vm0, %v12448_v43, 0.0 }
  0x91   : > { %600 = vst.msk [vmem:[#allocation2 + $0x148] sm:$0xff] %vm558_vm0, %v14639_v1  ;;  %601 = vst.msk [vmem:[#allocation2 + $0x150] sm:$0xff] %vm558_vm0, %v14639_v1 }
  0x92   : > { %602 = vst.msk [vmem:[#allocation2 + $0x158] sm:$0xff] %vm558_vm0, %v14639_v1  ;;  %603 = vst.msk [vmem:[#allocation2 + $0x160] sm:$0xff] %vm558_vm0, %v14639_v1  ;;  %v690_v0 = vadd.f32 %v689_v61, %v688_v62  ;;  %v721_v62 = vsel %vm558_vm0, %v12451_v44, 0.0 }
  0x93   : > { %604 = vst.msk [vmem:[#allocation2 + $0x168] sm:$0xff] %vm558_vm0, %v14639_v1  ;;  %605 = vst.msk [vmem:[#allocation2 + $0x170] sm:$0xff] %vm558_vm0, %v14639_v1 }
  0x94   : > { %606 = vst.msk [vmem:[#allocation2 + $0x178] sm:$0xff] %vm558_vm0, %v14639_v1  ;;  %607 = vst.msk [vmem:[#allocation2 + $0x180] sm:$0xff] %vm558_vm0, %v14639_v1  ;;  %v692_v3 = vadd.f32 %v691_v63, %v690_v0  ;;  %v723_v0 = vsel %vm558_vm0, %v12454_v45, 0.0 }
  0x95   : > { %608 = vst.msk [vmem:[#allocation2 + $0x188] sm:$0xff] %vm558_vm0, %v14639_v1  ;;  %609 = vst.msk [vmem:[#allocation2 + $0x190] sm:$0xff] %vm558_vm0, %v14639_v1 }
  0x96   : > { %610 = vst.msk [vmem:[#allocation2 + $0x198] sm:$0xff] %vm558_vm0, %v14639_v1  ;;  %611 = vst.msk [vmem:[#allocation2 + $0x1a0] sm:$0xff] %vm558_vm0, %v14639_v1  ;;  %v694_v9 = vadd.f32 %v693_v2, %v692_v3  ;;  %v725_v3 = vsel %vm558_vm0, %v12465_v47, 0.0 }
  0x97   : > { %614 = vst.msk [vmem:[#allocation2 + $0x1b8] sm:$0xff] %vm558_vm0, %v14639_v1  ;;  %615 = vst.msk [vmem:[#allocation2 + $0x1c0] sm:$0xff] %vm558_vm0, %v14639_v1 }
  0x98   : > { %618 = vst.msk [vmem:[#allocation2 + $0x1d8] sm:$0xff] %vm558_vm0, %v14639_v1  ;;  %619 = vst.msk [vmem:[#allocation2 + $0x1e0] sm:$0xff] %vm558_vm0, %v14639_v1  ;;  %v696_v14 = vadd.f32 %v695_v5, %v694_v9 }
  0x99   : > { %622 = vst.msk [vmem:[#allocation2 + $0x1f8] sm:$0xff] %vm558_vm0, %v14639_v1  ;;  %623 = vst.msk [vmem:[#allocation2 + $0x200] sm:$0xff] %vm558_vm0, %v14639_v1 }
  0x9a   : > { %626 = vst.msk [vmem:[#allocation2 + $0x218] sm:$0xff] %vm558_vm0, %v14639_v1  ;;  %627 = vst.msk [vmem:[#allocation2 + $0x220] sm:$0xff] %vm558_vm0, %v14639_v1  ;;  %v698_v22 = vadd.f32 %v697_v13, %v696_v14 }
  0x9b   : > { %628 = vst.msk [vmem:[#allocation2 + $0x228] sm:$0xff] %vm558_vm0, %v14639_v1  ;;  %629 = vst.msk [vmem:[#allocation2 + $0x230] sm:$0xff] %vm558_vm0, %v14639_v1 }
  0x9c   : > { %630 = vst.msk [vmem:[#allocation2 + $0x238] sm:$0xff] %vm558_vm0, %v14639_v1  ;;  %4691 = vst.msk [vmem:[#allocation3] sm:$0xff] %vm558_vm0, %v14639_v1  ;;  %v700_v30 = vadd.f32 %v699_v18, %v698_v22 }
  0x9d   : > { %4692 = vst.msk [vmem:[#allocation3 + $0x8] sm:$0xff] %vm558_vm0, %v14639_v1  ;;  %4693 = vst.msk [vmem:[#allocation3 + $0x10] sm:$0xff] %vm558_vm0, %v14639_v1 }
  0x9e   : > { %4694 = vst.msk [vmem:[#allocation3 + $0x18] sm:$0xff] %vm558_vm0, %v14639_v1  ;;  %4695 = vst.msk [vmem:[#allocation3 + $0x20] sm:$0xff] %vm558_vm0, %v14639_v1  ;;  %v702_v38 = vadd.f32 %v701_v26, %v700_v30 }
  0x9f   : > { %4696 = vst.msk [vmem:[#allocation3 + $0x28] sm:$0xff] %vm558_vm0, %v14639_v1  ;;  %4697 = vst.msk [vmem:[#allocation3 + $0x30] sm:$0xff] %vm558_vm0, %v14639_v1 }
  0xa0   : > { %4698 = vst.msk [vmem:[#allocation3 + $0x38] sm:$0xff] %vm558_vm0, %v14639_v1  ;;  %4699 = vst.msk [vmem:[#allocation3 + $0x40] sm:$0xff] %vm558_vm0, %v14639_v1  ;;  %v704_v46 = vadd.f32 %v703_v34, %v702_v38  ;;  %v737_v38 = vld [vmem:[%s14623_s8] sm:$0xff] }
  0xa1   : > { %4700 = vst.msk [vmem:[#allocation3 + $0x48] sm:$0xff] %vm558_vm0, %v14639_v1  ;;  %4701 = vst.msk [vmem:[#allocation3 + $0x50] sm:$0xff] %vm558_vm0, %v14639_v1 }
  0xa2   : > { %4702 = vst.msk [vmem:[#allocation3 + $0x58] sm:$0xff] %vm558_vm0, %v14639_v1  ;;  %4703 = vst.msk [vmem:[#allocation3 + $0x60] sm:$0xff] %vm558_vm0, %v14639_v1  ;;  %v706_v49 = vadd.f32 %v705_v42, %v704_v46  ;;  %v958_v42 = vld [vmem:[#allocation7 + $0x10] sm:$0xff]  ;;  %v959_v46 = vld [vmem:[#allocation7 + $0x18] sm:$0xff] }
  0xa3   : > { %4704 = vst.msk [vmem:[#allocation3 + $0x68] sm:$0xff] %vm558_vm0, %v14639_v1  ;;  %4705 = vst.msk [vmem:[#allocation3 + $0x70] sm:$0xff] %vm558_vm0, %v14639_v1 }
  0xa4   : > { %4706 = vst.msk [vmem:[#allocation3 + $0x78] sm:$0xff] %vm558_vm0, %v14639_v1  ;;  %4707 = vst.msk [vmem:[#allocation3 + $0x80] sm:$0xff] %vm558_vm0, %v14639_v1  ;;  %v708_v51 = vadd.f32 %v707_v48, %v706_v49  ;;  %v10860_v48 = vpack.c.bf16 %v959_v46, %v958_v42  ;;  %v923_v49 = vld [vmem:[#allocation7] sm:$0xff] }
  0xa5   : > { %4708 = vst.msk [vmem:[#allocation3 + $0x88] sm:$0xff] %vm558_vm0, %v14639_v1  ;;  %4709 = vst.msk [vmem:[#allocation3 + $0x90] sm:$0xff] %vm558_vm0, %v14639_v1 }
  0xa6   : > { %4710 = vst.msk [vmem:[#allocation3 + $0x98] sm:$0xff] %vm558_vm0, %v14639_v1  ;;  %4711 = vst.msk [vmem:[#allocation3 + $0xa0] sm:$0xff] %vm558_vm0, %v14639_v1  ;;  %v710_v53 = vadd.f32 %v709_v50, %v708_v51  ;;  %v924_v50 = vld [vmem:[#allocation7 + $0x8] sm:$0xff] }
  0xa7   : > { %4712 = vst.msk [vmem:[#allocation3 + $0xa8] sm:$0xff] %vm558_vm0, %v14639_v1  ;;  %4713 = vst.msk [vmem:[#allocation3 + $0xb0] sm:$0xff] %vm558_vm0, %v14639_v1 }
  0xa8   : > { %4714 = vst.msk [vmem:[#allocation3 + $0xb8] sm:$0xff] %vm558_vm0, %v14639_v1  ;;  %4715 = vst.msk [vmem:[#allocation3 + $0xc0] sm:$0xff] %vm558_vm0, %v14639_v1  ;;  %v712_v55 = vadd.f32 %v711_v52, %v710_v53 }
  0xa9   : > { %4716 = vst.msk [vmem:[#allocation3 + $0xc8] sm:$0xff] %vm558_vm0, %v14639_v1  ;;  %4717 = vst.msk [vmem:[#allocation3 + $0xd0] sm:$0xff] %vm558_vm0, %v14639_v1 }
  0xaa   : > { %4718 = vst.msk [vmem:[#allocation3 + $0xd8] sm:$0xff] %vm558_vm0, %v14639_v1  ;;  %4719 = vst.msk [vmem:[#allocation3 + $0xe0] sm:$0xff] %vm558_vm0, %v14639_v1  ;;  %v714_v57 = vadd.f32 %v713_v54, %v712_v55  ;;  %v925_v54 = vld [vmem:[#allocation2 + $0x8] sm:$0xff]  ;;  %v10864_v55 = vpack.c.bf16 %v924_v50, %v923_v49 }
  0xab   : > { %4720 = vst.msk [vmem:[#allocation3 + $0xe8] sm:$0xff] %vm558_vm0, %v14639_v1  ;;  %4721 = vst.msk [vmem:[#allocation3 + $0xf0] sm:$0xff] %vm558_vm0, %v14639_v1 }
  0xac   : > { %4722 = vst.msk [vmem:[#allocation3 + $0xf8] sm:$0xff] %vm558_vm0, %v14639_v1  ;;  %4723 = vst.msk [vmem:[#allocation3 + $0x100] sm:$0xff] %vm558_vm0, %v14639_v1  ;;  %v716_v59 = vadd.f32 %v715_v56, %v714_v57  ;;  %v1635_v56 = vld [vmem:[#allocation7 + $0x20] sm:$0xff]  ;;  %v1636_v57 = vld [vmem:[#allocation7 + $0x28] sm:$0xff] }
  0xad   : > { %4724 = vst.msk [vmem:[#allocation3 + $0x108] sm:$0xff] %vm558_vm0, %v14639_v1  ;;  %4725 = vst.msk [vmem:[#allocation3 + $0x110] sm:$0xff] %vm558_vm0, %v14639_v1 }
  0xae   : > { %4726 = vst.msk [vmem:[#allocation3 + $0x118] sm:$0xff] %vm558_vm0, %v14639_v1  ;;  %4727 = vst.msk [vmem:[#allocation3 + $0x120] sm:$0xff] %vm558_vm0, %v14639_v1  ;;  %v718_v61 = vadd.f32 %v717_v58, %v716_v59  ;;  %v926_v58 = vld [vmem:[#allocation2 + $0x10] sm:$0xff] }
  0xaf   : > { %4728 = vst.msk [vmem:[#allocation3 + $0x128] sm:$0xff] %vm558_vm0, %v14639_v1  ;;  %4729 = vst.msk [vmem:[#allocation3 + $0x130] sm:$0xff] %vm558_vm0, %v14639_v1 }
  0xb0   : > { %4730 = vst.msk [vmem:[#allocation3 + $0x138] sm:$0xff] %vm558_vm0, %v14639_v1  ;;  %4731 = vst.msk [vmem:[#allocation3 + $0x140] sm:$0xff] %vm558_vm0, %v14639_v1  ;;  %v720_v63 = vadd.f32 %v719_v60, %v718_v61  ;;  %v12535_v60 = vpack.c.bf16 %v1636_v57, %v1635_v56 }
  0xb1   : > { %4732 = vst.msk [vmem:[#allocation3 + $0x148] sm:$0xff] %vm558_vm0, %v14639_v1  ;;  %4733 = vst.msk [vmem:[#allocation3 + $0x150] sm:$0xff] %vm558_vm0, %v14639_v1 }
  0xb2   : > { %4734 = vst.msk [vmem:[#allocation3 + $0x158] sm:$0xff] %vm558_vm0, %v14639_v1  ;;  %4735 = vst.msk [vmem:[#allocation3 + $0x160] sm:$0xff] %vm558_vm0, %v14639_v1  ;;  %v722_v2 = vadd.f32 %v721_v62, %v720_v63 }
  0xb3   : > { %4736 = vst.msk [vmem:[#allocation3 + $0x168] sm:$0xff] %vm558_vm0, %v14639_v1  ;;  %4737 = vst.msk [vmem:[#allocation3 + $0x170] sm:$0xff] %vm558_vm0, %v14639_v1 }
  0xb4   : > { %4738 = vst.msk [vmem:[#allocation3 + $0x178] sm:$0xff] %vm558_vm0, %v14639_v1  ;;  %4739 = vst.msk [vmem:[#allocation3 + $0x180] sm:$0xff] %vm558_vm0, %v14639_v1  ;;  %v724_v5 = vadd.f32 %v723_v0, %v722_v2 }
  0xb5   : > { %4740 = vst.msk [vmem:[#allocation3 + $0x188] sm:$0xff] %vm558_vm0, %v14639_v1  ;;  %4741 = vst.msk [vmem:[#allocation3 + $0x190] sm:$0xff] %vm558_vm0, %v14639_v1 }
  0xb6   : > { %4742 = vst.msk [vmem:[#allocation3 + $0x198] sm:$0xff] %vm558_vm0, %v14639_v1  ;;  %4743 = vst.msk [vmem:[#allocation3 + $0x1a0] sm:$0xff] %vm558_vm0, %v14639_v1  ;;  %v726_v9 = vadd.f32 %v725_v3, %v724_v5 }
  0xb7   : > { %4744 = vst.msk [vmem:[#allocation3 + $0x1a8] sm:$0xff] %vm558_vm0, %v14639_v1  ;;  %4745 = vst.msk [vmem:[#allocation3 + $0x1b0] sm:$0xff] %vm558_vm0, %v14639_v1 }
  0xb8   : > { %4746 = vst.msk [vmem:[#allocation3 + $0x1b8] sm:$0xff] %vm558_vm0, %v14639_v1  ;;  %4747 = vst.msk [vmem:[#allocation3 + $0x1c0] sm:$0xff] %vm558_vm0, %v14639_v1  ;;  %v727_v13 = vrot.slane %v726_v9, 4 }
  0xb9   : > { %4748 = vst.msk [vmem:[#allocation3 + $0x1c8] sm:$0xff] %vm558_vm0, %v14639_v1  ;;  %4749 = vst.msk [vmem:[#allocation3 + $0x1d0] sm:$0xff] %vm558_vm0, %v14639_v1 }
  0xba   : > { %4750 = vst.msk [vmem:[#allocation3 + $0x1d8] sm:$0xff] %vm558_vm0, %v14639_v1  ;;  %4751 = vst.msk [vmem:[#allocation3 + $0x1e0] sm:$0xff] %vm558_vm0, %v14639_v1  ;;  %v728_v14 = vadd.f32 %v727_v13, %v726_v9 }
  0xbb   : > { %4752 = vst.msk [vmem:[#allocation3 + $0x1e8] sm:$0xff] %vm558_vm0, %v14639_v1  ;;  %4753 = vst.msk [vmem:[#allocation3 + $0x1f0] sm:$0xff] %vm558_vm0, %v14639_v1 }
  0xbc   : > { %4754 = vst.msk [vmem:[#allocation3 + $0x1f8] sm:$0xff] %vm558_vm0, %v14639_v1  ;;  %4755 = vst.msk [vmem:[#allocation3 + $0x200] sm:$0xff] %vm558_vm0, %v14639_v1  ;;  %v729_v18 = vrot.slane %v728_v14, 2 }
  0xbd   : > { %4756 = vst.msk [vmem:[#allocation3 + $0x208] sm:$0xff] %vm558_vm0, %v14639_v1  ;;  %4757 = vst.msk [vmem:[#allocation3 + $0x210] sm:$0xff] %vm558_vm0, %v14639_v1 }
  0xbe   : > { %4758 = vst.msk [vmem:[#allocation3 + $0x218] sm:$0xff] %vm558_vm0, %v14639_v1  ;;  %4759 = vst.msk [vmem:[#allocation3 + $0x220] sm:$0xff] %vm558_vm0, %v14639_v1  ;;  %v730_v22 = vadd.f32 %v729_v18, %v728_v14 }
  0xbf   : > { %4760 = vst.msk [vmem:[#allocation3 + $0x228] sm:$0xff] %vm558_vm0, %v14639_v1  ;;  %4761 = vst.msk [vmem:[#allocation3 + $0x230] sm:$0xff] %vm558_vm0, %v14639_v1 }
  0xc0   : > { %4762 = vst.msk [vmem:[#allocation3 + $0x238] sm:$0xff] %vm558_vm0, %v14639_v1  ;;  %14835 = vst [vmem:[#allocation19_spill] sm:$0xff] %v12301_v4  ;;  %v731_v26 = vrot.slane %v730_v22, 1 }
  0xc1   : > { %14836 = vst [vmem:[#allocation20_spill] sm:$0xff] %v12304_v6  ;;  %14837 = vst [vmem:[#allocation21_spill] sm:$0xff] %v12307_v7 }
  0xc2   : > { %14838 = vst [vmem:[#allocation22_spill] sm:$0xff] %v12310_v8  ;;  %632 = vst.msk [vmem:[#allocation2 + $0x28] sm:$0xff] %vm558_vm0, %v12301_v4  ;;  %v732_v30 = vadd.f32 %v731_v26, %v730_v22  ;;  %v1602_v4 = vld [vmem:[#allocation2 + $0x9] sm:$0xff] }
  0xc3   : > { %14839 = vst [vmem:[#allocation23_spill] sm:$0xff] %v12317_v10  ;;  %14840 = vst [vmem:[#allocation24_spill] sm:$0xff] %v12320_v11 }
  0xc4   : > { %14841 = vst [vmem:[#allocation25_spill] sm:$0xff] %v12323_v12  ;;  %633 = vst.msk [vmem:[#allocation2 + $0x30] sm:$0xff] %vm558_vm0, %v12304_v6  ;;  %v734_v34 = vmul.f32 0.00390625, %v732_v30  ;;  %v2411_v6 = vld [vmem:[#allocation7 + $0x40] sm:$0xff] }
  0xc5   : > { %634 = vst.msk [vmem:[#allocation2 + $0x48] sm:$0xff] %vm558_vm0, %v12307_v7  ;;  %635 = vst.msk [vmem:[#allocation2 + $0x50] sm:$0xff] %vm558_vm0, %v12310_v8 }
  0xc6   : > { %14842 = vst [vmem:[#allocation26_spill] sm:$0xff] %v12336_v15  ;;  %14843 = vst [vmem:[#allocation27_spill] sm:$0xff] %v12339_v16  ;;  %9902 = vmatmul.mubr.msk.f32.vlgmr.msra.gmra.mrb[0].mxu1 %vm558_vm0, %v734_v34 }
  0xc7   : > { %14844 = vst [vmem:[#allocation28_spill] sm:$0xff] %v12342_v17  ;;  %636 = vst.msk [vmem:[#allocation2 + $0x68] sm:$0xff] %vm558_vm0, %v12317_v10  ;;  %9905 = vmatpush3.msra.mxu1 %v737_v38  ;;  %9906 = vmatprep.mubr.msk.f32.mxu1 %vm11722_vm1, %v14639_v1  ;;  %v891_v1 = vld [vmem:[#allocation2 + $0x7] sm:$0xff] }
  0xc8   : > { %637 = vst.msk [vmem:[#allocation2 + $0x70] sm:$0xff] %vm558_vm0, %v12320_v11  ;;  %638 = vst.msk [vmem:[#allocation2 + $0x88] sm:$0xff] %vm558_vm0, %v12323_v12  ;;  %10861 = vmatprep.subr.bf16.mxu1 %v10860_v48 }
  0xc9   : > { %14845 = vst [vmem:[#allocation29_spill] sm:$0xff] %v12351_v19  ;;  %14846 = vst [vmem:[#allocation30_spill] sm:$0xff] %v12354_v20  ;;  %v12533_v59 = vld [vmem:[#allocation2 + $0x28] sm:$0xff] }
  0xca   : > { %14847 = vst [vmem:[#allocation31_spill] sm:$0xff] %v12357_v21  ;;  %639 = vst.msk [vmem:[#allocation2 + $0x90] sm:$0xff] %vm558_vm0, %v12336_v15 }
  0xcb   : > { %640 = vst.msk [vmem:[#allocation2 + $0xa8] sm:$0xff] %vm558_vm0, %v12339_v16  ;;  %641 = vst.msk [vmem:[#allocation2 + $0xb0] sm:$0xff] %vm558_vm0, %v12342_v17  ;;  %v12540_v61 = vld [vmem:[#allocation2 + $0x30] sm:$0xff] }
  0xcc   : > { %14848 = vst [vmem:[#allocation32_spill] sm:$0xff] %v12369_v23  ;;  %14849 = vst [vmem:[#allocation33_spill] sm:$0xff] %v12372_v24  ;;  %v12542_v62 = vld [vmem:[#allocation2 + $0x48] sm:$0xff]  ;;  %v12549_v63 = vld [vmem:[#allocation2 + $0x50] sm:$0xff] }
  0xcd   : > { %14850 = vst [vmem:[#allocation34_spill] sm:$0xff] %v12375_v25  ;;  %642 = vst.msk [vmem:[#allocation2 + $0xc8] sm:$0xff] %vm558_vm0, %v12351_v19 }
  0xce   : > { %643 = vst.msk [vmem:[#allocation2 + $0xd0] sm:$0xff] %vm558_vm0, %v12354_v20  ;;  %644 = vst.msk [vmem:[#allocation2 + $0xe8] sm:$0xff] %vm558_vm0, %v12357_v21  ;;  %v12551_v0 = vld [vmem:[#allocation2 + $0x68] sm:$0xff] }
  0xcf   : > { %14851 = vst [vmem:[#allocation35_spill] sm:$0xff] %v12384_v27  ;;  %14852 = vst [vmem:[#allocation36_spill] sm:$0xff] %v12387_v28  ;;  %v12557_v2 = vld [vmem:[#allocation2 + $0x70] sm:$0xff]  ;;  %v12559_v3 = vld [vmem:[#allocation2 + $0x88] sm:$0xff] }
  0xd0   : > { %14853 = vst [vmem:[#allocation37_spill] sm:$0xff] %v12390_v29  ;;  %645 = vst.msk [vmem:[#allocation2 + $0xf0] sm:$0xff] %vm558_vm0, %v12369_v23 }
  0xd1   : > { %646 = vst.msk [vmem:[#allocation2 + $0x108] sm:$0xff] %vm558_vm0, %v12372_v24  ;;  %647 = vst.msk [vmem:[#allocation2 + $0x110] sm:$0xff] %vm558_vm0, %v12375_v25  ;;  %v12565_v5 = vld [vmem:[#allocation2 + $0x90] sm:$0xff] }
  0xd2   : > { %14854 = vst [vmem:[#allocation38_spill] sm:$0xff] %v12401_v31  ;;  %14855 = vst [vmem:[#allocation39_spill] sm:$0xff] %v12404_v32  ;;  %v12567_v9 = vld [vmem:[#allocation2 + $0xa8] sm:$0xff]  ;;  %v12573_v13 = vld [vmem:[#allocation2 + $0xb0] sm:$0xff] }
  0xd3   : > { %14856 = vst [vmem:[#allocation40_spill] sm:$0xff] %v12407_v33  ;;  %648 = vst.msk [vmem:[#allocation2 + $0x128] sm:$0xff] %vm558_vm0, %v12384_v27 }
  0xd4   : > { %649 = vst.msk [vmem:[#allocation2 + $0x130] sm:$0xff] %vm558_vm0, %v12387_v28  ;;  %650 = vst.msk [vmem:[#allocation2 + $0x148] sm:$0xff] %vm558_vm0, %v12390_v29  ;;  %v12575_v14 = vld [vmem:[#allocation2 + $0xc8] sm:$0xff] }
  0xd5   : > { %14857 = vst [vmem:[#allocation41_spill] sm:$0xff] %v12416_v35  ;;  %14858 = vst [vmem:[#allocation42_spill] sm:$0xff] %v12419_v36  ;;  %v12581_v18 = vld [vmem:[#allocation2 + $0xd0] sm:$0xff]  ;;  %v12583_v22 = vld [vmem:[#allocation2 + $0xe8] sm:$0xff] }
  0xd6   : > { %14859 = vst [vmem:[#allocation43_spill] sm:$0xff] %v12422_v37  ;;  %651 = vst.msk [vmem:[#allocation2 + $0x150] sm:$0xff] %vm558_vm0, %v12401_v31  ;;  %v12714_v29 = vld [vmem:[#allocation2 + $0xe7] sm:$0xff] }
  0xd7   : > { %652 = vst.msk [vmem:[#allocation2 + $0x168] sm:$0xff] %vm558_vm0, %v12404_v32  ;;  %653 = vst.msk [vmem:[#allocation2 + $0x170] sm:$0xff] %vm558_vm0, %v12407_v33  ;;  %v12589_v26 = vld [vmem:[#allocation2 + $0xf0] sm:$0xff]  ;;  %v12706_v32 = vld [vmem:[#allocation2 + $0xc7] sm:$0xff] }
  0xd8   : > { %14860 = vst [vmem:[#allocation44_spill] sm:$0xff] %v12433_v39  ;;  %14861 = vst [vmem:[#allocation45_spill] sm:$0xff] %v12436_v40  ;;  %v12591_v30 = vld [vmem:[#allocation2 + $0x108] sm:$0xff]  ;;  %v12597_v34 = vld [vmem:[#allocation2 + $0x110] sm:$0xff] }
  0xd9   : > { %14862 = vst [vmem:[#allocation46_spill] sm:$0xff] %v12439_v41  ;;  %656 = vst.msk [vmem:[#allocation2 + $0x1a8] sm:$0xff] %vm558_vm0, %v12422_v37  ;;  %v12668_v37 = vld [vmem:[#allocation2 + $0x47] sm:$0xff]  ;;  %v12712_v33 = vld [vmem:[#allocation2 + $0xcf] sm:$0xff] }
  0xda   : > { %654 = vst.msk [vmem:[#allocation2 + $0x188] sm:$0xff] %vm558_vm0, %v12416_v35  ;;  %655 = vst.msk [vmem:[#allocation2 + $0x190] sm:$0xff] %vm558_vm0, %v12419_v36  ;;  %v12599_v38 = vld [vmem:[#allocation2 + $0x128] sm:$0xff]  ;;  %v14876_v35 = vmov 0.0  }
  0xdb   : > { %14863 = vst [vmem:[#allocation47_spill] sm:$0xff] %v12448_v43  ;;  %14864 = vst [vmem:[#allocation48_spill] sm:$0xff] %v12451_v44  ;;  %v12605_v42 = vld [vmem:[#allocation2 + $0x130] sm:$0xff]  ;;  %v12607_v46 = vld [vmem:[#allocation2 + $0x148] sm:$0xff] }
  0xdc   : > { %14865 = vst [vmem:[#allocation49_spill] sm:$0xff] %v12454_v45  ;;  %657 = vst.msk [vmem:[#allocation2 + $0x1b0] sm:$0xff] %vm558_vm0, %v12433_v39  ;;  %v12694_v39 = vld [vmem:[#allocation2 + $0xa7] sm:$0xff]  ;;  %v12704_v36 = vld [vmem:[#allocation2 + $0xaf] sm:$0xff] }
  0xdd   : > { %658 = vst.msk [vmem:[#allocation2 + $0x1c8] sm:$0xff] %vm558_vm0, %v12436_v40  ;;  %659 = vst.msk [vmem:[#allocation2 + $0x1d0] sm:$0xff] %vm558_vm0, %v12439_v41  ;;  %v12666_v41 = vld [vmem:[#allocation2 + $0x2f] sm:$0xff]  ;;  %v12722_v27 = vld [vmem:[#allocation2 + $0x107] sm:$0xff] }
  0xde   : > { %14866 = vst [vmem:[#allocation50_spill] sm:$0xff] %v12465_v47  ;;  %660 = vst.msk [vmem:[#allocation2 + $0x1e8] sm:$0xff] %vm558_vm0, %v12448_v43  ;;  %v12615_v49 = vld [vmem:[#allocation2 + $0x168] sm:$0xff]  ;;  %v12621_v50 = vld [vmem:[#allocation2 + $0x170] sm:$0xff] }
  0xdf   : > { %661 = vst.msk [vmem:[#allocation2 + $0x1f0] sm:$0xff] %vm558_vm0, %v12451_v44  ;;  %662 = vst.msk [vmem:[#allocation2 + $0x208] sm:$0xff] %vm558_vm0, %v12454_v45  ;;  %v2023_v45 = vld [vmem:[#allocation7 + $0x30] sm:$0xff]  ;;  %v12658_v44 = vld [vmem:[#allocation2 + $0x27] sm:$0xff] }
  0xe0   : > { %663 = vst.msk [vmem:[#allocation2 + $0x210] sm:$0xff] %vm558_vm0, %v12465_v47  ;;  %v2024_v47 = vld [vmem:[#allocation7 + $0x38] sm:$0xff]  ;;  %v892_v43 = vld [vmem:[#allocation2 + $0xf] sm:$0xff]  ;;  %8504 = vst [vmem:[%s12696_s29] sm:$0xff] %v14876_v35 }
  0xe1   : > { %v12660_v40 = vpack.c.bf16 %v2024_v47, %v2023_v45  ;;  %v12683_v45 = vld [vmem:[#allocation2 + $0x6f] sm:$0xff]  ;;  %v12685_v47 = vld [vmem:[#allocation2 + $0x87] sm:$0xff] }
  0xe2   : > { %v12720_v31 = vld [vmem:[#allocation2 + $0xef] sm:$0xff]  ;;  %v12730_v24 = vld [vmem:[#allocation2 + $0x127] sm:$0xff] }
  0xe3   : > { %v12728_v28 = vld [vmem:[#allocation2 + $0x10f] sm:$0xff]  ;;  %v12738_v21 = vld [vmem:[#allocation2 + $0x147] sm:$0xff] }
  0xe4   : > { %v12645_v56 = vld [vmem:[#allocation2 + $0x1d0] sm:$0xff]  ;;  %v12746_v19 = vld [vmem:[#allocation2 + $0x167] sm:$0xff] }
  0xe5   : > { %14872 = vst [vmem:[#allocation56_spill] sm:$0xff] %v12645_v56  ;;  %v12647_v57 = vld [vmem:[#allocation2 + $0x1e8] sm:$0xff] }
  0xe6   : > { %14873 = vst [vmem:[#allocation57_spill] sm:$0xff] %v12647_v57  ;;  %v12736_v25 = vld [vmem:[#allocation2 + $0x12f] sm:$0xff]  ;;  %v12754_v16 = vld [vmem:[#allocation2 + $0x187] sm:$0xff] }
  0xe7   : > { %v12744_v23 = vld [vmem:[#allocation2 + $0x14f] sm:$0xff]  ;;  %v12762_v12 = vld [vmem:[#allocation2 + $0x1a7] sm:$0xff] }
  0xe8   : > { %v12752_v20 = vld [vmem:[#allocation2 + $0x16f] sm:$0xff]  ;;  %v12770_v10 = vld [vmem:[#allocation2 + $0x1c7] sm:$0xff] }
  0xe9   : > { %v12760_v17 = vld [vmem:[#allocation2 + $0x18f] sm:$0xff]  ;;  %v12778_v7 = vld [vmem:[#allocation2 + $0x1e7] sm:$0xff] }
  0xea   : > { %v12768_v15 = vld [vmem:[#allocation2 + $0x1af] sm:$0xff] }
  0xeb   : > { %v12776_v11 = vld [vmem:[#allocation2 + $0x1cf] sm:$0xff] }
  0xec   : > { %v12784_v8 = vld [vmem:[#allocation2 + $0x1ef] sm:$0xff] }
  0xed   : > { %v2412_v35 = vld [vmem:[#allocation7 + $0x48] sm:$0xff] }
 0x199   : > { %v808_v51 = vpop.f32.mrb[0].mxu1 }
 0x19a   : > { %v812_v52 = vmax.f32 %v808_v51, 0.0  ;;  %v9903_v53 = vpop.f32.mrb[1].mxu1  ;;  %v12623_v51 = vld [vmem:[#allocation2 + $0x188] sm:$0xff] }
 0x19b   : > { %14867 = vst [vmem:[#allocation51_spill] sm:$0xff] %v12623_v51  ;;  %v12631_v53 = vld [vmem:[#allocation2 + $0x1a8] sm:$0xff] }
 0x19c   : > { %9907 = vmatmul.mubr.msk.f32.vlgmr.msra.gmra.mrb[2].mxu1 %vm813_vm2, %v812_v52  ;;  %v12629_v52 = vld [vmem:[#allocation2 + $0x190] sm:$0xff]  ;;  %14869 = vst [vmem:[#allocation53_spill] sm:$0xff] %v12631_v53 }
 0x19d   : > { %10863 = vmatpush3.bf16.msra.mxu1 %v10860_v48  ;;  %9913 = vmatprep.mubr.msk.f32.mxu1 %vm558_vm0, %v925_v54  ;;  %v12613_v48 = vld [vmem:[#allocation2 + $0x150] sm:$0xff]  ;;  %14868 = vst [vmem:[#allocation52_spill] sm:$0xff] %v12629_v52 }
 0x19e   : > { %10865 = vmatprep.subr.bf16.mxu1 %v10864_v55  ;;  %v12637_v54 = vld [vmem:[#allocation2 + $0x1b0] sm:$0xff] }
 0x19f   : > { %14870 = vst [vmem:[#allocation54_spill] sm:$0xff] %v12637_v54 }
 0x1a0   : > { %9914 = vmatmul.mubr.msk.f32.vlgmr.msra.gmra.mrb[4].mxu1 %vm558_vm0, %v926_v58  ;;  %v12653_v58 = vld [vmem:[#allocation2 + $0x1f0] sm:$0xff] }
 0x1a1   : > { %10867 = vmatpush3.bf16.msra.mxu1 %v10864_v55  ;;  %9916 = vmatprep.mubr.msk.f32.mxu1 %vm558_vm0, %v12533_v59  ;;  %v12639_v55 = vld [vmem:[#allocation2 + $0x1c8] sm:$0xff]  ;;  %14874 = vst [vmem:[#allocation58_spill] sm:$0xff] %v12653_v58 }
 0x1a2   : > { %10869 = vmatprep.subr.bf16.mxu1 %v12535_v60  ;;  %14871 = vst [vmem:[#allocation55_spill] sm:$0xff] %v12639_v55 }
 0x1a4   : > { %9917 = vmatmul.mubr.msk.f32.gmra.mrb[6].mxu1 %vm558_vm0, %v12540_v61 }
 0x1a5   : > { %9919 = vmatprep.mubr.msk.f32.mxu1 %vm558_vm0, %v12542_v62 }
 0x1a8   : > { %9920 = vmatmul.mubr.msk.f32.gmra.mrb[8].mxu1 %vm558_vm0, %v12549_v63 }
 0x1a9   : > { %9922 = vmatprep.mubr.msk.f32.mxu1 %vm558_vm0, %v12551_v0 }
 0x1ac   : > { %9923 = vmatmul.mubr.msk.f32.gmra.mrb[10].mxu1 %vm558_vm0, %v12557_v2 }
 0x1ad   : > { %9925 = vmatprep.mubr.msk.f32.mxu1 %vm558_vm0, %v12559_v3 }
 0x1b0   : > { %9926 = vmatmul.mubr.msk.f32.gmra.mrb[12].mxu1 %vm558_vm0, %v12565_v5 }
 0x1b1   : > { %9928 = vmatprep.mubr.msk.f32.mxu1 %vm558_vm0, %v12567_v9 }
 0x1b4   : > { %9929 = vmatmul.mubr.msk.f32.gmra.mrb[14].mxu1 %vm558_vm0, %v12573_v13 }
 0x1b5   : > { %9931 = vmatprep.mubr.msk.f32.mxu1 %vm558_vm0, %v12575_v14 }
 0x1b8   : > { %9932 = vmatmul.mubr.msk.f32.gmra.mrb[16].mxu1 %vm558_vm0, %v12581_v18 }
 0x1b9   : > { %9934 = vmatprep.mubr.msk.f32.mxu1 %vm558_vm0, %v12583_v22 }
 0x1bc   : > { %9935 = vmatmul.mubr.msk.f32.gmra.mrb[18].mxu1 %vm558_vm0, %v12589_v26 }
 0x1bd   : > { %9937 = vmatprep.mubr.msk.f32.mxu1 %vm558_vm0, %v12591_v30 }
 0x1c0   : > { %9938 = vmatmul.mubr.msk.f32.gmra.mrb[20].mxu1 %vm558_vm0, %v12597_v34 }
 0x1c1   : > { %9940 = vmatprep.mubr.msk.f32.mxu1 %vm558_vm0, %v12599_v38 }
 0x1c4   : > { %9941 = vmatmul.mubr.msk.f32.gmra.mrb[22].mxu1 %vm558_vm0, %v12605_v42 }
 0x1c5   : > { %9943 = vmatprep.mubr.msk.f32.mxu1 %vm558_vm0, %v12607_v46 }
 0x1c8   : > { %9944 = vmatmul.mubr.msk.f32.gmra.mrb[24].mxu1 %vm558_vm0, %v12613_v48 }
 0x1c9   : > { %9946 = vmatprep.mubr.msk.f32.mxu1 %vm558_vm0, %v12615_v49 }
 0x1cc   : > { %9947 = vmatmul.mubr.msk.f32.gmra.mrb[26].mxu1 %vm558_vm0, %v12621_v50 }
 0x1cd   : > { %9949 = vmatprep.mubr.msk.f32.mxu1 %vm558_vm0, %v12623_v51 }
 0x1d0   : > { %9950 = vmatmul.mubr.msk.f32.gmra.mrb[28].mxu1 %vm558_vm0, %v12629_v52 }
 0x1d1   : > { %9952 = vmatprep.mubr.msk.f32.mxu1 %vm558_vm0, %v12631_v53 }
 0x1d4   : > { %9953 = vmatmul.mubr.msk.f32.gmra.mrb[30].mxu1 %vm558_vm0, %v12637_v54  ;;  %v12799_v54 = vld [vmem:[#allocation2 + $0x49] sm:$0xff] }
 0x1d5   : > { %9955 = vmatprep.mubr.msk.f32.mxu1 %vm558_vm0, %v12639_v55  ;;  %v12797_v55 = vld [vmem:[#allocation2 + $0x31] sm:$0xff]  ;;  %14878 = vst [vmem:[#allocation61_spill] sm:$0xff] %v12799_v54 }
 0x1d6   : > { %14877 = vst [vmem:[#allocation60_spill] sm:$0xff] %v12797_v55 }
 0x1d8   : > { %9956 = vmatmul.mubr.msk.f32.gmra.mrb[32].mxu1 %vm558_vm0, %v12645_v56  ;;  %v12791_v56 = vpack.c.bf16 %v2412_v35, %v2411_v6  ;;  %v12808_v6 = vld [vmem:[#allocation2 + $0x69] sm:$0xff]  ;;  %v12814_v35 = vld [vmem:[#allocation2 + $0x71] sm:$0xff] }
 0x1d9   : > { %9958 = vmatprep.mubr.msk.f32.mxu1 %vm558_vm0, %v12647_v57  ;;  %v12789_v57 = vld [vmem:[#allocation2 + $0x29] sm:$0xff]  ;;  %14880 = vst [vmem:[#allocation63_spill] sm:$0xff] %v12808_v6  ;;  %14881 = vst [vmem:[#allocation64_spill] sm:$0xff] %v12814_v35 }
 0x1dc   : > { %9959 = vmatmul.mubr.msk.f32.gmra.mrb[34].mxu1 %vm558_vm0, %v12653_v58  ;;  %v1603_v58 = vld [vmem:[#allocation2 + $0x11] sm:$0xff] }
 0x1dd   : > { %9965 = vmatprep.mubr.msk.f32.mxu1 %vm558_vm0, %v891_v1  ;;  %v12675_v1 = vld [vmem:[#allocation2 + $0x4f] sm:$0xff] }
 0x1e0   : > { %9966 = vmatmul.mubr.msk.f32.vlgmr.msra.gmra.mrb[4].mxu1 %vm558_vm0, %v892_v43  ;;  %v12677_v43 = vld [vmem:[#allocation2 + $0x67] sm:$0xff] }
 0x1e1   : > { %10871 = vmatpush3.bf16.msra.mxu1 %v12535_v60  ;;  %9968 = vmatprep.mubr.msk.f32.mxu1 %vm558_vm0, %v12658_v44  ;;  %v12692_v60 = vld [vmem:[#allocation2 + $0x8f] sm:$0xff] }
 0x1e2   : > { %10873 = vmatprep.subr.bf16.mxu1 %v12660_v40  ;;  %14875 = vst [vmem:[#allocation59_spill] sm:$0xff] %v12692_v60 }
 0x1e4   : > { %9969 = vmatmul.mubr.msk.f32.gmra.mrb[6].mxu1 %vm558_vm0, %v12666_v41 }
 0x1e5   : > { %9971 = vmatprep.mubr.msk.f32.mxu1 %vm558_vm0, %v12668_v37 }
 0x1e8   : > { %9972 = vmatmul.mubr.msk.f32.gmra.mrb[8].mxu1 %vm558_vm0, %v12675_v1 }
 0x1e9   : > { %9974 = vmatprep.mubr.msk.f32.mxu1 %vm558_vm0, %v12677_v43 }
 0x1ec   : > { %9975 = vmatmul.mubr.msk.f32.gmra.mrb[10].mxu1 %vm558_vm0, %v12683_v45 }
 0x1ed   : > { %9977 = vmatprep.mubr.msk.f32.mxu1 %vm558_vm0, %v12685_v47 }
 0x1f0   : > { %9978 = vmatmul.mubr.msk.f32.gmra.mrb[12].mxu1 %vm558_vm0, %v12692_v60 }
 0x1f1   : > { %9980 = vmatprep.mubr.msk.f32.mxu1 %vm558_vm0, %v12694_v39 }
 0x1f4   : > { %9981 = vmatmul.mubr.msk.f32.gmra.mrb[14].mxu1 %vm558_vm0, %v12704_v36 }
 0x1f5   : > { %9983 = vmatprep.mubr.msk.f32.mxu1 %vm558_vm0, %v12706_v32 }
 0x1f8   : > { %9984 = vmatmul.mubr.msk.f32.gmra.mrb[16].mxu1 %vm558_vm0, %v12712_v33 }
 0x1f9   : > { %9986 = vmatprep.mubr.msk.f32.mxu1 %vm558_vm0, %v12714_v29 }
 0x1fc   : > { %9987 = vmatmul.mubr.msk.f32.gmra.mrb[18].mxu1 %vm558_vm0, %v12720_v31 }
 0x1fd   : > { %9989 = vmatprep.mubr.msk.f32.mxu1 %vm558_vm0, %v12722_v27 }
 0x200   : > { %9990 = vmatmul.mubr.msk.f32.gmra.mrb[20].mxu1 %vm558_vm0, %v12728_v28 }
 0x201   : > { %9992 = vmatprep.mubr.msk.f32.mxu1 %vm558_vm0, %v12730_v24 }
 0x204   : > { %9993 = vmatmul.mubr.msk.f32.gmra.mrb[22].mxu1 %vm558_vm0, %v12736_v25 }
 0x205   : > { %9995 = vmatprep.mubr.msk.f32.mxu1 %vm558_vm0, %v12738_v21 }
 0x208   : > { %9996 = vmatmul.mubr.msk.f32.gmra.mrb[24].mxu1 %vm558_vm0, %v12744_v23 }
 0x209   : > { %9998 = vmatprep.mubr.msk.f32.mxu1 %vm558_vm0, %v12746_v19 }
 0x20c   : > { %9999 = vmatmul.mubr.msk.f32.gmra.mrb[26].mxu1 %vm558_vm0, %v12752_v20 }
 0x20d   : > { %10001 = vmatprep.mubr.msk.f32.mxu1 %vm558_vm0, %v12754_v16 }
 0x210   : > { %10002 = vmatmul.mubr.msk.f32.gmra.mrb[28].mxu1 %vm558_vm0, %v12760_v17 }
 0x211   : > { %10004 = vmatprep.mubr.msk.f32.mxu1 %vm558_vm0, %v12762_v12 }
 0x214   : > { %10005 = vmatmul.mubr.msk.f32.gmra.mrb[30].mxu1 %vm558_vm0, %v12768_v15 }
 0x215   : > { %10007 = vmatprep.mubr.msk.f32.mxu1 %vm558_vm0, %v12770_v10 }
 0x218   : > { %10008 = vmatmul.mubr.msk.f32.gmra.mrb[32].mxu1 %vm558_vm0, %v12776_v11 }
 0x219   : > { %10010 = vmatprep.mubr.msk.f32.mxu1 %vm558_vm0, %v12778_v7 }
 0x21c   : > { %10011 = vmatmul.mubr.msk.f32.gmra.mrb[34].mxu1 %vm558_vm0, %v12784_v8 }
 0x21d   : > { %10017 = vmatprep.mubr.msk.f32.mxu1 %vm558_vm0, %v1602_v4  ;;  %v12806_v4 = vld [vmem:[#allocation2 + $0x51] sm:$0xff] }
 0x21e   : > { %14879 = vst [vmem:[#allocation62_spill] sm:$0xff] %v12806_v4 }
 0x220   : > { %10018 = vmatmul.mubr.msk.f32.vlgmr.msra.gmra.mrb[4].mxu1 %vm558_vm0, %v1603_v58  ;;  %v12822_v58 = vld [vmem:[#allocation2 + $0x91] sm:$0xff] }
 0x221   : > { %10875 = vmatpush3.bf16.msra.mxu1 %v12660_v40  ;;  %10020 = vmatprep.mubr.msk.f32.mxu1 %vm558_vm0, %v12789_v57  ;;  %v12816_v40 = vld [vmem:[#allocation2 + $0x89] sm:$0xff]  ;;  %14883 = vst [vmem:[#allocation66_spill] sm:$0xff] %v12822_v58 }
 0x222   : > { %10877 = vmatprep.subr.bf16.mxu1 %v12791_v56  ;;  %14882 = vst [vmem:[#allocation65_spill] sm:$0xff] %v12816_v40 }
 0x224   : > { %10021 = vmatmul.mubr.msk.f32.gmra.mrb[6].mxu1 %vm558_vm0, %v12797_v55  ;;  %v2800_v55 = vld [vmem:[#allocation7 + $0x58] sm:$0xff] }
 0x225   : > { %10023 = vmatprep.mubr.msk.f32.mxu1 %vm558_vm0, %v12799_v54  ;;  %v12824_v54 = vld [vmem:[#allocation2 + $0xa9] sm:$0xff] }
 0x226   : > { %14884 = vst [vmem:[#allocation67_spill] sm:$0xff] %v12824_v54 }
 0x228   : > { %10024 = vmatmul.mubr.msk.f32.gmra.mrb[8].mxu1 %vm558_vm0, %v12806_v4  ;;  %v12832_v4 = vld [vmem:[#allocation2 + $0xc9] sm:$0xff] }
 0x229   : > { %10026 = vmatprep.mubr.msk.f32.mxu1 %vm558_vm0, %v12808_v6  ;;  %v12830_v6 = vld [vmem:[#allocation2 + $0xb1] sm:$0xff]  ;;  %14886 = vst [vmem:[#allocation69_spill] sm:$0xff] %v12832_v4 }
 0x22a   : > { %14885 = vst [vmem:[#allocation68_spill] sm:$0xff] %v12830_v6 }
 0x22c   : > { %10027 = vmatmul.mubr.msk.f32.gmra.mrb[10].mxu1 %vm558_vm0, %v12814_v35  ;;  %v12840_v35 = vld [vmem:[#allocation2 + $0xe9] sm:$0xff] }
 0x22d   : > { %10029 = vmatprep.mubr.msk.f32.mxu1 %vm558_vm0, %v12816_v40  ;;  %v12838_v40 = vld [vmem:[#allocation2 + $0xd1] sm:$0xff]  ;;  %14888 = vst [vmem:[#allocation71_spill] sm:$0xff] %v12840_v35 }
 0x22e   : > { %14887 = vst [vmem:[#allocation70_spill] sm:$0xff] %v12838_v40 }
 0x230   : > { %10030 = vmatmul.mubr.msk.f32.gmra.mrb[12].mxu1 %vm558_vm0, %v12822_v58  ;;  %v12848_v58 = vld [vmem:[#allocation2 + $0x109] sm:$0xff] }
 0x231   : > { %10032 = vmatprep.mubr.msk.f32.mxu1 %vm558_vm0, %v12824_v54  ;;  %v12846_v54 = vld [vmem:[#allocation2 + $0xf1] sm:$0xff]  ;;  %14890 = vst [vmem:[#allocation73_spill] sm:$0xff] %v12848_v58 }
 0x232   : > { %14889 = vst [vmem:[#allocation72_spill] sm:$0xff] %v12846_v54 }
 0x234   : > { %10033 = vmatmul.mubr.msk.f32.gmra.mrb[14].mxu1 %vm558_vm0, %v12830_v6  ;;  %v12856_v6 = vld [vmem:[#allocation2 + $0x129] sm:$0xff] }
 0x235   : > { %10035 = vmatprep.mubr.msk.f32.mxu1 %vm558_vm0, %v12832_v4  ;;  %v12854_v4 = vld [vmem:[#allocation2 + $0x111] sm:$0xff]  ;;  %14892 = vst [vmem:[#allocation75_spill] sm:$0xff] %v12856_v6 }
 0x236   : > { %14891 = vst [vmem:[#allocation74_spill] sm:$0xff] %v12854_v4 }
 0x238   : > { %10036 = vmatmul.mubr.msk.f32.gmra.mrb[16].mxu1 %vm558_vm0, %v12838_v40  ;;  %v12864_v40 = vld [vmem:[#allocation2 + $0x149] sm:$0xff] }
 0x239   : > { %10038 = vmatprep.mubr.msk.f32.mxu1 %vm558_vm0, %v12840_v35  ;;  %v12862_v35 = vld [vmem:[#allocation2 + $0x131] sm:$0xff]  ;;  %14894 = vst [vmem:[#allocation77_spill] sm:$0xff] %v12864_v40 }
 0x23a   : > { %14893 = vst [vmem:[#allocation76_spill] sm:$0xff] %v12862_v35 }
 0x23c   : > { %10039 = vmatmul.mubr.msk.f32.gmra.mrb[18].mxu1 %vm558_vm0, %v12846_v54  ;;  %v12872_v54 = vld [vmem:[#allocation2 + $0x169] sm:$0xff] }
 0x23d   : > { %10041 = vmatprep.mubr.msk.f32.mxu1 %vm558_vm0, %v12848_v58  ;;  %v12870_v58 = vld [vmem:[#allocation2 + $0x151] sm:$0xff]  ;;  %14896 = vst [vmem:[#allocation79_spill] sm:$0xff] %v12872_v54 }
 0x23e   : > { %14895 = vst [vmem:[#allocation78_spill] sm:$0xff] %v12870_v58 }
 0x240   : > { %10042 = vmatmul.mubr.msk.f32.gmra.mrb[20].mxu1 %vm558_vm0, %v12854_v4  ;;  %v12880_v4 = vld [vmem:[#allocation2 + $0x189] sm:$0xff] }
 0x241   : > { %10044 = vmatprep.mubr.msk.f32.mxu1 %vm558_vm0, %v12856_v6  ;;  %v12878_v6 = vld [vmem:[#allocation2 + $0x171] sm:$0xff]  ;;  %14898 = vst [vmem:[#allocation81_spill] sm:$0xff] %v12880_v4 }
 0x242   : > { %14897 = vst [vmem:[#allocation80_spill] sm:$0xff] %v12878_v6 }
 0x244   : > { %10045 = vmatmul.mubr.msk.f32.gmra.mrb[22].mxu1 %vm558_vm0, %v12862_v35  ;;  %v12888_v35 = vld [vmem:[#allocation2 + $0x1a9] sm:$0xff] }
 0x245   : > { %10047 = vmatprep.mubr.msk.f32.mxu1 %vm558_vm0, %v12864_v40  ;;  %v12886_v40 = vld [vmem:[#allocation2 + $0x191] sm:$0xff]  ;;  %14900 = vst [vmem:[#allocation83_spill] sm:$0xff] %v12888_v35 }
 0x246   : > { %14899 = vst [vmem:[#allocation82_spill] sm:$0xff] %v12886_v40 }
 0x248   : > { %10048 = vmatmul.mubr.msk.f32.gmra.mrb[24].mxu1 %vm558_vm0, %v12870_v58  ;;  %v12896_v58 = vld [vmem:[#allocation2 + $0x1c9] sm:$0xff] }
 0x249   : > { %10050 = vmatprep.mubr.msk.f32.mxu1 %vm558_vm0, %v12872_v54  ;;  %v12894_v54 = vld [vmem:[#allocation2 + $0x1b1] sm:$0xff]  ;;  %14902 = vst [vmem:[#allocation85_spill] sm:$0xff] %v12896_v58 }
 0x24a   : > { %14901 = vst [vmem:[#allocation84_spill] sm:$0xff] %v12894_v54 }
 0x24c   : > { %10051 = vmatmul.mubr.msk.f32.gmra.mrb[26].mxu1 %vm558_vm0, %v12878_v6  ;;  %v12904_v6 = vld [vmem:[#allocation2 + $0x1e9] sm:$0xff] }
 0x24d   : > { %10053 = vmatprep.mubr.msk.f32.mxu1 %vm558_vm0, %v12880_v4  ;;  %v12902_v4 = vld [vmem:[#allocation2 + $0x1d1] sm:$0xff] }
 0x24e   : > { %14903 = vst [vmem:[#allocation86_spill] sm:$0xff] %v12902_v4 }
 0x250   : > { %10054 = vmatmul.mubr.msk.f32.gmra.mrb[28].mxu1 %vm558_vm0, %v12886_v40  ;;  %v2799_v40 = vld [vmem:[#allocation7 + $0x50] sm:$0xff] }
 0x251   : > { %10056 = vmatprep.mubr.msk.f32.mxu1 %vm558_vm0, %v12888_v35  ;;  %v12910_v35 = vld [vmem:[#allocation2 + $0x1f1] sm:$0xff] }
 0x254   : > { %10057 = vmatmul.mubr.msk.f32.gmra.mrb[30].mxu1 %vm558_vm0, %v12894_v54 }
 0x255   : > { %10059 = vmatprep.mubr.msk.f32.mxu1 %vm558_vm0, %v12896_v58  ;;  %v10880_v58 = vpack.c.bf16 %v2800_v55, %v2799_v40 }
 0x258   : > { %10060 = vmatmul.mubr.msk.f32.gmra.mrb[32].mxu1 %vm558_vm0, %v12902_v4 }
 0x259   : > { %10062 = vmatprep.mubr.msk.f32.mxu1 %vm558_vm0, %v12904_v6 }
 0x25c   : > { %10063 = vmatmul.mubr.msk.f32.gmra.mrb[34].mxu1 %vm558_vm0, %v12910_v35 }
 0x25d   : > { %10069 = vmatprep.mubr.msk.f32.mxu1 %vm558_vm0, %v12658_v44 }
 0x260   : > { %10070 = vmatmul.mubr.msk.f32.vlgmr.msra.gmra.mrb[4].mxu1 %vm558_vm0, %v12666_v41  ;;  %v738_v41 = vld [vmem:[%s14624_s9] sm:$0x1] }
 0x261   : > { %10879 = vmatpush3.bf16.msra.mxu1 %v12791_v56  ;;  %10072 = vmatprep.mubr.msk.f32.mxu1 %vm558_vm0, %v12668_v37 }
 0x262   : > { %10881 = vmatprep.subr.bf16.mxu1 %v10880_v58 }
 0x264   : > { %10073 = vmatmul.mubr.msk.f32.gmra.mrb[6].mxu1 %vm558_vm0, %v12675_v1 }
 0x265   : > { %10075 = vmatprep.mubr.msk.f32.mxu1 %vm558_vm0, %v12677_v43 }
 0x268   : > { %10076 = vmatmul.mubr.msk.f32.gmra.mrb[8].mxu1 %vm558_vm0, %v12683_v45 }
 0x269   : > { %10078 = vmatprep.mubr.msk.f32.mxu1 %vm558_vm0, %v12685_v47 }
 0x26c   : > { %10079 = vmatmul.mubr.msk.f32.gmra.mrb[10].mxu1 %vm558_vm0, %v12692_v60 }
 0x26d   : > { %10081 = vmatprep.mubr.msk.f32.mxu1 %vm558_vm0, %v12694_v39 }
 0x26f   : > { %v883_v44 = vpop.f32.mrb[2].mxu1 }
 0x270   : > { %v884_v55 = vadd.f32 %v883_v44, %v738_v41  ;;  %v9908_v56 = vpop.f32.mrb[3].mxu1  ;;  %10082 = vmatmul.mubr.msk.f32.gmra.mrb[12].mxu1 %vm558_vm0, %v12704_v36  ;;  %v12989_v44 = vld [vmem:[#allocation2 + $0x20f] sm:$0xff] }
 0x271   : > { %10084 = vmatprep.mubr.msk.f32.mxu1 %vm558_vm0, %v12706_v32  ;;  %v3189_v56 = vld [vmem:[#allocation7 + $0x68] sm:$0xff] }
 0x272   : > { %v887_v40 = vmax.f32 %v884_v55, 0.0  ;;  %v3188_v55 = vld [vmem:[#allocation7 + $0x60] sm:$0xff] }
 0x274   : > { %v888_v60 = vmin.f32 %v887_v40, 1.0  ;;  %10085 = vmatmul.mubr.msk.f32.gmra.mrb[14].mxu1 %vm558_vm0, %v12712_v33  ;;  %v10884_v40 = vpack.c.bf16 %v3189_v56, %v3188_v55  ;;  %v14908_v55 = vld [vmem:[#allocation57_spill] sm:$0xff]  ;;  %v13051_v56 = vld [vmem:[#allocation2 + $0x208] sm:$0xff] }
 0x275   : > { %10087 = vmatprep.mubr.msk.f32.mxu1 %vm558_vm0, %v12714_v29  ;;  %14909 = vst [vmem:[#allocation88_spill] sm:$0xff] %v13051_v56 }
 0x276   : > { %vm889_vm4 = vcmp.lt.f32.partialorder %v888_v60, 0.1  ;;  %8507 = vst.msk [vmem:[%s12696_s29 + $0x1] sm:$0x1] %vm8505_vm3, %v888_v60 }
 0x277   : > { %v12946_v41 = vsel %vm889_vm4, 0.0, %v888_v60  ;;  %v12983_v60 = vld [vmem:[#allocation2 + $0x207] sm:$0xff] }
 0x278   : > { %14904 = vst [vmem:[#allocation87_spill] sm:$0xff] %v12946_v41  ;;  %8506 = vst.msk [vmem:[%s12696_s29] sm:$0x1] %vm8505_vm3, %v12946_v41  ;;  %10088 = vmatmul.mubr.msk.f32.gmra.mrb[16].mxu1 %vm558_vm0, %v12720_v31  ;;  %v14910_v41 = vld [vmem:[#allocation58_spill] sm:$0xff] }
 0x279   : > { %10090 = vmatprep.mubr.msk.f32.mxu1 %vm558_vm0, %v12722_v27 }
 0x27c   : > { %10091 = vmatmul.mubr.msk.f32.gmra.mrb[18].mxu1 %vm558_vm0, %v12728_v28 }
 0x27d   : > { %10093 = vmatprep.mubr.msk.f32.mxu1 %vm558_vm0, %v12730_v24 }
 0x280   : > { %10094 = vmatmul.mubr.msk.f32.gmra.mrb[20].mxu1 %vm558_vm0, %v12736_v25 }
 0x281   : > { %10096 = vmatprep.mubr.msk.f32.mxu1 %vm558_vm0, %v12738_v21 }
 0x284   : > { %10097 = vmatmul.mubr.msk.f32.gmra.mrb[22].mxu1 %vm558_vm0, %v12744_v23 }
 0x285   : > { %10099 = vmatprep.mubr.msk.f32.mxu1 %vm558_vm0, %v12746_v19 }
 0x288   : > { %10100 = vmatmul.mubr.msk.f32.gmra.mrb[24].mxu1 %vm558_vm0, %v12752_v20 }
 0x289   : > { %10102 = vmatprep.mubr.msk.f32.mxu1 %vm558_vm0, %v12754_v16 }
 0x28c   : > { %10103 = vmatmul.mubr.msk.f32.gmra.mrb[26].mxu1 %vm558_vm0, %v12760_v17 }
 0x28d   : > { %10105 = vmatprep.mubr.msk.f32.mxu1 %vm558_vm0, %v12762_v12 }
 0x290   : > { %10106 = vmatmul.mubr.msk.f32.gmra.mrb[28].mxu1 %vm558_vm0, %v12768_v15 }
 0x291   : > { %10108 = vmatprep.mubr.msk.f32.mxu1 %vm558_vm0, %v12770_v10 }
 0x294   : > { %10109 = vmatmul.mubr.msk.f32.gmra.mrb[30].mxu1 %vm558_vm0, %v12776_v11 }
 0x295   : > { %10111 = vmatprep.mubr.msk.f32.mxu1 %vm558_vm0, %v12778_v7 }
 0x298   : > { %10112 = vmatmul.mubr.msk.f32.gmra.mrb[32].mxu1 %vm558_vm0, %v12784_v8 }
 0x299   : > { %10114 = vmatprep.mubr.msk.f32.mxu1 %vm558_vm0, %v12983_v60 }
 0x29c   : > { %10115 = vmatmul.mubr.msk.f32.gmra.mrb[34].mxu1 %vm558_vm0, %v12989_v44 }
 0x29d   : > { %10121 = vmatprep.mubr.msk.f32.mxu1 %vm558_vm0, %v12533_v59  ;;  %v14905_v59 = vld [vmem:[#allocation54_spill] sm:$0xff] }
 0x2a0   : > { %10122 = vmatmul.mubr.msk.f32.vlgmr.msra.gmra.mrb[4].mxu1 %vm558_vm0, %v12540_v61  ;;  %v14906_v61 = vld [vmem:[#allocation55_spill] sm:$0xff] }
 0x2a1   : > { %10883 = vmatpush3.bf16.msra.mxu1 %v10880_v58  ;;  %10124 = vmatprep.mubr.msk.f32.mxu1 %vm558_vm0, %v12542_v62  ;;  %v14907_v58 = vld [vmem:[#allocation56_spill] sm:$0xff] }
 0x2a2   : > { %10885 = vmatprep.subr.bf16.mxu1 %v10884_v40 }
 0x2a4   : > { %10125 = vmatmul.mubr.msk.f32.gmra.mrb[6].mxu1 %vm558_vm0, %v12549_v63 }
 0x2a5   : > { %10127 = vmatprep.mubr.msk.f32.mxu1 %vm558_vm0, %v12551_v0 }
 0x2a8   : > { %10128 = vmatmul.mubr.msk.f32.gmra.mrb[8].mxu1 %vm558_vm0, %v12557_v2 }
 0x2a9   : > { %10130 = vmatprep.mubr.msk.f32.mxu1 %vm558_vm0, %v12559_v3 }
 0x2ac   : > { %10131 = vmatmul.mubr.msk.f32.gmra.mrb[10].mxu1 %vm558_vm0, %v12565_v5 }
 0x2ad   : > { %10133 = vmatprep.mubr.msk.f32.mxu1 %vm558_vm0, %v12567_v9 }
 0x2b0   : > { %10134 = vmatmul.mubr.msk.f32.gmra.mrb[12].mxu1 %vm558_vm0, %v12573_v13 }
 0x2b1   : > { %10136 = vmatprep.mubr.msk.f32.mxu1 %vm558_vm0, %v12575_v14 }
 0x2b4   : > { %10137 = vmatmul.mubr.msk.f32.gmra.mrb[14].mxu1 %vm558_vm0, %v12581_v18 }
 0x2b5   : > { %10139 = vmatprep.mubr.msk.f32.mxu1 %vm558_vm0, %v12583_v22 }
 0x2b8   : > { %10140 = vmatmul.mubr.msk.f32.gmra.mrb[16].mxu1 %vm558_vm0, %v12589_v26 }
 0x2b9   : > { %10142 = vmatprep.mubr.msk.f32.mxu1 %vm558_vm0, %v12591_v30 }
 0x2bc   : > { %10143 = vmatmul.mubr.msk.f32.gmra.mrb[18].mxu1 %vm558_vm0, %v12597_v34 }
 0x2bd   : > { %10145 = vmatprep.mubr.msk.f32.mxu1 %vm558_vm0, %v12599_v38 }
 0x2c0   : > { %10146 = vmatmul.mubr.msk.f32.gmra.mrb[20].mxu1 %vm558_vm0, %v12605_v42 }
 0x2c1   : > { %10148 = vmatprep.mubr.msk.f32.mxu1 %vm558_vm0, %v12607_v46 }
 0x2c4   : > { %10149 = vmatmul.mubr.msk.f32.gmra.mrb[22].mxu1 %vm558_vm0, %v12613_v48 }
 0x2c5   : > { %10151 = vmatprep.mubr.msk.f32.mxu1 %vm558_vm0, %v12615_v49 }
 0x2c8   : > { %10152 = vmatmul.mubr.msk.f32.gmra.mrb[24].mxu1 %vm558_vm0, %v12621_v50 }
 0x2c9   : > { %10154 = vmatprep.mubr.msk.f32.mxu1 %vm558_vm0, %v12623_v51  ;;  %v14916_v51 = vld [vmem:[#allocation64_spill] sm:$0xff] }
 0x2cc   : > { %10155 = vmatmul.mubr.msk.f32.gmra.mrb[26].mxu1 %vm558_vm0, %v12629_v52  ;;  %v3577_v52 = vld [vmem:[#allocation7 + $0x78] sm:$0xff] }
 0x2cd   : > { %10157 = vmatprep.mubr.msk.f32.mxu1 %vm558_vm0, %v12631_v53  ;;  %v13057_v53 = vld [vmem:[#allocation2 + $0x210] sm:$0xff] }
 0x2ce   : > { %14911 = vst [vmem:[#allocation89_spill] sm:$0xff] %v13057_v53 }
 0x2d0   : > { %10158 = vmatmul.mubr.msk.f32.gmra.mrb[28].mxu1 %vm558_vm0, %v14905_v59  ;;  %v3576_v59 = vld [vmem:[#allocation7 + $0x70] sm:$0xff] }
 0x2d1   : > { %10160 = vmatprep.mubr.msk.f32.mxu1 %vm558_vm0, %v14906_v61  ;;  %v14913_v61 = vld [vmem:[#allocation61_spill] sm:$0xff] }
 0x2d4   : > { %10161 = vmatmul.mubr.msk.f32.gmra.mrb[30].mxu1 %vm558_vm0, %v14907_v58  ;;  %v10888_v58 = vpack.c.bf16 %v3577_v52, %v3576_v59  ;;  %v14918_v52 = vld [vmem:[#allocation66_spill] sm:$0xff]  ;;  %v14921_v59 = vld [vmem:[#allocation69_spill] sm:$0xff] }
 0x2d5   : > { %10163 = vmatprep.mubr.msk.f32.mxu1 %vm558_vm0, %v14908_v55  ;;  %v14912_v55 = vld [vmem:[#allocation60_spill] sm:$0xff] }
 0x2d8   : > { %10164 = vmatmul.mubr.msk.f32.gmra.mrb[32].mxu1 %vm558_vm0, %v14910_v41  ;;  %v14915_v41 = vld [vmem:[#allocation63_spill] sm:$0xff] }
 0x2d9   : > { %10166 = vmatprep.mubr.msk.f32.mxu1 %vm558_vm0, %v13051_v56  ;;  %v14914_v56 = vld [vmem:[#allocation62_spill] sm:$0xff] }
 0x2dc   : > { %10167 = vmatmul.mubr.msk.f32.gmra.mrb[34].mxu1 %vm558_vm0, %v13057_v53  ;;  %v14917_v53 = vld [vmem:[#allocation65_spill] sm:$0xff] }
 0x2dd   : > { %10173 = vmatprep.mubr.msk.f32.mxu1 %vm558_vm0, %v12789_v57  ;;  %v14919_v57 = vld [vmem:[#allocation67_spill] sm:$0xff] }
 0x2e0   : > { %10174 = vmatmul.mubr.msk.f32.vlgmr.msra.gmra.mrb[4].mxu1 %vm558_vm0, %v14912_v55  ;;  %v14922_v55 = vld [vmem:[#allocation70_spill] sm:$0xff] }
 0x2e1   : > { %10887 = vmatpush3.bf16.msra.mxu1 %v10884_v40  ;;  %10176 = vmatprep.mubr.msk.f32.mxu1 %vm558_vm0, %v14913_v61  ;;  %v14920_v40 = vld [vmem:[#allocation68_spill] sm:$0xff] }
 0x2e2   : > { %10889 = vmatprep.subr.bf16.mxu1 %v10888_v58 }
 0x2e4   : > { %10177 = vmatmul.mubr.msk.f32.gmra.mrb[6].mxu1 %vm558_vm0, %v14914_v56 }
 0x2e5   : > { %10179 = vmatprep.mubr.msk.f32.mxu1 %vm558_vm0, %v14915_v41  ;;  %v14923_v41 = vld [vmem:[#allocation71_spill] sm:$0xff] }
 0x2e8   : > { %10180 = vmatmul.mubr.msk.f32.gmra.mrb[8].mxu1 %vm558_vm0, %v14916_v51  ;;  %v14924_v51 = vld [vmem:[#allocation72_spill] sm:$0xff] }
 0x2e9   : > { %10182 = vmatprep.mubr.msk.f32.mxu1 %vm558_vm0, %v14917_v53  ;;  %v14925_v53 = vld [vmem:[#allocation73_spill] sm:$0xff] }
 0x2ec   : > { %10183 = vmatmul.mubr.msk.f32.gmra.mrb[10].mxu1 %vm558_vm0, %v14918_v52  ;;  %v14926_v52 = vld [vmem:[#allocation74_spill] sm:$0xff] }
 0x2ed   : > { %10185 = vmatprep.mubr.msk.f32.mxu1 %vm558_vm0, %v14919_v57  ;;  %v14927_v57 = vld [vmem:[#allocation75_spill] sm:$0xff] }
 0x2f0   : > { %10186 = vmatmul.mubr.msk.f32.gmra.mrb[12].mxu1 %vm558_vm0, %v14920_v40  ;;  %v14928_v40 = vld [vmem:[#allocation76_spill] sm:$0xff] }
 0x2f1   : > { %10188 = vmatprep.mubr.msk.f32.mxu1 %vm558_vm0, %v14921_v59  ;;  %v14929_v59 = vld [vmem:[#allocation77_spill] sm:$0xff] }
 0x2f4   : > { %10189 = vmatmul.mubr.msk.f32.gmra.mrb[14].mxu1 %vm558_vm0, %v14922_v55  ;;  %v14930_v55 = vld [vmem:[#allocation78_spill] sm:$0xff] }
 0x2f5   : > { %10191 = vmatprep.mubr.msk.f32.mxu1 %vm558_vm0, %v14923_v41  ;;  %v14931_v41 = vld [vmem:[#allocation79_spill] sm:$0xff] }
 0x2f8   : > { %10192 = vmatmul.mubr.msk.f32.gmra.mrb[16].mxu1 %vm558_vm0, %v14924_v51  ;;  %v14932_v51 = vld [vmem:[#allocation80_spill] sm:$0xff] }
 0x2f9   : > { %10194 = vmatprep.mubr.msk.f32.mxu1 %vm558_vm0, %v14925_v53  ;;  %v14933_v53 = vld [vmem:[#allocation81_spill] sm:$0xff] }
 0x2fc   : > { %10195 = vmatmul.mubr.msk.f32.gmra.mrb[18].mxu1 %vm558_vm0, %v14926_v52  ;;  %v14934_v52 = vld [vmem:[#allocation82_spill] sm:$0xff] }
 0x2fd   : > { %10197 = vmatprep.mubr.msk.f32.mxu1 %vm558_vm0, %v14927_v57  ;;  %v14935_v57 = vld [vmem:[#allocation83_spill] sm:$0xff] }
 0x300   : > { %10198 = vmatmul.mubr.msk.f32.gmra.mrb[20].mxu1 %vm558_vm0, %v14928_v40 }
 0x301   : > { %10200 = vmatprep.mubr.msk.f32.mxu1 %vm558_vm0, %v14929_v59  ;;  %v14936_v59 = vld [vmem:[#allocation85_spill] sm:$0xff] }
 0x304   : > { %10201 = vmatmul.mubr.msk.f32.gmra.mrb[22].mxu1 %vm558_vm0, %v14930_v55 }
 0x305   : > { %10203 = vmatprep.mubr.msk.f32.mxu1 %vm558_vm0, %v14931_v41 }
 0x308   : > { %10204 = vmatmul.mubr.msk.f32.gmra.mrb[24].mxu1 %vm558_vm0, %v14932_v51  ;;  %v13119_v51 = vld [vmem:[#allocation2 + $0x209] sm:$0xff] }
 0x309   : > { %10206 = vmatprep.mubr.msk.f32.mxu1 %vm558_vm0, %v14933_v53  ;;  %14937 = vst [vmem:[#allocation60_spill] sm:$0xff] %v13119_v51 }
 0x30c   : > { %10207 = vmatmul.mubr.msk.f32.gmra.mrb[26].mxu1 %vm558_vm0, %v14934_v52  ;;  %v3965_v52 = vld [vmem:[#allocation7 + $0x88] sm:$0xff] }
 0x30d   : > { %10209 = vmatprep.mubr.msk.f32.mxu1 %vm558_vm0, %v14935_v57  ;;  %v13125_v57 = vld [vmem:[#allocation2 + $0x211] sm:$0xff] }
 0x310   : > { %10210 = vmatmul.mubr.msk.f32.gmra.mrb[28].mxu1 %vm558_vm0, %v12894_v54  ;;  %v3964_v54 = vld [vmem:[#allocation7 + $0x80] sm:$0xff] }
 0x311   : > { %10212 = vmatprep.mubr.msk.f32.mxu1 %vm558_vm0, %v14936_v59 }
 0x314   : > { %10213 = vmatmul.mubr.msk.f32.gmra.mrb[30].mxu1 %vm558_vm0, %v12902_v4  ;;  %v10892_v4 = vpack.c.bf16 %v3965_v52, %v3964_v54 }
 0x315   : > { %10215 = vmatprep.mubr.msk.f32.mxu1 %vm558_vm0, %v12904_v6 }
 0x318   : > { %10216 = vmatmul.mubr.msk.f32.gmra.mrb[32].mxu1 %vm558_vm0, %v12910_v35 }
 0x319   : > { %10218 = vmatprep.mubr.msk.f32.mxu1 %vm558_vm0, %v13119_v51  ;;  %v14938_v51 = vld [vmem:[#allocation59_spill] sm:$0xff] }
 0x31c   : > { %10219 = vmatmul.mubr.msk.f32.gmra.mrb[34].mxu1 %vm558_vm0, %v13125_v57 }
 0x31d   : > { %10225 = vmatprep.mubr.msk.f32.mxu1 %vm558_vm0, %v12668_v37  ;;  %v14956_v37 = vld [vmem:[#allocation70_spill] sm:$0xff] }
 0x320   : > { %10226 = vmatmul.mubr.msk.f32.vlgmr.msra.gmra.mrb[4].mxu1 %vm558_vm0, %v12675_v1 }
 0x321   : > { %10891 = vmatpush3.bf16.msra.mxu1 %v10888_v58  ;;  %10228 = vmatprep.mubr.msk.f32.mxu1 %vm558_vm0, %v12677_v43 }
 0x322   : > { %10893 = vmatprep.subr.bf16.mxu1 %v10892_v4 }
 0x324   : > { %10229 = vmatmul.mubr.msk.f32.gmra.mrb[6].mxu1 %vm558_vm0, %v12683_v45 }
 0x325   : > { %10231 = vmatprep.mubr.msk.f32.mxu1 %vm558_vm0, %v12685_v47 }
 0x328   : > { %10232 = vmatmul.mubr.msk.f32.gmra.mrb[8].mxu1 %vm558_vm0, %v14938_v51 }
 0x329   : > { %10234 = vmatprep.mubr.msk.f32.mxu1 %vm558_vm0, %v12694_v39  ;;  %v14957_v39 = vld [vmem:[#allocation71_spill] sm:$0xff] }
 0x32c   : > { %10235 = vmatmul.mubr.msk.f32.gmra.mrb[10].mxu1 %vm558_vm0, %v12704_v36  ;;  %v14955_v36 = vld [vmem:[#allocation69_spill] sm:$0xff] }
 0x32d   : > { %10237 = vmatprep.mubr.msk.f32.mxu1 %vm558_vm0, %v12706_v32  ;;  %v14953_v32 = vld [vmem:[#allocation67_spill] sm:$0xff] }
 0x330   : > { %10238 = vmatmul.mubr.msk.f32.gmra.mrb[12].mxu1 %vm558_vm0, %v12712_v33  ;;  %v14954_v33 = vld [vmem:[#allocation68_spill] sm:$0xff] }
 0x331   : > { %10240 = vmatprep.mubr.msk.f32.mxu1 %vm558_vm0, %v12714_v29  ;;  %v14951_v29 = vld [vmem:[#allocation65_spill] sm:$0xff] }
 0x334   : > { %10241 = vmatmul.mubr.msk.f32.gmra.mrb[14].mxu1 %vm558_vm0, %v12720_v31  ;;  %v14952_v31 = vld [vmem:[#allocation66_spill] sm:$0xff] }
 0x335   : > { %10243 = vmatprep.mubr.msk.f32.mxu1 %vm558_vm0, %v12722_v27  ;;  %v14949_v27 = vld [vmem:[#allocation63_spill] sm:$0xff] }
 0x338   : > { %10244 = vmatmul.mubr.msk.f32.gmra.mrb[16].mxu1 %vm558_vm0, %v12728_v28  ;;  %v14950_v28 = vld [vmem:[#allocation64_spill] sm:$0xff] }
 0x339   : > { %10246 = vmatprep.mubr.msk.f32.mxu1 %vm558_vm0, %v12730_v24  ;;  %v14948_v24 = vld [vmem:[#allocation89_spill] sm:$0xff] }
 0x33c   : > { %10247 = vmatmul.mubr.msk.f32.gmra.mrb[18].mxu1 %vm558_vm0, %v12736_v25  ;;  %v3574_v25 = vld [vmem:[#allocation2 + $0x230] sm:$0xff] }
 0x33d   : > { %10249 = vmatprep.mubr.msk.f32.mxu1 %vm558_vm0, %v12738_v21  ;;  %v14947_v21 = vld [vmem:[#allocation88_spill] sm:$0xff] }
 0x340   : > { %10250 = vmatmul.mubr.msk.f32.gmra.mrb[20].mxu1 %vm558_vm0, %v12744_v23  ;;  %v3573_v23 = vld [vmem:[#allocation2 + $0x228] sm:$0xff] }
 0x341   : > { %10252 = vmatprep.mubr.msk.f32.mxu1 %vm558_vm0, %v12746_v19  ;;  %v14945_v19 = vld [vmem:[#allocation57_spill] sm:$0xff] }
 0x344   : > { %10253 = vmatmul.mubr.msk.f32.gmra.mrb[22].mxu1 %vm558_vm0, %v12752_v20  ;;  %v14946_v20 = vld [vmem:[#allocation58_spill] sm:$0xff] }
 0x345   : > { %10255 = vmatprep.mubr.msk.f32.mxu1 %vm558_vm0, %v12754_v16  ;;  %v3185_v16 = vld [vmem:[#allocation2 + $0x227] sm:$0xff] }
 0x348   : > { %10256 = vmatmul.mubr.msk.f32.gmra.mrb[24].mxu1 %vm558_vm0, %v12760_v17  ;;  %v14944_v17 = vld [vmem:[#allocation56_spill] sm:$0xff] }
 0x349   : > { %10258 = vmatprep.mubr.msk.f32.mxu1 %vm558_vm0, %v12762_v12  ;;  %v3186_v12 = vld [vmem:[#allocation2 + $0x22f] sm:$0xff] }
 0x34c   : > { %10259 = vmatmul.mubr.msk.f32.gmra.mrb[26].mxu1 %vm558_vm0, %v12768_v15  ;;  %v14943_v15 = vld [vmem:[#allocation55_spill] sm:$0xff] }
 0x34d   : > { %10261 = vmatprep.mubr.msk.f32.mxu1 %vm558_vm0, %v12770_v10  ;;  %v14941_v10 = vld [vmem:[#allocation53_spill] sm:$0xff] }
 0x350   : > { %10262 = vmatmul.mubr.msk.f32.gmra.mrb[28].mxu1 %vm558_vm0, %v12776_v11  ;;  %v14942_v11 = vld [vmem:[#allocation54_spill] sm:$0xff] }
 0x351   : > { %10264 = vmatprep.mubr.msk.f32.mxu1 %vm558_vm0, %v12778_v7  ;;  %v14939_v7 = vld [vmem:[#allocation51_spill] sm:$0xff] }
 0x354   : > { %10265 = vmatmul.mubr.msk.f32.gmra.mrb[30].mxu1 %vm558_vm0, %v12784_v8  ;;  %v14940_v8 = vld [vmem:[#allocation52_spill] sm:$0xff] }
 0x355   : > { %10267 = vmatprep.mubr.msk.f32.mxu1 %vm558_vm0, %v12983_v60 }
 0x358   : > { %10268 = vmatmul.mubr.msk.f32.gmra.mrb[32].mxu1 %vm558_vm0, %v12989_v44 }
 0x359   : > { %10270 = vmatprep.mubr.msk.f32.mxu1 %vm558_vm0, %v3185_v16 }
 0x35c   : > { %10271 = vmatmul.mubr.msk.f32.gmra.mrb[34].mxu1 %vm558_vm0, %v3186_v12 }
 0x35d   : > { %10277 = vmatprep.mubr.msk.f32.mxu1 %vm558_vm0, %v12542_v62  ;;  %v14958_v62 = vld [vmem:[#allocation72_spill] sm:$0xff] }
 0x360   : > { %10278 = vmatmul.mubr.msk.f32.vlgmr.msra.gmra.mrb[4].mxu1 %vm558_vm0, %v12549_v63  ;;  %v14959_v63 = vld [vmem:[#allocation73_spill] sm:$0xff] }
 0x361   : > { %10895 = vmatpush3.bf16.msra.mxu1 %v10892_v4  ;;  %10280 = vmatprep.mubr.msk.f32.mxu1 %vm558_vm0, %v12551_v0  ;;  %v14960_v0 = vld [vmem:[#allocation74_spill] sm:$0xff] }
 0x364   : > { %10281 = vmatmul.mubr.msk.f32.gmra.mrb[6].mxu1 %vm558_vm0, %v12557_v2  ;;  %v14961_v2 = vld [vmem:[#allocation75_spill] sm:$0xff] }
 0x365   : > { %10283 = vmatprep.mubr.msk.f32.mxu1 %vm558_vm0, %v12559_v3  ;;  %v14962_v3 = vld [vmem:[#allocation77_spill] sm:$0xff] }
 0x368   : > { %10284 = vmatmul.mubr.msk.f32.gmra.mrb[8].mxu1 %vm558_vm0, %v12565_v5  ;;  %v14963_v5 = vld [vmem:[#allocation80_spill] sm:$0xff] }
 0x369   : > { %10286 = vmatprep.mubr.msk.f32.mxu1 %vm558_vm0, %v12567_v9  ;;  %v14964_v9 = vld [vmem:[#allocation82_spill] sm:$0xff] }
 0x36c   : > { %10287 = vmatmul.mubr.msk.f32.gmra.mrb[10].mxu1 %vm558_vm0, %v12573_v13  ;;  %v14965_v13 = vld [vmem:[#allocation83_spill] sm:$0xff] }
 0x36d   : > { %10289 = vmatprep.mubr.msk.f32.mxu1 %vm558_vm0, %v12575_v14  ;;  %v14966_v14 = vld [vmem:[#allocation84_spill] sm:$0xff] }
 0x370   : > { %10290 = vmatmul.mubr.msk.f32.gmra.mrb[12].mxu1 %vm558_vm0, %v12581_v18  ;;  %v14967_v18 = vld [vmem:[#allocation86_spill] sm:$0xff] }
 0x371   : > { %10292 = vmatprep.mubr.msk.f32.mxu1 %vm558_vm0, %v12583_v22  ;;  %v14968_v22 = vld [vmem:[#allocation60_spill] sm:$0xff] }
 0x374   : > { %10293 = vmatmul.mubr.msk.f32.gmra.mrb[14].mxu1 %vm558_vm0, %v12589_v26  ;;  %v3961_v26 = vld [vmem:[#allocation2 + $0x229] sm:$0xff] }
 0x375   : > { %10295 = vmatprep.mubr.msk.f32.mxu1 %vm558_vm0, %v12591_v30  ;;  %v3962_v30 = vld [vmem:[#allocation2 + $0x231] sm:$0xff] }
 0x378   : > { %10296 = vmatmul.mubr.msk.f32.gmra.mrb[16].mxu1 %vm558_vm0, %v12597_v34  ;;  %v4536_v34 = vld [vmem:[%s14625_s10] sm:$0xff] }
 0x379   : > { %10298 = vmatprep.mubr.msk.f32.mxu1 %vm558_vm0, %v12599_v38  ;;  %v4537_v38 = vld [vmem:[%s14625_s10 + $0x8] sm:$0xff] }
 0x37c   : > { %10299 = vmatmul.mubr.msk.f32.gmra.mrb[18].mxu1 %vm558_vm0, %v12605_v42  ;;  %v10897_v42 = vpack.c.bf16 %v4537_v38, %v4536_v34 }
 0x37d   : > { %10301 = vmatprep.mubr.msk.f32.mxu1 %vm558_vm0, %v12607_v46  ;;  %v14969_v46 = vmov 0.0  }
 0x37e   : > { %10898 = vmatpush3.bf16.msra.mxu0 %v10897_v42 }
 0x37f   : > { %10384 = vmatprep.subr.mxu0 %v14969_v46 }
 0x380   : > { %10302 = vmatmul.mubr.msk.f32.gmra.mrb[20].mxu1 %vm558_vm0, %v12613_v48  ;;  %v4499_v48 = vlaneseq }
 0x381   : > { %10304 = vmatprep.mubr.msk.f32.mxu1 %vm558_vm0, %v12615_v49 }
 0x382   : > { %v13322_v49 = vshrl.u32 %v4499_v48, 7 }
 0x384   : > { %10305 = vmatmul.mubr.msk.f32.gmra.mrb[22].mxu1 %vm558_vm0, %v12621_v50  ;;  %14970 = vst [vmem:[#allocation61_spill] sm:$0xff] %v13322_v49  ;;  %v13327_v50 = vld [vmem:[%s14617_s2] ss:$0 sm:$0xff]  ;;  %v14743_v54 = vsub.s32 0, %v13322_v49  ;;  %v6317_v49 = vld [vmem:[#allocation9 + $0x48] sm:$0xff] }
 0x385   : > { %10307 = vmatprep.mubr.msk.f32.mxu1 %vm558_vm0, %v14939_v7 }
 0x388   : > { %10308 = vmatmul.mubr.msk.f32.gmra.mrb[24].mxu1 %vm558_vm0, %v14940_v8 }
 0x389   : > { %10310 = vmatprep.mubr.msk.f32.mxu1 %vm558_vm0, %v14941_v10 }
 0x38c   : > { %10311 = vmatmul.mubr.msk.f32.gmra.mrb[26].mxu1 %vm558_vm0, %v14942_v11 }
 0x38d   : > { %10313 = vmatprep.mubr.msk.f32.mxu1 %vm558_vm0, %v14943_v15 }
 0x390   : > { %10314 = vmatmul.mubr.msk.f32.gmra.mrb[28].mxu1 %vm558_vm0, %v14944_v17 }
 0x391   : > { %10316 = vmatprep.mubr.msk.f32.mxu1 %vm558_vm0, %v14945_v19 }
 0x394   : > { %10317 = vmatmul.mubr.msk.f32.gmra.mrb[30].mxu1 %vm558_vm0, %v14946_v20 }
 0x395   : > { %10319 = vmatprep.mubr.msk.f32.mxu1 %vm558_vm0, %v14947_v21 }
 0x398   : > { %10320 = vmatmul.mubr.msk.f32.gmra.mrb[32].mxu1 %vm558_vm0, %v14948_v24 }
 0x399   : > { %10322 = vmatprep.mubr.msk.f32.mxu1 %vm558_vm0, %v3573_v23 }
 0x39c   : > { %10323 = vmatmul.mubr.msk.f32.gmra.mrb[34].mxu1 %vm558_vm0, %v3574_v25 }
 0x39d   : > { %10329 = vmatprep.mubr.msk.f32.mxu1 %vm558_vm0, %v14913_v61 }
 0x3a0   : > { %10330 = vmatmul.mubr.msk.f32.vlgmr.msra.gmra.mrb[4].mxu1 %vm558_vm0, %v14914_v56 }
 0x3a1   : > { %10332 = vmatprep.mubr.msk.f32.mxu1 %vm558_vm0, %v14949_v27 }
 0x3a4   : > { %10333 = vmatmul.mubr.msk.f32.gmra.mrb[6].mxu1 %vm558_vm0, %v14950_v28 }
 0x3a5   : > { %10335 = vmatprep.mubr.msk.f32.mxu1 %vm558_vm0, %v14951_v29 }
 0x3a8   : > { %10336 = vmatmul.mubr.msk.f32.gmra.mrb[8].mxu1 %vm558_vm0, %v14952_v31 }
 0x3a9   : > { %10338 = vmatprep.mubr.msk.f32.mxu1 %vm558_vm0, %v14953_v32 }
 0x3ac   : > { %10339 = vmatmul.mubr.msk.f32.gmra.mrb[10].mxu1 %vm558_vm0, %v14954_v33 }
 0x3ad   : > { %10341 = vmatprep.mubr.msk.f32.mxu1 %vm558_vm0, %v14955_v36 }
 0x3b0   : > { %10342 = vmatmul.mubr.msk.f32.gmra.mrb[12].mxu1 %vm558_vm0, %v14956_v37 }
 0x3b1   : > { %10344 = vmatprep.mubr.msk.f32.mxu1 %vm558_vm0, %v14957_v39 }
 0x3b4   : > { %10345 = vmatmul.mubr.msk.f32.gmra.mrb[14].mxu1 %vm558_vm0, %v14958_v62 }
 0x3b5   : > { %10347 = vmatprep.mubr.msk.f32.mxu1 %vm558_vm0, %v14959_v63 }
 0x3b8   : > { %10348 = vmatmul.mubr.msk.f32.gmra.mrb[16].mxu1 %vm558_vm0, %v14960_v0 }
 0x3b9   : > { %10350 = vmatprep.mubr.msk.f32.mxu1 %vm558_vm0, %v14961_v2 }
 0x3bc   : > { %10351 = vmatmul.mubr.msk.f32.gmra.mrb[18].mxu1 %vm558_vm0, %v14928_v40 }
 0x3bd   : > { %10353 = vmatprep.mubr.msk.f32.mxu1 %vm558_vm0, %v14962_v3 }
 0x3c0   : > { %10354 = vmatmul.mubr.msk.f32.gmra.mrb[20].mxu1 %vm558_vm0, %v14930_v55 }
 0x3c1   : > { %10356 = vmatprep.mubr.msk.f32.mxu1 %vm558_vm0, %v14931_v41 }
 0x3c4   : > { %10357 = vmatmul.mubr.msk.f32.gmra.mrb[22].mxu1 %vm558_vm0, %v14963_v5 }
 0x3c5   : > { %10359 = vmatprep.mubr.msk.f32.mxu1 %vm558_vm0, %v14933_v53  ;;  %v13332_v53 = vld [vmem:[%s14618_s3] ss:$0 sm:$0xff] }
 0x3c8   : > { %10360 = vmatmul.mubr.msk.f32.gmra.mrb[24].mxu1 %vm558_vm0, %v14964_v9 }
 0x3c9   : > { %10362 = vmatprep.mubr.msk.f32.mxu1 %vm558_vm0, %v14965_v13 }
 0x3cc   : > { %10363 = vmatmul.mubr.msk.f32.gmra.mrb[26].mxu1 %vm558_vm0, %v14966_v14 }
 0x3cd   : > { %10365 = vmatprep.mubr.msk.f32.mxu1 %vm558_vm0, %v14936_v59 }
 0x3d0   : > { %10366 = vmatmul.mubr.msk.f32.gmra.mrb[28].mxu1 %vm558_vm0, %v14967_v18 }
 0x3d1   : > { %10368 = vmatprep.mubr.msk.f32.mxu1 %vm558_vm0, %v12904_v6 }
 0x3d4   : > { %10369 = vmatmul.mubr.msk.f32.gmra.mrb[30].mxu1 %vm558_vm0, %v12910_v35  ;;  %v14971_v35 = vld [vmem:[#allocation87_spill] sm:$0xff] }
 0x3d5   : > { %10371 = vmatprep.mubr.msk.f32.mxu1 %vm558_vm0, %v14968_v22  ;;  %v13342_v41 = vrot.slane %v14971_v35, %v14743_v54  ;;  %v6316_v54 = vld [vmem:[#allocation9 + $0x40] sm:$0xff] }
 0x3d8   : > { %10372 = vmatmul.mubr.msk.f32.gmra.mrb[32].mxu1 %vm558_vm0, %v13125_v57 }
 0x3d9   : > { %10374 = vmatprep.mubr.msk.f32.mxu1 %vm558_vm0, %v3961_v26 }
 0x3dc   : > { %10375 = vmatmul.mubr.msk.f32.gmra.mrb[34].mxu1 %vm558_vm0, %v3962_v30 }
 0x473   : > { %v10331_v51 = vpop.f32.mrb[4].mxu1 }
 0x474   : > { %v4327_v1 = vmul.f32 %v10331_v51, %v13327_v50  ;;  %v4128_v43 = vpop.f32.mrb[5].mxu1 }
 0x475   : > { %v4326_v45 = vmul.f32 %v13327_v50, %v4128_v43 }
 0x476   : > { %v4366_v47 = vadd.f32 %v13332_v53, %v4327_v1 }
 0x477   : > { %v4365_v4 = vadd.f32 %v13332_v53, %v4326_v45  ;;  %v10334_v6 = vpop.f32.mrb[6].mxu1 }
 0x478   : > { %v4398_v60 = vmax.f32 %v4366_v47, 0.0  ;;  %v4329_v44 = vmul.f32 %v10334_v6, %v13327_v50  ;;  %v4138_v61 = vpop.f32.mrb[7].mxu1 }
 0x479   : > { %v4397_v58 = vmax.f32 %v4365_v4, 0.0  ;;  %v4328_v56 = vmul.f32 %v13327_v50, %v4138_v61 }
 0x47a   : > { %v4430_v52 = vsel %vm558_vm0, %v4398_v60, 0.0  ;;  %v4504_v57 = vmul.f32 %v13342_v41, %v4398_v60  ;;  %v4368_v40 = vadd.f32 %v13332_v53, %v4329_v44 }
 0x47b   : > { %v4429_v59 = vsel %vm558_vm0, %v4397_v58, 0.0  ;;  %v4503_v55 = vmul.f32 %v13342_v41, %v4397_v58  ;;  %v4367_v16 = vadd.f32 %v13332_v53, %v4328_v56  ;;  %v10337_v12 = vpop.f32.mrb[8].mxu1 }
 0x47c   : > { %4765 = vst.msk [vmem:[#allocation3 + $0x30] sm:$0xff] %vm558_vm0, %v4504_v57  ;;  %v4431_v7 = vadd.f32 %v4430_v52, %v4429_v59  ;;  %v4400_v8 = vmax.f32 %v4368_v40, 0.0  ;;  %v4331_v10 = vmul.f32 %v10337_v12, %v13327_v50  ;;  %v4148_v11 = vpop.f32.mrb[9].mxu1 }
 0x47d   : > { %4764 = vst.msk [vmem:[#allocation3 + $0x28] sm:$0xff] %vm558_vm0, %v4503_v55  ;;  %v4399_v15 = vmax.f32 %v4367_v16, 0.0  ;;  %v4330_v17 = vmul.f32 %v13327_v50, %v4148_v11 }
 0x47e   : > { %v4506_v19 = vmul.f32 %v13342_v41, %v4400_v8  ;;  %v4370_v20 = vadd.f32 %v13332_v53, %v4331_v10  ;;  %v4434_v32 = vsel %vm558_vm0, %v4400_v8, 0.0 }
 0x47f   : > { %v4432_v21 = vsel %vm558_vm0, %v4399_v15, 0.0  ;;  %v4505_v23 = vmul.f32 %v13342_v41, %v4399_v15  ;;  %v4369_v24 = vadd.f32 %v13332_v53, %v4330_v17  ;;  %v10340_v25 = vpop.f32.mrb[10].mxu1 }
 0x480   : > { %4767 = vst.msk [vmem:[#allocation3 + $0x50] sm:$0xff] %vm558_vm0, %v4506_v19  ;;  %v4433_v27 = vadd.f32 %v4432_v21, %v4431_v7  ;;  %v4402_v28 = vmax.f32 %v4370_v20, 0.0  ;;  %v4333_v29 = vmul.f32 %v10340_v25, %v13327_v50  ;;  %v4158_v31 = vpop.f32.mrb[11].mxu1 }
 0x481   : > { %4766 = vst.msk [vmem:[#allocation3 + $0x48] sm:$0xff] %vm558_vm0, %v4505_v23  ;;  %v4401_v33 = vmax.f32 %v4369_v24, 0.0  ;;  %v4332_v36 = vmul.f32 %v13327_v50, %v4158_v31 }
 0x482   : > { %v4508_v37 = vmul.f32 %v13342_v41, %v4402_v28  ;;  %v4435_v39 = vadd.f32 %v4434_v32, %v4433_v27  ;;  %v4372_v62 = vadd.f32 %v13332_v53, %v4333_v29  ;;  %v4438_v18 = vsel %vm558_vm0, %v4402_v28, 0.0 }
 0x483   : > { %v4436_v63 = vsel %vm558_vm0, %v4401_v33, 0.0  ;;  %v4507_v0 = vmul.f32 %v13342_v41, %v4401_v33  ;;  %v4371_v2 = vadd.f32 %v13332_v53, %v4332_v36  ;;  %v10343_v3 = vpop.f32.mrb[12].mxu1 }
 0x484   : > { %4769 = vst.msk [vmem:[#allocation3 + $0x70] sm:$0xff] %vm558_vm0, %v4508_v37  ;;  %v4437_v5 = vadd.f32 %v4436_v63, %v4435_v39  ;;  %v4404_v9 = vmax.f32 %v4372_v62, 0.0  ;;  %v4335_v13 = vmul.f32 %v10343_v3, %v13327_v50  ;;  %v4168_v14 = vpop.f32.mrb[13].mxu1 }
 0x485   : > { %4768 = vst.msk [vmem:[#allocation3 + $0x68] sm:$0xff] %vm558_vm0, %v4507_v0  ;;  %v4403_v22 = vmax.f32 %v4371_v2, 0.0  ;;  %v4334_v26 = vmul.f32 %v13327_v50, %v4168_v14 }
 0x486   : > { %v4510_v30 = vmul.f32 %v13342_v41, %v4404_v9  ;;  %v4439_v34 = vadd.f32 %v4438_v18, %v4437_v5  ;;  %v4374_v38 = vadd.f32 %v13332_v53, %v4335_v13  ;;  %v4442_v6 = vsel %vm558_vm0, %v4404_v9, 0.0 }
 0x487   : > { %v4440_v42 = vsel %vm558_vm0, %v4403_v22, 0.0  ;;  %v4509_v48 = vmul.f32 %v13342_v41, %v4403_v22  ;;  %v4373_v51 = vadd.f32 %v13332_v53, %v4334_v26  ;;  %v10346_v1 = vpop.f32.mrb[14].mxu1 }
 0x488   : > { %4771 = vst.msk [vmem:[#allocation3 + $0x90] sm:$0xff] %vm558_vm0, %v4510_v30  ;;  %v4441_v43 = vadd.f32 %v4440_v42, %v4439_v34  ;;  %v4406_v45 = vmax.f32 %v4374_v38, 0.0  ;;  %v4337_v47 = vmul.f32 %v10346_v1, %v13327_v50  ;;  %v4178_v4 = vpop.f32.mrb[15].mxu1 }
 0x489   : > { %4770 = vst.msk [vmem:[#allocation3 + $0x88] sm:$0xff] %vm558_vm0, %v4509_v48  ;;  %v4405_v60 = vmax.f32 %v4373_v51, 0.0  ;;  %v4336_v44 = vmul.f32 %v13327_v50, %v4178_v4 }
 0x48a   : > { %v4512_v61 = vmul.f32 %v13342_v41, %v4406_v45  ;;  %v4443_v58 = vadd.f32 %v4442_v6, %v4441_v43  ;;  %v4376_v56 = vadd.f32 %v13332_v53, %v4337_v47  ;;  %v4446_v8 = vsel %vm558_vm0, %v4406_v45, 0.0 }
 0x48b   : > { %v4444_v52 = vsel %vm558_vm0, %v4405_v60, 0.0  ;;  %v4511_v57 = vmul.f32 %v13342_v41, %v4405_v60  ;;  %v4375_v40 = vadd.f32 %v13332_v53, %v4336_v44  ;;  %v10349_v59 = vpop.f32.mrb[16].mxu1 }
 0x48c   : > { %4773 = vst.msk [vmem:[#allocation3 + $0xb0] sm:$0xff] %vm558_vm0, %v4512_v61  ;;  %v4445_v55 = vadd.f32 %v4444_v52, %v4443_v58  ;;  %v4408_v16 = vmax.f32 %v4376_v56, 0.0  ;;  %v4339_v12 = vmul.f32 %v10349_v59, %v13327_v50  ;;  %v4188_v7 = vpop.f32.mrb[17].mxu1 }
 0x48d   : > { %4772 = vst.msk [vmem:[#allocation3 + $0xa8] sm:$0xff] %vm558_vm0, %v4511_v57  ;;  %v4407_v10 = vmax.f32 %v4375_v40, 0.0  ;;  %v4338_v11 = vmul.f32 %v13327_v50, %v4188_v7 }
 0x48e   : > { %v4514_v15 = vmul.f32 %v13342_v41, %v4408_v16  ;;  %v4447_v17 = vadd.f32 %v4446_v8, %v4445_v55  ;;  %v4378_v19 = vadd.f32 %v13332_v53, %v4339_v12  ;;  %v4450_v31 = vsel %vm558_vm0, %v4408_v16, 0.0 }
 0x48f   : > { %v4448_v20 = vsel %vm558_vm0, %v4407_v10, 0.0  ;;  %v4513_v21 = vmul.f32 %v13342_v41, %v4407_v10  ;;  %v4377_v23 = vadd.f32 %v13332_v53, %v4338_v11  ;;  %v10352_v24 = vpop.f32.mrb[18].mxu1 }
 0x490   : > { %4775 = vst.msk [vmem:[#allocation3 + $0xd0] sm:$0xff] %vm558_vm0, %v4514_v15  ;;  %v4449_v25 = vadd.f32 %v4448_v20, %v4447_v17  ;;  %v4410_v27 = vmax.f32 %v4378_v19, 0.0  ;;  %v4341_v28 = vmul.f32 %v10352_v24, %v13327_v50  ;;  %v4198_v29 = vpop.f32.mrb[19].mxu1 }
 0x491   : > { %4774 = vst.msk [vmem:[#allocation3 + $0xc8] sm:$0xff] %vm558_vm0, %v4513_v21  ;;  %v4409_v32 = vmax.f32 %v4377_v23, 0.0  ;;  %v4340_v33 = vmul.f32 %v13327_v50, %v4198_v29 }
 0x492   : > { %v4516_v36 = vmul.f32 %v13342_v41, %v4410_v27  ;;  %v4451_v37 = vadd.f32 %v4450_v31, %v4449_v25  ;;  %v4380_v39 = vadd.f32 %v13332_v53, %v4341_v28  ;;  %v4454_v14 = vsel %vm558_vm0, %v4410_v27, 0.0 }
 0x493   : > { %v4452_v62 = vsel %vm558_vm0, %v4409_v32, 0.0  ;;  %v4515_v63 = vmul.f32 %v13342_v41, %v4409_v32  ;;  %v4379_v0 = vadd.f32 %v13332_v53, %v4340_v33  ;;  %v10355_v2 = vpop.f32.mrb[20].mxu1 }
 0x494   : > { %4777 = vst.msk [vmem:[#allocation3 + $0xf0] sm:$0xff] %vm558_vm0, %v4516_v36  ;;  %v4453_v3 = vadd.f32 %v4452_v62, %v4451_v37  ;;  %v4412_v5 = vmax.f32 %v4380_v39, 0.0  ;;  %v4343_v9 = vmul.f32 %v10355_v2, %v13327_v50  ;;  %v4208_v13 = vpop.f32.mrb[21].mxu1 }
 0x495   : > { %4776 = vst.msk [vmem:[#allocation3 + $0xe8] sm:$0xff] %vm558_vm0, %v4515_v63  ;;  %v4411_v18 = vmax.f32 %v4379_v0, 0.0  ;;  %v4342_v22 = vmul.f32 %v13327_v50, %v4208_v13 }
 0x496   : > { %v4518_v26 = vmul.f32 %v13342_v41, %v4412_v5  ;;  %v4455_v30 = vadd.f32 %v4454_v14, %v4453_v3  ;;  %v4382_v34 = vadd.f32 %v13332_v53, %v4343_v9  ;;  %v4458_v4 = vsel %vm558_vm0, %v4412_v5, 0.0 }
 0x497   : > { %v4456_v38 = vsel %vm558_vm0, %v4411_v18, 0.0  ;;  %v4517_v42 = vmul.f32 %v13342_v41, %v4411_v18  ;;  %v4381_v48 = vadd.f32 %v13332_v53, %v4342_v22  ;;  %v10358_v51 = vpop.f32.mrb[22].mxu1 }
 0x498   : > { %4779 = vst.msk [vmem:[#allocation3 + $0x110] sm:$0xff] %vm558_vm0, %v4518_v26  ;;  %v4457_v1 = vadd.f32 %v4456_v38, %v4455_v30  ;;  %v4414_v43 = vmax.f32 %v4382_v34, 0.0  ;;  %v4345_v45 = vmul.f32 %v10358_v51, %v13327_v50  ;;  %v4218_v47 = vpop.f32.mrb[23].mxu1 }
 0x499   : > { %4778 = vst.msk [vmem:[#allocation3 + $0x108] sm:$0xff] %vm558_vm0, %v4517_v42  ;;  %v4413_v6 = vmax.f32 %v4381_v48, 0.0  ;;  %v4344_v60 = vmul.f32 %v13327_v50, %v4218_v47 }
 0x49a   : > { %v4520_v44 = vmul.f32 %v13342_v41, %v4414_v43  ;;  %v4459_v61 = vadd.f32 %v4458_v4, %v4457_v1  ;;  %v4384_v58 = vadd.f32 %v13332_v53, %v4345_v45  ;;  %v4462_v7 = vsel %vm558_vm0, %v4414_v43, 0.0 }
 0x49b   : > { %v4460_v56 = vsel %vm558_vm0, %v4413_v6, 0.0  ;;  %v4519_v52 = vmul.f32 %v13342_v41, %v4413_v6  ;;  %v4383_v57 = vadd.f32 %v13332_v53, %v4344_v60  ;;  %v10361_v40 = vpop.f32.mrb[24].mxu1 }
 0x49c   : > { %4781 = vst.msk [vmem:[#allocation3 + $0x130] sm:$0xff] %vm558_vm0, %v4520_v44  ;;  %v4461_v59 = vadd.f32 %v4460_v56, %v4459_v61  ;;  %v4416_v55 = vmax.f32 %v4384_v58, 0.0  ;;  %v4347_v16 = vmul.f32 %v10361_v40, %v13327_v50  ;;  %v4228_v12 = vpop.f32.mrb[25].mxu1 }
 0x49d   : > { %4780 = vst.msk [vmem:[#allocation3 + $0x128] sm:$0xff] %vm558_vm0, %v4519_v52  ;;  %v4415_v8 = vmax.f32 %v4383_v57, 0.0  ;;  %v4346_v10 = vmul.f32 %v13327_v50, %v4228_v12 }
 0x49e   : > { %v4522_v11 = vmul.f32 %v13342_v41, %v4416_v55  ;;  %v4463_v15 = vadd.f32 %v4462_v7, %v4461_v59  ;;  %v4386_v17 = vadd.f32 %v13332_v53, %v4347_v16  ;;  %v4466_v29 = vsel %vm558_vm0, %v4416_v55, 0.0 }
 0x49f   : > { %v4464_v19 = vsel %vm558_vm0, %v4415_v8, 0.0  ;;  %v4521_v20 = vmul.f32 %v13342_v41, %v4415_v8  ;;  %v4385_v21 = vadd.f32 %v13332_v53, %v4346_v10  ;;  %v10364_v23 = vpop.f32.mrb[26].mxu1 }
 0x4a0   : > { %4783 = vst.msk [vmem:[#allocation3 + $0x150] sm:$0xff] %vm558_vm0, %v4522_v11  ;;  %v4465_v24 = vadd.f32 %v4464_v19, %v4463_v15  ;;  %v4418_v25 = vmax.f32 %v4386_v17, 0.0  ;;  %v4349_v27 = vmul.f32 %v10364_v23, %v13327_v50  ;;  %v4238_v28 = vpop.f32.mrb[27].mxu1 }
 0x4a1   : > { %4782 = vst.msk [vmem:[#allocation3 + $0x148] sm:$0xff] %vm558_vm0, %v4521_v20  ;;  %v4417_v31 = vmax.f32 %v4385_v21, 0.0  ;;  %v4348_v32 = vmul.f32 %v13327_v50, %v4238_v28 }
 0x4a2   : > { %v4524_v33 = vmul.f32 %v13342_v41, %v4418_v25  ;;  %v4467_v36 = vadd.f32 %v4466_v29, %v4465_v24  ;;  %v4388_v37 = vadd.f32 %v13332_v53, %v4349_v27  ;;  %v4470_v13 = vsel %vm558_vm0, %v4418_v25, 0.0 }
 0x4a3   : > { %v4468_v39 = vsel %vm558_vm0, %v4417_v31, 0.0  ;;  %v4523_v62 = vmul.f32 %v13342_v41, %v4417_v31  ;;  %v4387_v63 = vadd.f32 %v13332_v53, %v4348_v32  ;;  %v10367_v0 = vpop.f32.mrb[28].mxu1 }
 0x4a4   : > { %4785 = vst.msk [vmem:[#allocation3 + $0x170] sm:$0xff] %vm558_vm0, %v4524_v33  ;;  %v4469_v2 = vadd.f32 %v4468_v39, %v4467_v36  ;;  %v4420_v3 = vmax.f32 %v4388_v37, 0.0  ;;  %v4351_v5 = vmul.f32 %v10367_v0, %v13327_v50  ;;  %v4248_v9 = vpop.f32.mrb[29].mxu1 }
 0x4a5   : > { %4784 = vst.msk [vmem:[#allocation3 + $0x168] sm:$0xff] %vm558_vm0, %v4523_v62  ;;  %v4419_v14 = vmax.f32 %v4387_v63, 0.0  ;;  %v4350_v18 = vmul.f32 %v13327_v50, %v4248_v9 }
 0x4a6   : > { %v4526_v22 = vmul.f32 %v13342_v41, %v4420_v3  ;;  %v4471_v26 = vadd.f32 %v4470_v13, %v4469_v2  ;;  %v4390_v30 = vadd.f32 %v13332_v53, %v4351_v5  ;;  %v4474_v47 = vsel %vm558_vm0, %v4420_v3, 0.0 }
 0x4a7   : > { %v4472_v34 = vsel %vm558_vm0, %v4419_v14, 0.0  ;;  %v4525_v38 = vmul.f32 %v13342_v41, %v4419_v14  ;;  %v4389_v42 = vadd.f32 %v13332_v53, %v4350_v18  ;;  %v10370_v48 = vpop.f32.mrb[30].mxu1 }
 0x4a8   : > { %4787 = vst.msk [vmem:[#allocation3 + $0x190] sm:$0xff] %vm558_vm0, %v4526_v22  ;;  %v4473_v51 = vadd.f32 %v4472_v34, %v4471_v26  ;;  %v4422_v1 = vmax.f32 %v4390_v30, 0.0  ;;  %v4353_v43 = vmul.f32 %v10370_v48, %v13327_v50  ;;  %v4258_v45 = vpop.f32.mrb[31].mxu1 }
 0x4a9   : > { %4786 = vst.msk [vmem:[#allocation3 + $0x188] sm:$0xff] %vm558_vm0, %v4525_v38  ;;  %v4421_v4 = vmax.f32 %v4389_v42, 0.0  ;;  %v4352_v6 = vmul.f32 %v13327_v50, %v4258_v45 }
 0x4aa   : > { %v4528_v60 = vmul.f32 %v13342_v41, %v4422_v1  ;;  %v4475_v44 = vadd.f32 %v4474_v47, %v4473_v51  ;;  %v4392_v61 = vadd.f32 %v13332_v53, %v4353_v43  ;;  %v4478_v12 = vsel %vm558_vm0, %v4422_v1, 0.0  ;;  %v4863_v1 = vld [vmem:[#allocation9 + $0x10] sm:$0xff]  ;;  %v4864_v43 = vld [vmem:[#allocation9 + $0x18] sm:$0xff]  ;;  %v4828_v47 = vld [vmem:[#allocation9] sm:$0xff] }
 0x4ab   : > { %v4476_v58 = vsel %vm558_vm0, %v4421_v4, 0.0  ;;  %v4527_v56 = vmul.f32 %v13342_v41, %v4421_v4  ;;  %v4391_v52 = vadd.f32 %v13332_v53, %v4352_v6  ;;  %v10373_v57 = vpop.f32.mrb[32].mxu1  ;;  %v10899_v45 = vpack.c.bf16 %v4864_v43, %v4863_v1  ;;  %v4829_v4 = vld [vmem:[#allocation9 + $0x8] sm:$0xff]  ;;  %v13693_v1 = vld [vmem:[#allocation3 + $0xef] sm:$0xff]  ;;  %v13697_v43 = vld [vmem:[#allocation3 + $0x107] sm:$0xff] }
 0x4ac   : > { %4789 = vst.msk [vmem:[#allocation3 + $0x1b0] sm:$0xff] %vm558_vm0, %v4528_v60  ;;  %v4477_v40 = vadd.f32 %v4476_v58, %v4475_v44  ;;  %v4424_v59 = vmax.f32 %v4392_v61, 0.0  ;;  %v4355_v55 = vmul.f32 %v10373_v57, %v13327_v50  ;;  %v4268_v16 = vpop.f32.mrb[33].mxu1  ;;  %v4830_v44 = vld [vmem:[#allocation3 + $0x8] sm:$0xff]  ;;  %v10903_v61 = vpack.c.bf16 %v4829_v4, %v4828_v47  ;;  %v5540_v58 = vld [vmem:[#allocation9 + $0x20] sm:$0xff] }
 0x4ad   : > { %4788 = vst.msk [vmem:[#allocation3 + $0x1a8] sm:$0xff] %vm558_vm0, %v4527_v56  ;;  %v4423_v7 = vmax.f32 %v4391_v52, 0.0  ;;  %v4354_v8 = vmul.f32 %v13327_v50, %v4268_v16  ;;  %v5541_v56 = vld [vmem:[#allocation9 + $0x28] sm:$0xff]  ;;  %v4831_v52 = vld [vmem:[#allocation3 + $0x10] sm:$0xff]  ;;  %v13514_v57 = vld [vmem:[#allocation3 + $0x28] sm:$0xff] }
 0x4ae   : > { %v4530_v10 = vmul.f32 %v13342_v41, %v4424_v59  ;;  %v4479_v11 = vadd.f32 %v4478_v12, %v4477_v40  ;;  %v4394_v15 = vadd.f32 %v13332_v53, %v4355_v55  ;;  %v4482_v28 = vsel %vm558_vm0, %v4424_v59, 0.0  ;;  %v13519_v40 = vld [vmem:[#allocation3 + $0x30] sm:$0xff]  ;;  %v13523_v59 = vld [vmem:[#allocation3 + $0x48] sm:$0xff] }
 0x4af   : > { %v4480_v17 = vsel %vm558_vm0, %v4423_v7, 0.0  ;;  %v4529_v19 = vmul.f32 %v13342_v41, %v4423_v7  ;;  %v4393_v20 = vadd.f32 %v13332_v53, %v4354_v8  ;;  %v10376_v21 = vpop.f32.mrb[34].mxu1  ;;  %v13527_v55 = vld [vmem:[#allocation3 + $0x50] sm:$0xff]  ;;  %v13531_v16 = vld [vmem:[#allocation3 + $0x68] sm:$0xff] }
 0x4b0   : > { %4791 = vst.msk [vmem:[#allocation3 + $0x1d0] sm:$0xff] %vm558_vm0, %v4530_v10  ;;  %v4481_v23 = vadd.f32 %v4480_v17, %v4479_v11  ;;  %v4426_v24 = vmax.f32 %v4394_v15, 0.0  ;;  %v4357_v25 = vmul.f32 %v10376_v21, %v13327_v50  ;;  %v4278_v27 = vpop.f32.mrb[35].mxu1  ;;  %v13535_v12 = vld [vmem:[#allocation3 + $0x70] sm:$0xff]  ;;  %v13539_v7 = vld [vmem:[#allocation3 + $0x88] sm:$0xff] }
 0x4b1   : > { %4790 = vst.msk [vmem:[#allocation3 + $0x1c8] sm:$0xff] %vm558_vm0, %v4529_v19  ;;  %v4425_v29 = vmax.f32 %v4393_v20, 0.0  ;;  %v4356_v31 = vmul.f32 %v13327_v50, %v4278_v27  ;;  %v13543_v8 = vld [vmem:[#allocation3 + $0x90] sm:$0xff]  ;;  %v13547_v10 = vld [vmem:[#allocation3 + $0xa8] sm:$0xff] }
 0x4b2   : > { %v4532_v32 = vmul.f32 %v13342_v41, %v4426_v24  ;;  %v4483_v33 = vadd.f32 %v4482_v28, %v4481_v23  ;;  %v4396_v36 = vadd.f32 %v13332_v53, %v4357_v25  ;;  %v4486_v2 = vsel %vm558_vm0, %v4426_v24, 0.0  ;;  %v13551_v11 = vld [vmem:[#allocation3 + $0xb0] sm:$0xff]  ;;  %v13555_v15 = vld [vmem:[#allocation3 + $0xc8] sm:$0xff] }
 0x4b3   : > { %v4484_v37 = vsel %vm558_vm0, %v4425_v29, 0.0  ;;  %v4531_v39 = vmul.f32 %v13342_v41, %v4425_v29  ;;  %v4395_v62 = vadd.f32 %v13332_v53, %v4356_v31  ;;  %v13559_v17 = vld [vmem:[#allocation3 + $0xd0] sm:$0xff]  ;;  %v13563_v19 = vld [vmem:[#allocation3 + $0xe8] sm:$0xff] }
 0x4b4   : > { %4793 = vst.msk [vmem:[#allocation3 + $0x1f0] sm:$0xff] %vm558_vm0, %v4532_v32  ;;  %v4485_v63 = vadd.f32 %v4484_v37, %v4483_v33  ;;  %v4428_v0 = vmax.f32 %v4396_v36, 0.0  ;;  %v13567_v20 = vld [vmem:[#allocation3 + $0xf0] sm:$0xff]  ;;  %v13571_v21 = vld [vmem:[#allocation3 + $0x108] sm:$0xff] }
 0x4b5   : > { %4792 = vst.msk [vmem:[#allocation3 + $0x1e8] sm:$0xff] %vm558_vm0, %v4531_v39  ;;  %v4427_v50 = vmax.f32 %v4395_v62, 0.0  ;;  %v13575_v23 = vld [vmem:[#allocation3 + $0x110] sm:$0xff]  ;;  %v13579_v24 = vld [vmem:[#allocation3 + $0x128] sm:$0xff] }
 0x4b6   : > { %v4534_v3 = vmul.f32 %v13342_v41, %v4428_v0  ;;  %v4487_v5 = vadd.f32 %v4486_v2, %v4485_v63  ;;  %v4490_v14 = vsel %vm558_vm0, %v4428_v0, 0.0  ;;  %v13583_v25 = vld [vmem:[#allocation3 + $0x130] sm:$0xff]  ;;  %v13587_v27 = vld [vmem:[#allocation3 + $0x148] sm:$0xff] }
 0x4b7   : > { %v4488_v9 = vsel %vm558_vm0, %v4427_v50, 0.0  ;;  %v4533_v13 = vmul.f32 %v13342_v41, %v4427_v50  ;;  %v4538_v41 = vld [vmem:[%s14626_s11] sm:$0xff]  ;;  %v13591_v28 = vld [vmem:[#allocation3 + $0x150] sm:$0xff]  ;;  %v13595_v29 = vld [vmem:[#allocation3 + $0x168] sm:$0xff] }
 0x4b8   : > { %4795 = vst.msk [vmem:[#allocation3 + $0x210] sm:$0xff] %vm558_vm0, %v4534_v3  ;;  %v4489_v53 = vadd.f32 %v4488_v9, %v4487_v5  ;;  %v13599_v31 = vld [vmem:[#allocation3 + $0x170] sm:$0xff]  ;;  %v13603_v32 = vld [vmem:[#allocation3 + $0x188] sm:$0xff]  ;;  %v5928_v50 = vld [vmem:[#allocation9 + $0x30] sm:$0xff] }
 0x4b9   : > { %4794 = vst.msk [vmem:[#allocation3 + $0x208] sm:$0xff] %vm558_vm0, %v4533_v13  ;;  %v13607_v33 = vld [vmem:[#allocation3 + $0x190] sm:$0xff]  ;;  %v13611_v36 = vld [vmem:[#allocation3 + $0x1a8] sm:$0xff] }
 0x4ba   : > { %v4491_v18 = vadd.f32 %v4490_v14, %v4489_v53  ;;  %14972 = vst [vmem:[#allocation62_spill] sm:$0xff] %v13607_v33  ;;  %14973 = vst [vmem:[#allocation76_spill] sm:$0xff] %v13611_v36  ;;  %v13615_v37 = vld [vmem:[#allocation3 + $0x1b0] sm:$0xff]  ;;  %v13619_v39 = vld [vmem:[#allocation3 + $0x1c8] sm:$0xff] }
 0x4bb   : > { %14974 = vst [vmem:[#allocation78_spill] sm:$0xff] %v13615_v37  ;;  %14975 = vst [vmem:[#allocation79_spill] sm:$0xff] %v13619_v39  ;;  %v13623_v62 = vld [vmem:[#allocation3 + $0x1d0] sm:$0xff]  ;;  %v4796_v0 = vld [vmem:[#allocation3 + $0x7] sm:$0xff] }
 0x4bc   : > { %v4492_v22 = vrot.slane %v4491_v18, 4  ;;  %14976 = vst [vmem:[#allocation81_spill] sm:$0xff] %v13623_v62  ;;  %v13627_v63 = vld [vmem:[#allocation3 + $0x1e8] sm:$0xff]  ;;  %v13631_v2 = vld [vmem:[#allocation3 + $0x1f0] sm:$0xff] }
 0x4bd   : > { %14977 = vst [vmem:[#allocation85_spill] sm:$0xff] %v13627_v63  ;;  %14978 = vst [vmem:[#allocation59_spill] sm:$0xff] %v13631_v2  ;;  %v5929_v3 = vld [vmem:[#allocation9 + $0x38] sm:$0xff] }
 0x4be   : > { %v4493_v26 = vadd.f32 %v4492_v22, %v4491_v18  ;;  %v4797_v5 = vld [vmem:[#allocation3 + $0xf] sm:$0xff]  ;;  %v13636_v9 = vpack.c.bf16 %v5929_v3, %v5928_v50  ;;  %v13639_v13 = vld [vmem:[#allocation3 + $0x27] sm:$0xff] }
 0x4bf   : > { %v13645_v53 = vld [vmem:[#allocation3 + $0x2f] sm:$0xff]  ;;  %v13649_v14 = vld [vmem:[#allocation3 + $0x47] sm:$0xff] }
 0x4c0   : > { %v4494_v30 = vrot.slane %v4493_v26, 2  ;;  %v13653_v18 = vld [vmem:[#allocation3 + $0x4f] sm:$0xff]  ;;  %v13657_v22 = vld [vmem:[#allocation3 + $0x67] sm:$0xff] }
 0x4c1   : > { %v13705_v47 = vld [vmem:[#allocation3 + $0x127] sm:$0xff]  ;;  %v13709_v4 = vld [vmem:[#allocation3 + $0x12f] sm:$0xff] }
 0x4c2   : > { %v4495_v34 = vadd.f32 %v4494_v30, %v4493_v26  ;;  %v13661_v26 = vld [vmem:[#allocation3 + $0x6f] sm:$0xff]  ;;  %v13665_v30 = vld [vmem:[#allocation3 + $0x87] sm:$0xff] }
 0x4c3   : > { %14979 = vst [vmem:[#allocation51_spill] sm:$0xff] %v13665_v30  ;;  %v13753_v50 = vld [vmem:[#allocation3 + $0x1e7] sm:$0xff] }
 0x4c4   : > { %v4496_v38 = vrot.slane %v4495_v34, 1  ;;  %v5507_v3 = vld [vmem:[#allocation3 + $0x9] sm:$0xff] }
 0x4c6   : > { %v4497_v42 = vadd.f32 %v4496_v38, %v4495_v34  ;;  %v13669_v34 = vld [vmem:[#allocation3 + $0x8f] sm:$0xff]  ;;  %v13673_v38 = vld [vmem:[#allocation3 + $0xa7] sm:$0xff] }
 0x4c7   : > { %14980 = vst [vmem:[#allocation52_spill] sm:$0xff] %v13673_v38 }
 0x4c8   : > { %v4498_v48 = vmul.f32 0.00390625, %v4497_v42  ;;  %v13677_v42 = vld [vmem:[#allocation3 + $0xaf] sm:$0xff] }
 0x4ca   : > { %v4535_v51 = vmul.f32 %v4498_v48, %v14971_v35  ;;  %8510 = vst.msk [vmem:[%s12696_s29 + $0x4] sm:$0x1] %vm8505_vm3, %v4498_v48  ;;  %v13681_v48 = vld [vmem:[#allocation3 + $0xc7] sm:$0xff] }
 0x4cc   : > { %10382 = vmatmul.mubr.msk.f32.vlgmr.msra.gmra.mrb[0].mxu0 %vm558_vm0, %v4535_v51  ;;  %v13685_v51 = vld [vmem:[#allocation3 + $0xcf] sm:$0xff] }
 0x4cd   : > { %10385 = vmatpush3.msra.mxu0 %v4538_v41  ;;  %10386 = vmatprep.mubr.msk.f32.mxu0 %vm11722_vm1, %v14969_v46  ;;  %v13511_v46 = vpack.c.bf16 %v5541_v56, %v5540_v58  ;;  %v13689_v41 = vld [vmem:[#allocation3 + $0xe7] sm:$0xff]  ;;  %v13733_v58 = vld [vmem:[#allocation3 + $0x18f] sm:$0xff] }
 0x4ce   : > { %10900 = vmatprep.subr.bf16.mxu0 %v10899_v45  ;;  %v13737_v56 = vld [vmem:[#allocation3 + $0x1a7] sm:$0xff] }
 0x59f   : > { %v4609_v6 = vpop.f32.mrb[0].mxu0 }
 0x5a0   : > { %v4613_v35 = vmax.f32 %v4609_v6, 0.0  ;;  %v10383_v60 = vpop.f32.mrb[1].mxu0  ;;  %v13713_v6 = vld [vmem:[#allocation3 + $0x147] sm:$0xff] }
 0x5a1   : > { %v13721_v60 = vld [vmem:[#allocation3 + $0x167] sm:$0xff] }
 0x5a2   : > { %10387 = vmatmul.mubr.msk.f32.vlgmr.msra.gmra.mrb[2].mxu0 %vm813_vm2, %v4613_v35  ;;  %v13717_v35 = vld [vmem:[#allocation3 + $0x14f] sm:$0xff] }
 0x5a3   : > { %10902 = vmatpush3.bf16.msra.mxu0 %v10899_v45  ;;  %10393 = vmatprep.mubr.msk.f32.mxu0 %vm558_vm0, %v4830_v44  ;;  %v13701_v45 = vld [vmem:[#allocation3 + $0x10f] sm:$0xff] }
 0x5a4   : > { %10904 = vmatprep.subr.bf16.mxu0 %v10903_v61  ;;  %v13725_v44 = vld [vmem:[#allocation3 + $0x16f] sm:$0xff] }
 0x5a6   : > { %10394 = vmatmul.mubr.msk.f32.vlgmr.msra.gmra.mrb[4].mxu0 %vm558_vm0, %v4831_v52  ;;  %v13741_v52 = vld [vmem:[#allocation3 + $0x1af] sm:$0xff] }
 0x5a7   : > { %10906 = vmatpush3.bf16.msra.mxu0 %v10903_v61  ;;  %10396 = vmatprep.mubr.msk.f32.mxu0 %vm558_vm0, %v13514_v57  ;;  %v13729_v61 = vld [vmem:[#allocation3 + $0x187] sm:$0xff] }
 0x5a8   : > { %10908 = vmatprep.subr.bf16.mxu0 %v13511_v46 }
 0x5aa   : > { %10397 = vmatmul.mubr.msk.f32.gmra.mrb[6].mxu0 %vm558_vm0, %v13519_v40 }
 0x5ab   : > { %10399 = vmatprep.mubr.msk.f32.mxu0 %vm558_vm0, %v13523_v59 }
 0x5ae   : > { %10400 = vmatmul.mubr.msk.f32.gmra.mrb[8].mxu0 %vm558_vm0, %v13527_v55 }
 0x5af   : > { %10402 = vmatprep.mubr.msk.f32.mxu0 %vm558_vm0, %v13531_v16 }
 0x5b2   : > { %10403 = vmatmul.mubr.msk.f32.gmra.mrb[10].mxu0 %vm558_vm0, %v13535_v12 }
 0x5b3   : > { %10405 = vmatprep.mubr.msk.f32.mxu0 %vm558_vm0, %v13539_v7 }
 0x5b6   : > { %10406 = vmatmul.mubr.msk.f32.gmra.mrb[12].mxu0 %vm558_vm0, %v13543_v8 }
 0x5b7   : > { %10408 = vmatprep.mubr.msk.f32.mxu0 %vm558_vm0, %v13547_v10 }
 0x5ba   : > { %10409 = vmatmul.mubr.msk.f32.gmra.mrb[14].mxu0 %vm558_vm0, %v13551_v11 }
 0x5bb   : > { %10411 = vmatprep.mubr.msk.f32.mxu0 %vm558_vm0, %v13555_v15 }
 0x5be   : > { %10412 = vmatmul.mubr.msk.f32.gmra.mrb[16].mxu0 %vm558_vm0, %v13559_v17 }
 0x5bf   : > { %10414 = vmatprep.mubr.msk.f32.mxu0 %vm558_vm0, %v13563_v19 }
 0x5c2   : > { %10415 = vmatmul.mubr.msk.f32.gmra.mrb[18].mxu0 %vm558_vm0, %v13567_v20 }
 0x5c3   : > { %10417 = vmatprep.mubr.msk.f32.mxu0 %vm558_vm0, %v13571_v21 }
 0x5c6   : > { %10418 = vmatmul.mubr.msk.f32.gmra.mrb[20].mxu0 %vm558_vm0, %v13575_v23 }
 0x5c7   : > { %10420 = vmatprep.mubr.msk.f32.mxu0 %vm558_vm0, %v13579_v24 }
 0x5ca   : > { %10421 = vmatmul.mubr.msk.f32.gmra.mrb[22].mxu0 %vm558_vm0, %v13583_v25 }
 0x5cb   : > { %10423 = vmatprep.mubr.msk.f32.mxu0 %vm558_vm0, %v13587_v27 }
 0x5ce   : > { %10424 = vmatmul.mubr.msk.f32.gmra.mrb[24].mxu0 %vm558_vm0, %v13591_v28 }
 0x5cf   : > { %10426 = vmatprep.mubr.msk.f32.mxu0 %vm558_vm0, %v13595_v29 }
 0x5d2   : > { %10427 = vmatmul.mubr.msk.f32.gmra.mrb[26].mxu0 %vm558_vm0, %v13599_v31 }
 0x5d3   : > { %10429 = vmatprep.mubr.msk.f32.mxu0 %vm558_vm0, %v13603_v32 }
 0x5d6   : > { %10430 = vmatmul.mubr.msk.f32.gmra.mrb[28].mxu0 %vm558_vm0, %v13607_v33 }
 0x5d7   : > { %10432 = vmatprep.mubr.msk.f32.mxu0 %vm558_vm0, %v13611_v36 }
 0x5da   : > { %10433 = vmatmul.mubr.msk.f32.gmra.mrb[30].mxu0 %vm558_vm0, %v13615_v37 }
 0x5db   : > { %10435 = vmatprep.mubr.msk.f32.mxu0 %vm558_vm0, %v13619_v39  ;;  %v13771_v39 = vld [vmem:[#allocation3 + $0x31] sm:$0xff] }
 0x5dc   : > { %14982 = vst [vmem:[#allocation54_spill] sm:$0xff] %v13771_v39 }
 0x5de   : > { %10436 = vmatmul.mubr.msk.f32.gmra.mrb[32].mxu0 %vm558_vm0, %v13623_v62  ;;  %v13765_v62 = vld [vmem:[#allocation3 + $0x29] sm:$0xff] }
 0x5df   : > { %10438 = vmatprep.mubr.msk.f32.mxu0 %vm558_vm0, %v13627_v63  ;;  %v13762_v63 = vpack.c.bf16 %v6317_v49, %v6316_v54  ;;  %14981 = vst [vmem:[#allocation53_spill] sm:$0xff] %v13765_v62  ;;  %v13779_v49 = vld [vmem:[#allocation3 + $0x51] sm:$0xff]  ;;  %v13783_v54 = vld [vmem:[#allocation3 + $0x69] sm:$0xff] }
 0x5e0   : > { %14984 = vst [vmem:[#allocation56_spill] sm:$0xff] %v13779_v49  ;;  %14985 = vst [vmem:[#allocation57_spill] sm:$0xff] %v13783_v54 }
 0x5e2   : > { %10439 = vmatmul.mubr.msk.f32.gmra.mrb[34].mxu0 %vm558_vm0, %v13631_v2  ;;  %v5508_v2 = vld [vmem:[#allocation3 + $0x11] sm:$0xff] }
 0x5e3   : > { %10445 = vmatprep.mubr.msk.f32.mxu0 %vm558_vm0, %v4796_v0  ;;  %v13749_v0 = vld [vmem:[#allocation3 + $0x1cf] sm:$0xff] }
 0x5e6   : > { %10446 = vmatmul.mubr.msk.f32.vlgmr.msra.gmra.mrb[4].mxu0 %vm558_vm0, %v4797_v5  ;;  %v13757_v5 = vld [vmem:[#allocation3 + $0x1ef] sm:$0xff] }
 0x5e7   : > { %10910 = vmatpush3.bf16.msra.mxu0 %v13511_v46  ;;  %10448 = vmatprep.mubr.msk.f32.mxu0 %vm558_vm0, %v13639_v13  ;;  %v13745_v46 = vld [vmem:[#allocation3 + $0x1c7] sm:$0xff] }
 0x5e8   : > { %10912 = vmatprep.subr.bf16.mxu0 %v13636_v9 }
 0x5ea   : > { %10449 = vmatmul.mubr.msk.f32.gmra.mrb[6].mxu0 %vm558_vm0, %v13645_v53 }
 0x5eb   : > { %10451 = vmatprep.mubr.msk.f32.mxu0 %vm558_vm0, %v13649_v14 }
 0x5ee   : > { %10452 = vmatmul.mubr.msk.f32.gmra.mrb[8].mxu0 %vm558_vm0, %v13653_v18 }
 0x5ef   : > { %10454 = vmatprep.mubr.msk.f32.mxu0 %vm558_vm0, %v13657_v22 }
 0x5f2   : > { %10455 = vmatmul.mubr.msk.f32.gmra.mrb[10].mxu0 %vm558_vm0, %v13661_v26 }
 0x5f3   : > { %10457 = vmatprep.mubr.msk.f32.mxu0 %vm558_vm0, %v13665_v30 }
 0x5f6   : > { %10458 = vmatmul.mubr.msk.f32.gmra.mrb[12].mxu0 %vm558_vm0, %v13669_v34 }
 0x5f7   : > { %10460 = vmatprep.mubr.msk.f32.mxu0 %vm558_vm0, %v13673_v38 }
 0x5fa   : > { %10461 = vmatmul.mubr.msk.f32.gmra.mrb[14].mxu0 %vm558_vm0, %v13677_v42 }
 0x5fb   : > { %10463 = vmatprep.mubr.msk.f32.mxu0 %vm558_vm0, %v13681_v48 }
 0x5fe   : > { %10464 = vmatmul.mubr.msk.f32.gmra.mrb[16].mxu0 %vm558_vm0, %v13685_v51 }
 0x5ff   : > { %10466 = vmatprep.mubr.msk.f32.mxu0 %vm558_vm0, %v13689_v41 }
 0x602   : > { %10467 = vmatmul.mubr.msk.f32.gmra.mrb[18].mxu0 %vm558_vm0, %v13693_v1 }
 0x603   : > { %10469 = vmatprep.mubr.msk.f32.mxu0 %vm558_vm0, %v13697_v43 }
 0x606   : > { %10470 = vmatmul.mubr.msk.f32.gmra.mrb[20].mxu0 %vm558_vm0, %v13701_v45 }
 0x607   : > { %10472 = vmatprep.mubr.msk.f32.mxu0 %vm558_vm0, %v13705_v47 }
 0x60a   : > { %10473 = vmatmul.mubr.msk.f32.gmra.mrb[22].mxu0 %vm558_vm0, %v13709_v4 }
 0x60b   : > { %10475 = vmatprep.mubr.msk.f32.mxu0 %vm558_vm0, %v13713_v6 }
 0x60e   : > { %10476 = vmatmul.mubr.msk.f32.gmra.mrb[24].mxu0 %vm558_vm0, %v13717_v35 }
 0x60f   : > { %10478 = vmatprep.mubr.msk.f32.mxu0 %vm558_vm0, %v13721_v60 }
 0x612   : > { %10479 = vmatmul.mubr.msk.f32.gmra.mrb[26].mxu0 %vm558_vm0, %v13725_v44 }
 0x613   : > { %10481 = vmatprep.mubr.msk.f32.mxu0 %vm558_vm0, %v13729_v61 }
 0x616   : > { %10482 = vmatmul.mubr.msk.f32.gmra.mrb[28].mxu0 %vm558_vm0, %v13733_v58 }
 0x617   : > { %10484 = vmatprep.mubr.msk.f32.mxu0 %vm558_vm0, %v13737_v56 }
 0x61a   : > { %10485 = vmatmul.mubr.msk.f32.gmra.mrb[30].mxu0 %vm558_vm0, %v13741_v52 }
 0x61b   : > { %10487 = vmatprep.mubr.msk.f32.mxu0 %vm558_vm0, %v13745_v46 }
 0x61e   : > { %10488 = vmatmul.mubr.msk.f32.gmra.mrb[32].mxu0 %vm558_vm0, %v13749_v0 }
 0x61f   : > { %10490 = vmatprep.mubr.msk.f32.mxu0 %vm558_vm0, %v13753_v50 }
 0x622   : > { %10491 = vmatmul.mubr.msk.f32.gmra.mrb[34].mxu0 %vm558_vm0, %v13757_v5 }
 0x623   : > { %10497 = vmatprep.mubr.msk.f32.mxu0 %vm558_vm0, %v5507_v3  ;;  %v13775_v3 = vld [vmem:[#allocation3 + $0x49] sm:$0xff] }
 0x624   : > { %14983 = vst [vmem:[#allocation55_spill] sm:$0xff] %v13775_v3 }
 0x626   : > { %10498 = vmatmul.mubr.msk.f32.vlgmr.msra.gmra.mrb[4].mxu0 %vm558_vm0, %v5508_v2  ;;  %v13787_v2 = vld [vmem:[#allocation3 + $0x71] sm:$0xff] }
 0x627   : > { %10914 = vmatpush3.bf16.msra.mxu0 %v13636_v9  ;;  %10500 = vmatprep.mubr.msk.f32.mxu0 %vm558_vm0, %v13765_v62  ;;  %14986 = vst [vmem:[#allocation58_spill] sm:$0xff] %v13787_v2  ;;  %v13791_v9 = vld [vmem:[#allocation3 + $0x89] sm:$0xff] }
 0x628   : > { %10916 = vmatprep.subr.bf16.mxu0 %v13762_v63  ;;  %14987 = vst [vmem:[#allocation88_spill] sm:$0xff] %v13791_v9  ;;  %v6705_v62 = vld [vmem:[#allocation9 + $0x58] sm:$0xff] }
 0x62a   : > { %10501 = vmatmul.mubr.msk.f32.gmra.mrb[6].mxu0 %vm558_vm0, %v13771_v39  ;;  %v6704_v39 = vld [vmem:[#allocation9 + $0x50] sm:$0xff] }
 0x62b   : > { %10503 = vmatprep.mubr.msk.f32.mxu0 %vm558_vm0, %v13775_v3  ;;  %v13795_v3 = vld [vmem:[#allocation3 + $0x91] sm:$0xff] }
 0x62c   : > { %14988 = vst [vmem:[#allocation89_spill] sm:$0xff] %v13795_v3 }
 0x62e   : > { %10504 = vmatmul.mubr.msk.f32.gmra.mrb[8].mxu0 %vm558_vm0, %v13779_v49  ;;  %v13799_v49 = vld [vmem:[#allocation3 + $0xa9] sm:$0xff] }
 0x62f   : > { %10506 = vmatprep.mubr.msk.f32.mxu0 %vm558_vm0, %v13783_v54  ;;  %14989 = vst [vmem:[#allocation63_spill] sm:$0xff] %v13799_v49  ;;  %v13803_v54 = vld [vmem:[#allocation3 + $0xb1] sm:$0xff] }
 0x630   : > { %14990 = vst [vmem:[#allocation64_spill] sm:$0xff] %v13803_v54 }
 0x632   : > { %10507 = vmatmul.mubr.msk.f32.gmra.mrb[10].mxu0 %vm558_vm0, %v13787_v2  ;;  %v13807_v2 = vld [vmem:[#allocation3 + $0xc9] sm:$0xff] }
 0x633   : > { %10509 = vmatprep.mubr.msk.f32.mxu0 %vm558_vm0, %v13791_v9  ;;  %14991 = vst [vmem:[#allocation65_spill] sm:$0xff] %v13807_v2  ;;  %v13811_v9 = vld [vmem:[#allocation3 + $0xd1] sm:$0xff] }
 0x634   : > { %14992 = vst [vmem:[#allocation66_spill] sm:$0xff] %v13811_v9 }
 0x636   : > { %10510 = vmatmul.mubr.msk.f32.gmra.mrb[12].mxu0 %vm558_vm0, %v13795_v3  ;;  %v13815_v3 = vld [vmem:[#allocation3 + $0xe9] sm:$0xff] }
 0x637   : > { %10512 = vmatprep.mubr.msk.f32.mxu0 %vm558_vm0, %v13799_v49  ;;  %14993 = vst [vmem:[#allocation67_spill] sm:$0xff] %v13815_v3  ;;  %v13819_v49 = vld [vmem:[#allocation3 + $0xf1] sm:$0xff] }
 0x638   : > { %14994 = vst [vmem:[#allocation68_spill] sm:$0xff] %v13819_v49 }
 0x63a   : > { %10513 = vmatmul.mubr.msk.f32.gmra.mrb[14].mxu0 %vm558_vm0, %v13803_v54  ;;  %v13823_v54 = vld [vmem:[#allocation3 + $0x109] sm:$0xff] }
 0x63b   : > { %10515 = vmatprep.mubr.msk.f32.mxu0 %vm558_vm0, %v13807_v2  ;;  %14995 = vst [vmem:[#allocation69_spill] sm:$0xff] %v13823_v54  ;;  %v13827_v2 = vld [vmem:[#allocation3 + $0x111] sm:$0xff] }
 0x63c   : > { %14996 = vst [vmem:[#allocation70_spill] sm:$0xff] %v13827_v2 }
 0x63e   : > { %10516 = vmatmul.mubr.msk.f32.gmra.mrb[16].mxu0 %vm558_vm0, %v13811_v9  ;;  %v13831_v9 = vld [vmem:[#allocation3 + $0x129] sm:$0xff] }
 0x63f   : > { %10518 = vmatprep.mubr.msk.f32.mxu0 %vm558_vm0, %v13815_v3  ;;  %14997 = vst [vmem:[#allocation71_spill] sm:$0xff] %v13831_v9  ;;  %v13835_v3 = vld [vmem:[#allocation3 + $0x131] sm:$0xff] }
 0x640   : > { %14998 = vst [vmem:[#allocation72_spill] sm:$0xff] %v13835_v3 }
 0x642   : > { %10519 = vmatmul.mubr.msk.f32.gmra.mrb[18].mxu0 %vm558_vm0, %v13819_v49  ;;  %v13839_v49 = vld [vmem:[#allocation3 + $0x149] sm:$0xff] }
 0x643   : > { %10521 = vmatprep.mubr.msk.f32.mxu0 %vm558_vm0, %v13823_v54  ;;  %14999 = vst [vmem:[#allocation73_spill] sm:$0xff] %v13839_v49  ;;  %v13843_v54 = vld [vmem:[#allocation3 + $0x151] sm:$0xff] }
 0x644   : > { %15000 = vst [vmem:[#allocation74_spill] sm:$0xff] %v13843_v54 }
 0x646   : > { %10522 = vmatmul.mubr.msk.f32.gmra.mrb[20].mxu0 %vm558_vm0, %v13827_v2  ;;  %v13847_v2 = vld [vmem:[#allocation3 + $0x169] sm:$0xff] }
 0x647   : > { %10524 = vmatprep.mubr.msk.f32.mxu0 %vm558_vm0, %v13831_v9  ;;  %15001 = vst [vmem:[#allocation75_spill] sm:$0xff] %v13847_v2  ;;  %v13851_v9 = vld [vmem:[#allocation3 + $0x171] sm:$0xff] }
 0x648   : > { %15002 = vst [vmem:[#allocation77_spill] sm:$0xff] %v13851_v9 }
 0x64a   : > { %10525 = vmatmul.mubr.msk.f32.gmra.mrb[22].mxu0 %vm558_vm0, %v13835_v3  ;;  %v13855_v3 = vld [vmem:[#allocation3 + $0x189] sm:$0xff] }
 0x64b   : > { %10527 = vmatprep.mubr.msk.f32.mxu0 %vm558_vm0, %v13839_v49  ;;  %15003 = vst [vmem:[#allocation80_spill] sm:$0xff] %v13855_v3  ;;  %v13859_v49 = vld [vmem:[#allocation3 + $0x191] sm:$0xff] }
 0x64c   : > { %15004 = vst [vmem:[#allocation82_spill] sm:$0xff] %v13859_v49 }
 0x64e   : > { %10528 = vmatmul.mubr.msk.f32.gmra.mrb[24].mxu0 %vm558_vm0, %v13843_v54  ;;  %v13863_v54 = vld [vmem:[#allocation3 + $0x1a9] sm:$0xff] }
 0x64f   : > { %10530 = vmatprep.mubr.msk.f32.mxu0 %vm558_vm0, %v13847_v2  ;;  %15005 = vst [vmem:[#allocation83_spill] sm:$0xff] %v13863_v54  ;;  %v13867_v2 = vld [vmem:[#allocation3 + $0x1b1] sm:$0xff] }
 0x650   : > { %15006 = vst [vmem:[#allocation84_spill] sm:$0xff] %v13867_v2 }
 0x652   : > { %10531 = vmatmul.mubr.msk.f32.gmra.mrb[26].mxu0 %vm558_vm0, %v13851_v9  ;;  %v13871_v9 = vld [vmem:[#allocation3 + $0x1c9] sm:$0xff] }
 0x653   : > { %10533 = vmatprep.mubr.msk.f32.mxu0 %vm558_vm0, %v13855_v3  ;;  %15007 = vst [vmem:[#allocation86_spill] sm:$0xff] %v13871_v9  ;;  %v13875_v3 = vld [vmem:[#allocation3 + $0x1d1] sm:$0xff] }
 0x654   : > { %15008 = vst [vmem:[#allocation60_spill] sm:$0xff] %v13875_v3 }
 0x656   : > { %10534 = vmatmul.mubr.msk.f32.gmra.mrb[28].mxu0 %vm558_vm0, %v13859_v49  ;;  %v13879_v49 = vld [vmem:[#allocation3 + $0x1e9] sm:$0xff] }
 0x657   : > { %10536 = vmatprep.mubr.msk.f32.mxu0 %vm558_vm0, %v13863_v54  ;;  %v13883_v54 = vld [vmem:[#allocation3 + $0x1f1] sm:$0xff] }
 0x65a   : > { %10537 = vmatmul.mubr.msk.f32.gmra.mrb[30].mxu0 %vm558_vm0, %v13867_v2 }
 0x65b   : > { %10539 = vmatprep.mubr.msk.f32.mxu0 %vm558_vm0, %v13871_v9  ;;  %v10919_v9 = vpack.c.bf16 %v6705_v62, %v6704_v39  ;;  %v4539_v39 = vld [vmem:[%s14627_s12] sm:$0x1] }
 0x65e   : > { %10540 = vmatmul.mubr.msk.f32.gmra.mrb[32].mxu0 %vm558_vm0, %v13875_v3 }
 0x65f   : > { %10542 = vmatprep.mubr.msk.f32.mxu0 %vm558_vm0, %v13879_v49 }
 0x662   : > { %10543 = vmatmul.mubr.msk.f32.gmra.mrb[34].mxu0 %vm558_vm0, %v13883_v54 }
 0x663   : > { %10549 = vmatprep.mubr.msk.f32.mxu0 %vm558_vm0, %v13639_v13 }
 0x666   : > { %10550 = vmatmul.mubr.msk.f32.vlgmr.msra.gmra.mrb[4].mxu0 %vm558_vm0, %v13645_v53 }
 0x667   : > { %10918 = vmatpush3.bf16.msra.mxu0 %v13762_v63  ;;  %10552 = vmatprep.mubr.msk.f32.mxu0 %vm558_vm0, %v13649_v14 }
 0x668   : > { %10920 = vmatprep.subr.bf16.mxu0 %v10919_v9 }
 0x66a   : > { %10553 = vmatmul.mubr.msk.f32.gmra.mrb[6].mxu0 %vm558_vm0, %v13653_v18 }
 0x66b   : > { %10555 = vmatprep.mubr.msk.f32.mxu0 %vm558_vm0, %v13657_v22 }
 0x66e   : > { %10556 = vmatmul.mubr.msk.f32.gmra.mrb[8].mxu0 %vm558_vm0, %v13661_v26 }
 0x66f   : > { %10558 = vmatprep.mubr.msk.f32.mxu0 %vm558_vm0, %v13665_v30 }
 0x672   : > { %10559 = vmatmul.mubr.msk.f32.gmra.mrb[10].mxu0 %vm558_vm0, %v13669_v34 }
 0x673   : > { %10561 = vmatprep.mubr.msk.f32.mxu0 %vm558_vm0, %v13673_v38 }
 0x675   : > { %v4683_v62 = vpop.f32.mrb[2].mxu0 }
 0x676   : > { %v4684_v63 = vadd.f32 %v4683_v62, %v4539_v39  ;;  %v10388_v13 = vpop.f32.mrb[3].mxu0  ;;  %10562 = vmatmul.mubr.msk.f32.gmra.mrb[12].mxu0 %vm558_vm0, %v13677_v42  ;;  %v13962_v39 = vld [vmem:[#allocation3 + $0x20f] sm:$0xff] }
 0x677   : > { %10564 = vmatprep.mubr.msk.f32.mxu0 %vm558_vm0, %v13681_v48  ;;  %v7093_v62 = vld [vmem:[#allocation9 + $0x60] sm:$0xff] }
 0x678   : > { %v4687_v53 = vmax.f32 %v4684_v63, 0.0  ;;  %v7094_v63 = vld [vmem:[#allocation9 + $0x68] sm:$0xff] }
 0x679   : > { %v10923_v13 = vpack.c.bf16 %v7094_v63, %v7093_v62  ;;  %v14026_v62 = vld [vmem:[#allocation3 + $0x208] sm:$0xff]  ;;  %v14030_v63 = vld [vmem:[#allocation3 + $0x210] sm:$0xff] }
 0x67a   : > { %v4688_v30 = vmin.f32 %v4687_v53, 1.0  ;;  %10565 = vmatmul.mubr.msk.f32.gmra.mrb[14].mxu0 %vm558_vm0, %v13685_v51  ;;  %v15013_v53 = vld [vmem:[#allocation59_spill] sm:$0xff]  ;;  %15014 = vst [vmem:[#allocation90_spill] sm:$0xff] %v14026_v62  ;;  %15015 = vst [vmem:[#allocation91_spill] sm:$0xff] %v14030_v63 }
 0x67b   : > { %10567 = vmatprep.mubr.msk.f32.mxu0 %vm558_vm0, %v13689_v41 }
 0x67c   : > { %vm4689_vm5 = vcmp.lt.f32.partialorder %v4688_v30, 0.1  ;;  %8509 = vst.msk [vmem:[%s12696_s29 + $0x3] sm:$0x1] %vm8505_vm3, %v4688_v30 }
 0x67d   : > { %v13919_v38 = vsel %vm4689_vm5, 0.0, %v4688_v30  ;;  %v13958_v30 = vld [vmem:[#allocation3 + $0x207] sm:$0xff] }
 0x67e   : > { %15009 = vst [vmem:[#allocation87_spill] sm:$0xff] %v13919_v38  ;;  %8508 = vst.msk [vmem:[%s12696_s29 + $0x2] sm:$0x1] %vm8505_vm3, %v13919_v38  ;;  %10568 = vmatmul.mubr.msk.f32.gmra.mrb[16].mxu0 %vm558_vm0, %v13693_v1  ;;  %v7481_v38 = vld [vmem:[#allocation9 + $0x70] sm:$0xff] }
 0x67f   : > { %10570 = vmatprep.mubr.msk.f32.mxu0 %vm558_vm0, %v13697_v43 }
 0x682   : > { %10571 = vmatmul.mubr.msk.f32.gmra.mrb[18].mxu0 %vm558_vm0, %v13701_v45 }
 0x683   : > { %10573 = vmatprep.mubr.msk.f32.mxu0 %vm558_vm0, %v13705_v47 }
 0x686   : > { %10574 = vmatmul.mubr.msk.f32.gmra.mrb[20].mxu0 %vm558_vm0, %v13709_v4 }
 0x687   : > { %10576 = vmatprep.mubr.msk.f32.mxu0 %vm558_vm0, %v13713_v6 }
 0x68a   : > { %10577 = vmatmul.mubr.msk.f32.gmra.mrb[22].mxu0 %vm558_vm0, %v13717_v35 }
 0x68b   : > { %10579 = vmatprep.mubr.msk.f32.mxu0 %vm558_vm0, %v13721_v60 }
 0x68e   : > { %10580 = vmatmul.mubr.msk.f32.gmra.mrb[24].mxu0 %vm558_vm0, %v13725_v44 }
 0x68f   : > { %10582 = vmatprep.mubr.msk.f32.mxu0 %vm558_vm0, %v13729_v61 }
 0x692   : > { %10583 = vmatmul.mubr.msk.f32.gmra.mrb[26].mxu0 %vm558_vm0, %v13733_v58 }
 0x693   : > { %10585 = vmatprep.mubr.msk.f32.mxu0 %vm558_vm0, %v13737_v56 }
 0x696   : > { %10586 = vmatmul.mubr.msk.f32.gmra.mrb[28].mxu0 %vm558_vm0, %v13741_v52 }
 0x697   : > { %10588 = vmatprep.mubr.msk.f32.mxu0 %vm558_vm0, %v13745_v46 }
 0x69a   : > { %10589 = vmatmul.mubr.msk.f32.gmra.mrb[30].mxu0 %vm558_vm0, %v13749_v0 }
 0x69b   : > { %10591 = vmatprep.mubr.msk.f32.mxu0 %vm558_vm0, %v13753_v50 }
 0x69e   : > { %10592 = vmatmul.mubr.msk.f32.gmra.mrb[32].mxu0 %vm558_vm0, %v13757_v5 }
 0x69f   : > { %10594 = vmatprep.mubr.msk.f32.mxu0 %vm558_vm0, %v13958_v30 }
 0x6a2   : > { %10595 = vmatmul.mubr.msk.f32.gmra.mrb[34].mxu0 %vm558_vm0, %v13962_v39 }
 0x6a3   : > { %10601 = vmatprep.mubr.msk.f32.mxu0 %vm558_vm0, %v13514_v57  ;;  %v15010_v57 = vld [vmem:[#allocation79_spill] sm:$0xff] }
 0x6a6   : > { %10602 = vmatmul.mubr.msk.f32.vlgmr.msra.gmra.mrb[4].mxu0 %vm558_vm0, %v13519_v40  ;;  %v15011_v40 = vld [vmem:[#allocation81_spill] sm:$0xff] }
 0x6a7   : > { %10922 = vmatpush3.bf16.msra.mxu0 %v10919_v9  ;;  %10604 = vmatprep.mubr.msk.f32.mxu0 %vm558_vm0, %v13523_v59  ;;  %v15012_v9 = vld [vmem:[#allocation85_spill] sm:$0xff] }
 0x6a8   : > { %10924 = vmatprep.subr.bf16.mxu0 %v10923_v13 }
 0x6aa   : > { %10605 = vmatmul.mubr.msk.f32.gmra.mrb[6].mxu0 %vm558_vm0, %v13527_v55 }
 0x6ab   : > { %10607 = vmatprep.mubr.msk.f32.mxu0 %vm558_vm0, %v13531_v16 }
 0x6ae   : > { %10608 = vmatmul.mubr.msk.f32.gmra.mrb[8].mxu0 %vm558_vm0, %v13535_v12 }
 0x6af   : > { %10610 = vmatprep.mubr.msk.f32.mxu0 %vm558_vm0, %v13539_v7 }
 0x6b2   : > { %10611 = vmatmul.mubr.msk.f32.gmra.mrb[10].mxu0 %vm558_vm0, %v13543_v8 }
 0x6b3   : > { %10613 = vmatprep.mubr.msk.f32.mxu0 %vm558_vm0, %v13547_v10 }
 0x6b6   : > { %10614 = vmatmul.mubr.msk.f32.gmra.mrb[12].mxu0 %vm558_vm0, %v13551_v11 }
 0x6b7   : > { %10616 = vmatprep.mubr.msk.f32.mxu0 %vm558_vm0, %v13555_v15 }
 0x6ba   : > { %10617 = vmatmul.mubr.msk.f32.gmra.mrb[14].mxu0 %vm558_vm0, %v13559_v17 }
 0x6bb   : > { %10619 = vmatprep.mubr.msk.f32.mxu0 %vm558_vm0, %v13563_v19 }
 0x6be   : > { %10620 = vmatmul.mubr.msk.f32.gmra.mrb[16].mxu0 %vm558_vm0, %v13567_v20 }
 0x6bf   : > { %10622 = vmatprep.mubr.msk.f32.mxu0 %vm558_vm0, %v13571_v21 }
 0x6c2   : > { %10623 = vmatmul.mubr.msk.f32.gmra.mrb[18].mxu0 %vm558_vm0, %v13575_v23 }
 0x6c3   : > { %10625 = vmatprep.mubr.msk.f32.mxu0 %vm558_vm0, %v13579_v24 }
 0x6c6   : > { %10626 = vmatmul.mubr.msk.f32.gmra.mrb[20].mxu0 %vm558_vm0, %v13583_v25 }
 0x6c7   : > { %10628 = vmatprep.mubr.msk.f32.mxu0 %vm558_vm0, %v13587_v27 }
 0x6ca   : > { %10629 = vmatmul.mubr.msk.f32.gmra.mrb[22].mxu0 %vm558_vm0, %v13591_v28 }
 0x6cb   : > { %10631 = vmatprep.mubr.msk.f32.mxu0 %vm558_vm0, %v13595_v29 }
 0x6ce   : > { %10632 = vmatmul.mubr.msk.f32.gmra.mrb[24].mxu0 %vm558_vm0, %v13599_v31 }
 0x6cf   : > { %10634 = vmatprep.mubr.msk.f32.mxu0 %vm558_vm0, %v13603_v32 }
 0x6d2   : > { %10635 = vmatmul.mubr.msk.f32.gmra.mrb[26].mxu0 %vm558_vm0, %v13607_v33  ;;  %v15021_v33 = vld [vmem:[#allocation58_spill] sm:$0xff] }
 0x6d3   : > { %10637 = vmatprep.mubr.msk.f32.mxu0 %vm558_vm0, %v13611_v36  ;;  %v15020_v36 = vld [vmem:[#allocation57_spill] sm:$0xff] }
 0x6d6   : > { %10638 = vmatmul.mubr.msk.f32.gmra.mrb[28].mxu0 %vm558_vm0, %v13615_v37  ;;  %v7482_v37 = vld [vmem:[#allocation9 + $0x78] sm:$0xff] }
 0x6d7   : > { %10640 = vmatprep.mubr.msk.f32.mxu0 %vm558_vm0, %v15010_v57  ;;  %v15016_v57 = vld [vmem:[#allocation53_spill] sm:$0xff] }
 0x6da   : > { %10641 = vmatmul.mubr.msk.f32.gmra.mrb[30].mxu0 %vm558_vm0, %v15011_v40  ;;  %v10927_v40 = vpack.c.bf16 %v7482_v37, %v7481_v38  ;;  %v15023_v37 = vld [vmem:[#allocation89_spill] sm:$0xff]  ;;  %v15024_v38 = vld [vmem:[#allocation63_spill] sm:$0xff] }
 0x6db   : > { %10643 = vmatprep.mubr.msk.f32.mxu0 %vm558_vm0, %v15012_v9  ;;  %v15017_v9 = vld [vmem:[#allocation54_spill] sm:$0xff] }
 0x6de   : > { %10644 = vmatmul.mubr.msk.f32.gmra.mrb[32].mxu0 %vm558_vm0, %v15013_v53  ;;  %v15018_v53 = vld [vmem:[#allocation55_spill] sm:$0xff] }
 0x6df   : > { %10646 = vmatprep.mubr.msk.f32.mxu0 %vm558_vm0, %v14026_v62  ;;  %v15019_v62 = vld [vmem:[#allocation56_spill] sm:$0xff] }
 0x6e2   : > { %10647 = vmatmul.mubr.msk.f32.gmra.mrb[34].mxu0 %vm558_vm0, %v14030_v63  ;;  %v15022_v63 = vld [vmem:[#allocation88_spill] sm:$0xff] }
 0x6e3   : > { %10653 = vmatprep.mubr.msk.f32.mxu0 %vm558_vm0, %v15016_v57  ;;  %v15026_v57 = vld [vmem:[#allocation65_spill] sm:$0xff] }
 0x6e6   : > { %10654 = vmatmul.mubr.msk.f32.vlgmr.msra.gmra.mrb[4].mxu0 %vm558_vm0, %v15017_v9  ;;  %v15027_v9 = vld [vmem:[#allocation66_spill] sm:$0xff] }
 0x6e7   : > { %10926 = vmatpush3.bf16.msra.mxu0 %v10923_v13  ;;  %10656 = vmatprep.mubr.msk.f32.mxu0 %vm558_vm0, %v15018_v53  ;;  %v15025_v13 = vld [vmem:[#allocation64_spill] sm:$0xff] }
 0x6e8   : > { %10928 = vmatprep.subr.bf16.mxu0 %v10927_v40 }
 0x6ea   : > { %10657 = vmatmul.mubr.msk.f32.gmra.mrb[6].mxu0 %vm558_vm0, %v15019_v62 }
 0x6eb   : > { %10659 = vmatprep.mubr.msk.f32.mxu0 %vm558_vm0, %v15020_v36  ;;  %v15028_v36 = vld [vmem:[#allocation67_spill] sm:$0xff] }
 0x6ee   : > { %10660 = vmatmul.mubr.msk.f32.gmra.mrb[8].mxu0 %vm558_vm0, %v15021_v33  ;;  %v15029_v33 = vld [vmem:[#allocation68_spill] sm:$0xff] }
 0x6ef   : > { %10662 = vmatprep.mubr.msk.f32.mxu0 %vm558_vm0, %v15022_v63  ;;  %v15030_v63 = vld [vmem:[#allocation69_spill] sm:$0xff] }
 0x6f2   : > { %10663 = vmatmul.mubr.msk.f32.gmra.mrb[10].mxu0 %vm558_vm0, %v15023_v37  ;;  %v15031_v37 = vld [vmem:[#allocation70_spill] sm:$0xff] }
 0x6f3   : > { %10665 = vmatprep.mubr.msk.f32.mxu0 %vm558_vm0, %v15024_v38  ;;  %v15032_v38 = vld [vmem:[#allocation71_spill] sm:$0xff] }
 0x6f6   : > { %10666 = vmatmul.mubr.msk.f32.gmra.mrb[12].mxu0 %vm558_vm0, %v15025_v13  ;;  %v15033_v13 = vld [vmem:[#allocation72_spill] sm:$0xff] }
 0x6f7   : > { %10668 = vmatprep.mubr.msk.f32.mxu0 %vm558_vm0, %v15026_v57  ;;  %v15034_v57 = vld [vmem:[#allocation73_spill] sm:$0xff] }
 0x6fa   : > { %10669 = vmatmul.mubr.msk.f32.gmra.mrb[14].mxu0 %vm558_vm0, %v15027_v9  ;;  %v15035_v9 = vld [vmem:[#allocation74_spill] sm:$0xff] }
 0x6fb   : > { %10671 = vmatprep.mubr.msk.f32.mxu0 %vm558_vm0, %v15028_v36  ;;  %v15036_v36 = vld [vmem:[#allocation75_spill] sm:$0xff] }
 0x6fe   : > { %10672 = vmatmul.mubr.msk.f32.gmra.mrb[16].mxu0 %vm558_vm0, %v15029_v33  ;;  %v15037_v33 = vld [vmem:[#allocation77_spill] sm:$0xff] }
 0x6ff   : > { %10674 = vmatprep.mubr.msk.f32.mxu0 %vm558_vm0, %v15030_v63  ;;  %v15038_v63 = vld [vmem:[#allocation80_spill] sm:$0xff] }
 0x702   : > { %10675 = vmatmul.mubr.msk.f32.gmra.mrb[18].mxu0 %vm558_vm0, %v15031_v37  ;;  %v15039_v37 = vld [vmem:[#allocation82_spill] sm:$0xff] }
 0x703   : > { %10677 = vmatprep.mubr.msk.f32.mxu0 %vm558_vm0, %v15032_v38  ;;  %v15040_v38 = vld [vmem:[#allocation83_spill] sm:$0xff] }
 0x706   : > { %10678 = vmatmul.mubr.msk.f32.gmra.mrb[20].mxu0 %vm558_vm0, %v15033_v13 }
 0x707   : > { %10680 = vmatprep.mubr.msk.f32.mxu0 %vm558_vm0, %v15034_v57  ;;  %v15041_v57 = vld [vmem:[#allocation86_spill] sm:$0xff] }
 0x70a   : > { %10681 = vmatmul.mubr.msk.f32.gmra.mrb[22].mxu0 %vm558_vm0, %v15035_v9 }
 0x70b   : > { %10683 = vmatprep.mubr.msk.f32.mxu0 %vm558_vm0, %v15036_v36 }
 0x70e   : > { %10684 = vmatmul.mubr.msk.f32.gmra.mrb[24].mxu0 %vm558_vm0, %v15037_v33 }
 0x70f   : > { %10686 = vmatprep.mubr.msk.f32.mxu0 %vm558_vm0, %v15038_v63  ;;  %v14094_v63 = vld [vmem:[#allocation3 + $0x209] sm:$0xff] }
 0x710   : > { %15042 = vst [vmem:[#allocation53_spill] sm:$0xff] %v14094_v63 }
 0x712   : > { %10687 = vmatmul.mubr.msk.f32.gmra.mrb[26].mxu0 %vm558_vm0, %v15039_v37  ;;  %v7870_v37 = vld [vmem:[#allocation9 + $0x88] sm:$0xff] }
 0x713   : > { %10689 = vmatprep.mubr.msk.f32.mxu0 %vm558_vm0, %v15040_v38  ;;  %v14098_v38 = vld [vmem:[#allocation3 + $0x211] sm:$0xff] }
 0x714   : > { %15043 = vst [vmem:[#allocation54_spill] sm:$0xff] %v14098_v38 }
 0x716   : > { %10690 = vmatmul.mubr.msk.f32.gmra.mrb[28].mxu0 %vm558_vm0, %v13867_v2  ;;  %v7869_v2 = vld [vmem:[#allocation9 + $0x80] sm:$0xff] }
 0x717   : > { %10692 = vmatprep.mubr.msk.f32.mxu0 %vm558_vm0, %v15041_v57 }
 0x71a   : > { %10693 = vmatmul.mubr.msk.f32.gmra.mrb[30].mxu0 %vm558_vm0, %v13875_v3  ;;  %v10931_v3 = vpack.c.bf16 %v7870_v37, %v7869_v2 }
 0x71b   : > { %10695 = vmatprep.mubr.msk.f32.mxu0 %vm558_vm0, %v13879_v49 }
 0x71e   : > { %10696 = vmatmul.mubr.msk.f32.gmra.mrb[32].mxu0 %vm558_vm0, %v13883_v54 }
 0x71f   : > { %10698 = vmatprep.mubr.msk.f32.mxu0 %vm558_vm0, %v14094_v63  ;;  %v15044_v63 = vld [vmem:[#allocation51_spill] sm:$0xff] }
 0x722   : > { %10699 = vmatmul.mubr.msk.f32.gmra.mrb[34].mxu0 %vm558_vm0, %v14098_v38  ;;  %v15045_v38 = vld [vmem:[#allocation52_spill] sm:$0xff] }
 0x723   : > { %10705 = vmatprep.mubr.msk.f32.mxu0 %vm558_vm0, %v13649_v14  ;;  %v7090_v14 = vld [vmem:[#allocation3 + $0x227] sm:$0xff] }
 0x726   : > { %10706 = vmatmul.mubr.msk.f32.vlgmr.msra.gmra.mrb[4].mxu0 %vm558_vm0, %v13653_v18  ;;  %v7091_v18 = vld [vmem:[#allocation3 + $0x22f] sm:$0xff] }
 0x727   : > { %10930 = vmatpush3.bf16.msra.mxu0 %v10927_v40  ;;  %10708 = vmatprep.mubr.msk.f32.mxu0 %vm558_vm0, %v13657_v22  ;;  %v15065_v22 = vld [vmem:[#allocation69_spill] sm:$0xff] }
 0x728   : > { %10932 = vmatprep.subr.bf16.mxu0 %v10931_v3 }
 0x72a   : > { %10709 = vmatmul.mubr.msk.f32.gmra.mrb[6].mxu0 %vm558_vm0, %v13661_v26  ;;  %v15066_v26 = vld [vmem:[#allocation70_spill] sm:$0xff] }
 0x72b   : > { %10711 = vmatprep.mubr.msk.f32.mxu0 %vm558_vm0, %v15044_v63 }
 0x72e   : > { %10712 = vmatmul.mubr.msk.f32.gmra.mrb[8].mxu0 %vm558_vm0, %v13669_v34  ;;  %v15067_v34 = vld [vmem:[#allocation71_spill] sm:$0xff] }
 0x72f   : > { %10714 = vmatprep.mubr.msk.f32.mxu0 %vm558_vm0, %v15045_v38  ;;  %v15082_v38 = vld [vmem:[#allocation19_spill] sm:$0xff] }
 0x732   : > { %10715 = vmatmul.mubr.msk.f32.gmra.mrb[10].mxu0 %vm558_vm0, %v13677_v42  ;;  %v15068_v42 = vld [vmem:[#allocation73_spill] sm:$0xff] }
 0x733   : > { %10717 = vmatprep.mubr.msk.f32.mxu0 %vm558_vm0, %v13681_v48  ;;  %v15069_v48 = vld [vmem:[#allocation80_spill] sm:$0xff] }
 0x736   : > { %10718 = vmatmul.mubr.msk.f32.gmra.mrb[12].mxu0 %vm558_vm0, %v13685_v51  ;;  %v15070_v51 = vld [vmem:[#allocation82_spill] sm:$0xff] }
 0x737   : > { %10720 = vmatprep.mubr.msk.f32.mxu0 %vm558_vm0, %v13689_v41  ;;  %v15071_v41 = vld [vmem:[#allocation83_spill] sm:$0xff] }
 0x73a   : > { %10721 = vmatmul.mubr.msk.f32.gmra.mrb[14].mxu0 %vm558_vm0, %v13693_v1  ;;  %v15072_v1 = vld [vmem:[#allocation84_spill] sm:$0xff] }
 0x73b   : > { %10723 = vmatprep.mubr.msk.f32.mxu0 %vm558_vm0, %v13697_v43  ;;  %v15073_v43 = vld [vmem:[#allocation60_spill] sm:$0xff] }
 0x73e   : > { %10724 = vmatmul.mubr.msk.f32.gmra.mrb[16].mxu0 %vm558_vm0, %v13701_v45  ;;  %v15075_v45 = vld [vmem:[#allocation54_spill] sm:$0xff] }
 0x73f   : > { %10726 = vmatprep.mubr.msk.f32.mxu0 %vm558_vm0, %v13705_v47  ;;  %v7867_v47 = vld [vmem:[#allocation3 + $0x231] sm:$0xff] }
 0x742   : > { %10727 = vmatmul.mubr.msk.f32.gmra.mrb[18].mxu0 %vm558_vm0, %v13709_v4  ;;  %v14291_v4 = vld [vmem:[%s15076_s5] ss:$0 sm:$0xff] }
 0x743   : > { %10729 = vmatprep.mubr.msk.f32.mxu0 %vm558_vm0, %v13713_v6 }
 0x746   : > { %10730 = vmatmul.mubr.msk.f32.gmra.mrb[20].mxu0 %vm558_vm0, %v13717_v35  ;;  %v14296_v35 = vld [vmem:[%s15077_s23] ss:$0 sm:$0xff]  ;;  %s11616_s23 = sshll.u32 %s11724_s26, 4  ;;  %s11617_s23 = int_to_ptr.vmem [resolvable:$false] %s11616_s23 }
 0x747   : > { %10732 = vmatprep.mubr.msk.f32.mxu0 %vm558_vm0, %v13721_v60  ;;  %s11618_s18 = scalar_lea.vmem %s11617_s23, 8192  ;;  %p11619_p7 = scmp.lt.s32.totalorder %s14534_s22, %s11617_s23 }
 0x748   : > { %p11620_p9 = scmp.lt.s32.totalorder %s11618_s18, %s11612_s20 }
 0x74a   : > { %10733 = vmatmul.mubr.msk.f32.gmra.mrb[22].mxu0 %vm558_vm0, %v13725_v44  ;;  %p11621_p12 = por %p11620_p9, %p11619_p7 }
 0x74b   : > { %10735 = vmatprep.mubr.msk.f32.mxu0 %vm558_vm0, %v13729_v61 }
 0x74c   : > { %p11622_p1 = pnand %p11621_p12, %p11615_p3 }
 0x74e   : > { %10736 = vmatmul.mubr.msk.f32.gmra.mrb[24].mxu0 %vm558_vm0, %v13733_v58  ;;  %v15078_v58 = vld [vmem:[#allocation61_spill] sm:$0xff] }
 0x74f   : > { %10738 = vmatprep.mubr.msk.f32.mxu0 %vm558_vm0, %v13737_v56  ;;  %v15079_v56 = vsub.s32 0, %v15078_v58 }
 0x752   : > { %10739 = vmatmul.mubr.msk.f32.gmra.mrb[26].mxu0 %vm558_vm0, %v13741_v52  ;;  %v15080_v52 = vld [vmem:[#allocation87_spill] sm:$0xff] }
 0x753   : > { %10741 = vmatprep.mubr.msk.f32.mxu0 %vm558_vm0, %v13745_v46  ;;  %v14303_v46 = vrot.slane %v15080_v52, %v15079_v56 }
 0x756   : > { %10742 = vmatmul.mubr.msk.f32.gmra.mrb[28].mxu0 %vm558_vm0, %v13749_v0 }
 0x757   : > { %10744 = vmatprep.mubr.msk.f32.mxu0 %vm558_vm0, %v13753_v50 }
 0x75a   : > { %10745 = vmatmul.mubr.msk.f32.gmra.mrb[30].mxu0 %vm558_vm0, %v13757_v5 }
 0x75b   : > { %10747 = vmatprep.mubr.msk.f32.mxu0 %vm558_vm0, %v13958_v30 }
 0x75e   : > { %10748 = vmatmul.mubr.msk.f32.gmra.mrb[32].mxu0 %vm558_vm0, %v13962_v39 }
 0x75f   : > { %10750 = vmatprep.mubr.msk.f32.mxu0 %vm558_vm0, %v7090_v14 }
 0x762   : > { %10751 = vmatmul.mubr.msk.f32.gmra.mrb[34].mxu0 %vm558_vm0, %v7091_v18 }
 0x763   : > { %10757 = vmatprep.mubr.msk.f32.mxu0 %vm558_vm0, %v13523_v59  ;;  %v15046_v59 = vld [vmem:[#allocation62_spill] sm:$0xff] }
 0x766   : > { %10758 = vmatmul.mubr.msk.f32.vlgmr.msra.gmra.mrb[4].mxu0 %vm558_vm0, %v13527_v55  ;;  %v15047_v55 = vld [vmem:[#allocation76_spill] sm:$0xff] }
 0x767   : > { %10934 = vmatpush3.bf16.msra.mxu0 %v10931_v3  ;;  %10760 = vmatprep.mubr.msk.f32.mxu0 %vm558_vm0, %v13531_v16  ;;  %v15048_v16 = vld [vmem:[#allocation78_spill] sm:$0xff] }
 0x76a   : > { %10761 = vmatmul.mubr.msk.f32.gmra.mrb[6].mxu0 %vm558_vm0, %v13535_v12  ;;  %v15049_v12 = vld [vmem:[#allocation79_spill] sm:$0xff] }
 0x76b   : > { %10763 = vmatprep.mubr.msk.f32.mxu0 %vm558_vm0, %v13539_v7  ;;  %v15050_v7 = vld [vmem:[#allocation81_spill] sm:$0xff] }
 0x76e   : > { %10764 = vmatmul.mubr.msk.f32.gmra.mrb[8].mxu0 %vm558_vm0, %v13543_v8  ;;  %v15051_v8 = vld [vmem:[#allocation85_spill] sm:$0xff] }
 0x76f   : > { %10766 = vmatprep.mubr.msk.f32.mxu0 %vm558_vm0, %v13547_v10  ;;  %v15052_v10 = vld [vmem:[#allocation59_spill] sm:$0xff] }
 0x772   : > { %10767 = vmatmul.mubr.msk.f32.gmra.mrb[10].mxu0 %vm558_vm0, %v13551_v11  ;;  %v15053_v11 = vld [vmem:[#allocation90_spill] sm:$0xff] }
 0x773   : > { %10769 = vmatprep.mubr.msk.f32.mxu0 %vm558_vm0, %v13555_v15  ;;  %v7478_v15 = vld [vmem:[#allocation3 + $0x228] sm:$0xff] }
 0x776   : > { %10770 = vmatmul.mubr.msk.f32.gmra.mrb[12].mxu0 %vm558_vm0, %v13559_v17  ;;  %v15054_v17 = vld [vmem:[#allocation91_spill] sm:$0xff] }
 0x777   : > { %10772 = vmatprep.mubr.msk.f32.mxu0 %vm558_vm0, %v13563_v19  ;;  %v7479_v19 = vld [vmem:[#allocation3 + $0x230] sm:$0xff] }
 0x77a   : > { %10773 = vmatmul.mubr.msk.f32.gmra.mrb[14].mxu0 %vm558_vm0, %v13567_v20  ;;  %v15055_v20 = vld [vmem:[#allocation57_spill] sm:$0xff] }
 0x77b   : > { %10775 = vmatprep.mubr.msk.f32.mxu0 %vm558_vm0, %v13571_v21  ;;  %v15056_v21 = vld [vmem:[#allocation58_spill] sm:$0xff] }
 0x77e   : > { %10776 = vmatmul.mubr.msk.f32.gmra.mrb[16].mxu0 %vm558_vm0, %v13575_v23  ;;  %v15057_v23 = vld [vmem:[#allocation88_spill] sm:$0xff] }
 0x77f   : > { %10778 = vmatprep.mubr.msk.f32.mxu0 %vm558_vm0, %v13579_v24  ;;  %v15058_v24 = vld [vmem:[#allocation89_spill] sm:$0xff] }
 0x782   : > { %10779 = vmatmul.mubr.msk.f32.gmra.mrb[18].mxu0 %vm558_vm0, %v13583_v25  ;;  %v15059_v25 = vld [vmem:[#allocation63_spill] sm:$0xff] }
 0x783   : > { %10781 = vmatprep.mubr.msk.f32.mxu0 %vm558_vm0, %v13587_v27  ;;  %v15060_v27 = vld [vmem:[#allocation64_spill] sm:$0xff] }
 0x786   : > { %10782 = vmatmul.mubr.msk.f32.gmra.mrb[20].mxu0 %vm558_vm0, %v13591_v28  ;;  %v15061_v28 = vld [vmem:[#allocation65_spill] sm:$0xff] }
 0x787   : > { %10784 = vmatprep.mubr.msk.f32.mxu0 %vm558_vm0, %v13595_v29  ;;  %v15062_v29 = vld [vmem:[#allocation66_spill] sm:$0xff] }
 0x78a   : > { %10785 = vmatmul.mubr.msk.f32.gmra.mrb[22].mxu0 %vm558_vm0, %v13599_v31  ;;  %v15063_v31 = vld [vmem:[#allocation67_spill] sm:$0xff] }
 0x78b   : > { %10787 = vmatprep.mubr.msk.f32.mxu0 %vm558_vm0, %v13603_v32  ;;  %v15064_v32 = vld [vmem:[#allocation68_spill] sm:$0xff] }
 0x78e   : > { %10788 = vmatmul.mubr.msk.f32.gmra.mrb[24].mxu0 %vm558_vm0, %v15046_v59 }
 0x78f   : > { %10790 = vmatprep.mubr.msk.f32.mxu0 %vm558_vm0, %v15047_v55 }
 0x792   : > { %10791 = vmatmul.mubr.msk.f32.gmra.mrb[26].mxu0 %vm558_vm0, %v15048_v16 }
 0x793   : > { %10793 = vmatprep.mubr.msk.f32.mxu0 %vm558_vm0, %v15049_v12 }
 0x796   : > { %10794 = vmatmul.mubr.msk.f32.gmra.mrb[28].mxu0 %vm558_vm0, %v15050_v7 }
 0x797   : > { %10796 = vmatprep.mubr.msk.f32.mxu0 %vm558_vm0, %v15051_v8 }
 0x79a   : > { %10797 = vmatmul.mubr.msk.f32.gmra.mrb[30].mxu0 %vm558_vm0, %v15052_v10  ;;  %v15083_v10 = vld [vmem:[#allocation22_spill] sm:$0xff] }
 0x79b   : > { %10799 = vmatprep.mubr.msk.f32.mxu0 %vm558_vm0, %v15053_v11 }
 0x79e   : > { %10800 = vmatmul.mubr.msk.f32.gmra.mrb[32].mxu0 %vm558_vm0, %v15054_v17 }
 0x79f   : > { %10802 = vmatprep.mubr.msk.f32.mxu0 %vm558_vm0, %v7478_v15 }
 0x7a2   : > { %10803 = vmatmul.mubr.msk.f32.gmra.mrb[34].mxu0 %vm558_vm0, %v7479_v19 }
 0x7a3   : > { %10809 = vmatprep.mubr.msk.f32.mxu0 %vm558_vm0, %v15018_v53  ;;  %v15081_v53 = vld [vmem:[#allocation20_spill] sm:$0xff] }
 0x7a6   : > { %10810 = vmatmul.mubr.msk.f32.vlgmr.msra.gmra.mrb[4].mxu0 %vm558_vm0, %v15019_v62 }
 0x7a7   : > { %10812 = vmatprep.mubr.msk.f32.mxu0 %vm558_vm0, %v15055_v20  ;;  %v15084_v20 = vld [vmem:[#allocation21_spill] sm:$0xff] }
 0x7aa   : > { %10813 = vmatmul.mubr.msk.f32.gmra.mrb[6].mxu0 %vm558_vm0, %v15056_v21 }
 0x7ab   : > { %10815 = vmatprep.mubr.msk.f32.mxu0 %vm558_vm0, %v15057_v23 }
 0x7ae   : > { %10816 = vmatmul.mubr.msk.f32.gmra.mrb[8].mxu0 %vm558_vm0, %v15058_v24 }
 0x7af   : > { %10818 = vmatprep.mubr.msk.f32.mxu0 %vm558_vm0, %v15059_v25 }
 0x7b2   : > { %10819 = vmatmul.mubr.msk.f32.gmra.mrb[10].mxu0 %vm558_vm0, %v15060_v27 }
 0x7b3   : > { %10821 = vmatprep.mubr.msk.f32.mxu0 %vm558_vm0, %v15061_v28 }
 0x7b6   : > { %10822 = vmatmul.mubr.msk.f32.gmra.mrb[12].mxu0 %vm558_vm0, %v15062_v29 }
 0x7b7   : > { %10824 = vmatprep.mubr.msk.f32.mxu0 %vm558_vm0, %v15063_v31 }
 0x7ba   : > { %10825 = vmatmul.mubr.msk.f32.gmra.mrb[14].mxu0 %vm558_vm0, %v15064_v32 }
 0x7bb   : > { %10827 = vmatprep.mubr.msk.f32.mxu0 %vm558_vm0, %v15065_v22 }
 0x7be   : > { %10828 = vmatmul.mubr.msk.f32.gmra.mrb[16].mxu0 %vm558_vm0, %v15066_v26 }
 0x7bf   : > { %10830 = vmatprep.mubr.msk.f32.mxu0 %vm558_vm0, %v15067_v34  ;;  %v15085_v34 = vld [vmem:[#allocation24_spill] sm:$0xff] }
 0x7c2   : > { %10831 = vmatmul.mubr.msk.f32.gmra.mrb[18].mxu0 %vm558_vm0, %v15033_v13 }
 0x7c3   : > { %10833 = vmatprep.mubr.msk.f32.mxu0 %vm558_vm0, %v15068_v42 }
 0x7c6   : > { %10834 = vmatmul.mubr.msk.f32.gmra.mrb[20].mxu0 %vm558_vm0, %v15035_v9 }
 0x7c7   : > { %10836 = vmatprep.mubr.msk.f32.mxu0 %vm558_vm0, %v15036_v36  ;;  %v7866_v36 = vld [vmem:[#allocation3 + $0x229] sm:$0xff] }
 0x7ca   : > { %10837 = vmatmul.mubr.msk.f32.gmra.mrb[22].mxu0 %vm558_vm0, %v15037_v33  ;;  %v15074_v33 = vld [vmem:[#allocation53_spill] sm:$0xff] }
 0x7cb   : > { %10839 = vmatprep.mubr.msk.f32.mxu0 %vm558_vm0, %v15069_v48 }
 0x7ce   : > { %10840 = vmatmul.mubr.msk.f32.gmra.mrb[24].mxu0 %vm558_vm0, %v15070_v51 }
 0x7cf   : > { %10842 = vmatprep.mubr.msk.f32.mxu0 %vm558_vm0, %v15071_v41 }
 0x7d2   : > { %10843 = vmatmul.mubr.msk.f32.gmra.mrb[26].mxu0 %vm558_vm0, %v15072_v1  ;;  %v15086_v1 = vld [vmem:[#allocation23_spill] sm:$0xff] }
 0x7d3   : > { %10845 = vmatprep.mubr.msk.f32.mxu0 %vm558_vm0, %v15041_v57 }
 0x7d6   : > { %10846 = vmatmul.mubr.msk.f32.gmra.mrb[28].mxu0 %vm558_vm0, %v15073_v43 }
 0x7d7   : > { %10848 = vmatprep.mubr.msk.f32.mxu0 %vm558_vm0, %v13879_v49 }
 0x7da   : > { %10849 = vmatmul.mubr.msk.f32.gmra.mrb[30].mxu0 %vm558_vm0, %v13883_v54 }
 0x7db   : > { %10851 = vmatprep.mubr.msk.f32.mxu0 %vm558_vm0, %v15074_v33 }
 0x7de   : > { %10852 = vmatmul.mubr.msk.f32.gmra.mrb[32].mxu0 %vm558_vm0, %v15075_v45 }
 0x7df   : > { %10854 = vmatprep.mubr.msk.f32.mxu0 %vm558_vm0, %v7866_v36 }
 0x7e2   : > { %10855 = vmatmul.mubr.msk.f32.gmra.mrb[34].mxu0 %vm558_vm0, %v7867_v47 }
 0x879   : > { %v10811_v6 = vpop.f32.mrb[4].mxu0 }
 0x87a   : > { %v8232_v60 = vmul.f32 %v10811_v6, %v14291_v4  ;;  %v8033_v44 = vpop.f32.mrb[5].mxu0 }
 0x87b   : > { %v8231_v61 = vmul.f32 %v14291_v4, %v8033_v44 }
 0x87c   : > { %v8271_v0 = vadd.f32 %v14296_v35, %v8232_v60 }
 0x87d   : > { %v8270_v50 = vadd.f32 %v14296_v35, %v8231_v61  ;;  %v10814_v5 = vpop.f32.mrb[6].mxu0 }
 0x87e   : > { %v8303_v3 = vsel %vm558_vm0, %v8271_v0, 0.0  ;;  %v8377_v49 = vmul.f32 %v14303_v46, %v8271_v0  ;;  %v8234_v54 = vmul.f32 %v10814_v5, %v14291_v4  ;;  %v8043_v2 = vpop.f32.mrb[7].mxu0  ;;  %v15087_v5 = vld [vmem:[#allocation26_spill] sm:$0xff] }
 0x87f   : > { %v8302_v30 = vsel %vm558_vm0, %v8270_v50, 0.0  ;;  %v8376_v39 = vmul.f32 %v14303_v46, %v8270_v50  ;;  %v8233_v40 = vmul.f32 %v14291_v4, %v8043_v2 }
 0x880   : > { %v8409_v62 = vadd.f32 %v8377_v49, %v15081_v53  ;;  %v8304_v63 = vadd.f32 %v8303_v3, %v8302_v30  ;;  %v8273_v37 = vadd.f32 %v14296_v35, %v8234_v54 }
 0x881   : > { %v8408_v13 = vadd.f32 %v8376_v39, %v15082_v38  ;;  %v8272_v57 = vadd.f32 %v14296_v35, %v8233_v40  ;;  %v10817_v9 = vpop.f32.mrb[8].mxu0  ;;  %v15088_v39 = vld [vmem:[#allocation25_spill] sm:$0xff] }
 0x882   : > { %v8441_v14 = vmax.f32 %v8409_v62, 0.0  ;;  %v8379_v18 = vmul.f32 %v14303_v46, %v8273_v37  ;;  %v8236_v59 = vmul.f32 %v10817_v9, %v14291_v4  ;;  %v8053_v55 = vpop.f32.mrb[9].mxu0  ;;  %v8307_v19 = vsel %vm558_vm0, %v8273_v37, 0.0 }
 0x883   : > { %v8440_v16 = vmax.f32 %v8408_v13, 0.0  ;;  %v8305_v12 = vsel %vm558_vm0, %v8272_v57, 0.0  ;;  %v8378_v7 = vmul.f32 %v14303_v46, %v8272_v57  ;;  %v8235_v8 = vmul.f32 %v14291_v4, %v8053_v55 }
 0x884   : > { %8473 = vst.msk [vmem:[%s14324_s25 + $0x8] sm:$0xff] %vm558_vm0, %v8441_v14  ;;  %v8411_v11 = vadd.f32 %v8379_v18, %v15083_v10  ;;  %v8306_v15 = vadd.f32 %v8305_v12, %v8304_v63  ;;  %v8275_v17 = vadd.f32 %v14296_v35, %v8236_v59  ;;  %v15089_v14 = vld [vmem:[#allocation28_spill] sm:$0xff]  ;;  %v15090_v12 = vld [vmem:[#allocation27_spill] sm:$0xff] }
 0x885   : > { %8472 = vst.msk [vmem:[%s14324_s25] sm:$0xff] %vm558_vm0, %v8440_v16  ;;  %v8410_v21 = vadd.f32 %v8378_v7, %v15084_v20  ;;  %v8274_v23 = vadd.f32 %v14296_v35, %v8235_v8  ;;  %v10820_v24 = vpop.f32.mrb[10].mxu0 }
 0x886   : > { %v8443_v25 = vmax.f32 %v8411_v11, 0.0  ;;  %v8381_v27 = vmul.f32 %v14303_v46, %v8275_v17  ;;  %v8308_v28 = vadd.f32 %v8307_v19, %v8306_v15  ;;  %v8063_v29 = vpop.f32.mrb[11].mxu0  ;;  %v8238_v26 = vmul.f32 %v10820_v24, %v14291_v4 }
 0x887   : > { %v8442_v31 = vmax.f32 %v8410_v21, 0.0  ;;  %v8309_v32 = vsel %vm558_vm0, %v8274_v23, 0.0  ;;  %v8380_v22 = vmul.f32 %v14303_v46, %v8274_v23  ;;  %v8237_v51 = vmul.f32 %v14291_v4, %v8063_v29 }
 0x888   : > { %8475 = vst.msk [vmem:[%s14324_s25 + $0x18] sm:$0xff] %vm558_vm0, %v8443_v25  ;;  %v8413_v42 = vadd.f32 %v8381_v27, %v15085_v34  ;;  %v8310_v48 = vadd.f32 %v8309_v32, %v8308_v28  ;;  %v8311_v41 = vsel %vm558_vm0, %v8275_v17, 0.0  ;;  %v8277_v33 = vadd.f32 %v14296_v35, %v8238_v26  ;;  %v15091_v25 = vld [vmem:[#allocation30_spill] sm:$0xff] }
 0x889   : > { %8474 = vst.msk [vmem:[%s14324_s25 + $0x10] sm:$0xff] %vm558_vm0, %v8442_v31  ;;  %v8412_v43 = vadd.f32 %v8380_v22, %v15086_v1  ;;  %v10823_v36 = vpop.f32.mrb[12].mxu0  ;;  %v8276_v47 = vadd.f32 %v14296_v35, %v8237_v51 }
 0x88a   : > { %v8445_v45 = vmax.f32 %v8413_v42, 0.0  ;;  %v8312_v6 = vadd.f32 %v8311_v41, %v8310_v48  ;;  %v8240_v60 = vmul.f32 %v10823_v36, %v14291_v4  ;;  %v8073_v44 = vpop.f32.mrb[13].mxu0  ;;  %v8383_v58 = vmul.f32 %v14303_v46, %v8277_v33  ;;  %v15092_v48 = vld [vmem:[#allocation29_spill] sm:$0xff] }
 0x88b   : > { %v8444_v61 = vmax.f32 %v8412_v43, 0.0  ;;  %v8239_v56 = vmul.f32 %v14291_v4, %v8073_v44  ;;  %v8313_v52 = vsel %vm558_vm0, %v8276_v47, 0.0  ;;  %v8382_v0 = vmul.f32 %v14303_v46, %v8276_v47  ;;  %v15093_v44 = vld [vmem:[#allocation32_spill] sm:$0xff] }
 0x88c   : > { %8477 = vst.msk [vmem:[%s14324_s25 + $0x28] sm:$0xff] %vm558_vm0, %v8445_v45  ;;  %v8279_v50 = vadd.f32 %v14296_v35, %v8240_v60  ;;  %v8415_v3 = vadd.f32 %v8383_v58, %v15087_v5  ;;  %v8314_v49 = vadd.f32 %v8313_v52, %v8312_v6  ;;  %v8315_v30 = vsel %vm558_vm0, %v8277_v33, 0.0 }
 0x88d   : > { %8476 = vst.msk [vmem:[%s14324_s25 + $0x20] sm:$0xff] %vm558_vm0, %v8444_v61  ;;  %v8278_v54 = vadd.f32 %v14296_v35, %v8239_v56  ;;  %v10826_v2 = vpop.f32.mrb[14].mxu0  ;;  %v8414_v40 = vadd.f32 %v8382_v0, %v15088_v39  ;;  %v15094_v0 = vld [vmem:[#allocation31_spill] sm:$0xff] }
 0x88e   : > { %v8385_v53 = vmul.f32 %v14303_v46, %v8279_v50  ;;  %v8242_v62 = vmul.f32 %v10826_v2, %v14291_v4  ;;  %v8083_v63 = vpop.f32.mrb[15].mxu0  ;;  %v8447_v37 = vmax.f32 %v8415_v3, 0.0  ;;  %v8316_v38 = vadd.f32 %v8315_v30, %v8314_v49 }
 0x88f   : > { %v8317_v13 = vsel %vm558_vm0, %v8278_v54, 0.0  ;;  %v8384_v57 = vmul.f32 %v14303_v46, %v8278_v54  ;;  %v8446_v9 = vmax.f32 %v8414_v40, 0.0  ;;  %v8241_v55 = vmul.f32 %v14291_v4, %v8083_v63 }
 0x890   : > { %v8417_v18 = vadd.f32 %v8385_v53, %v15089_v14  ;;  %v8281_v59 = vadd.f32 %v14296_v35, %v8242_v62  ;;  %8479 = vst.msk [vmem:[%s14324_s25 + $0x38] sm:$0xff] %vm558_vm0, %v8447_v37  ;;  %v8318_v16 = vadd.f32 %v8317_v13, %v8316_v38  ;;  %v8319_v10 = vsel %vm558_vm0, %v8279_v50, 0.0  ;;  %v15095_v53 = vld [vmem:[#allocation34_spill] sm:$0xff] }
 0x891   : > { %v8416_v7 = vadd.f32 %v8384_v57, %v15090_v12  ;;  %v10829_v8 = vpop.f32.mrb[16].mxu0  ;;  %8478 = vst.msk [vmem:[%s14324_s25 + $0x30] sm:$0xff] %vm558_vm0, %v8446_v9  ;;  %v8280_v17 = vadd.f32 %v14296_v35, %v8241_v55 }
 0x892   : > { %v8449_v11 = vmax.f32 %v8417_v18, 0.0  ;;  %v8387_v15 = vmul.f32 %v14303_v46, %v8281_v59  ;;  %v8093_v19 = vpop.f32.mrb[17].mxu0  ;;  %v8320_v21 = vadd.f32 %v8319_v10, %v8318_v16  ;;  %v8244_v23 = vmul.f32 %v10829_v8, %v14291_v4 }
 0x893   : > { %v8448_v20 = vmax.f32 %v8416_v7, 0.0  ;;  %v8243_v24 = vmul.f32 %v14291_v4, %v8093_v19  ;;  %v8321_v28 = vsel %vm558_vm0, %v8280_v17, 0.0  ;;  %v8386_v29 = vmul.f32 %v14303_v46, %v8280_v17 }
 0x894   : > { %8481 = vst.msk [vmem:[%s14324_s25 + $0x48] sm:$0xff] %vm558_vm0, %v8449_v11  ;;  %v8419_v27 = vadd.f32 %v8387_v15, %v15091_v25  ;;  %v8322_v31 = vadd.f32 %v8321_v28, %v8320_v21  ;;  %v8283_v32 = vadd.f32 %v14296_v35, %v8244_v23  ;;  %v8323_v34 = vsel %vm558_vm0, %v8281_v59, 0.0  ;;  %v15096_v59 = vld [vmem:[#allocation33_spill] sm:$0xff] }
 0x895   : > { %8480 = vst.msk [vmem:[%s14324_s25 + $0x40] sm:$0xff] %vm558_vm0, %v8448_v20  ;;  %v8282_v22 = vadd.f32 %v14296_v35, %v8243_v24  ;;  %v10832_v26 = vpop.f32.mrb[18].mxu0  ;;  %v8418_v51 = vadd.f32 %v8386_v29, %v15092_v48  ;;  %v15097_v20 = vld [vmem:[#allocation36_spill] sm:$0xff] }
 0x896   : > { %v8451_v42 = vmax.f32 %v8419_v27, 0.0  ;;  %v8246_v41 = vmul.f32 %v10832_v26, %v14291_v4  ;;  %v8103_v1 = vpop.f32.mrb[19].mxu0  ;;  %v8389_v43 = vmul.f32 %v14303_v46, %v8283_v32  ;;  %v8324_v33 = vadd.f32 %v8323_v34, %v8322_v31  ;;  %v15098_v27 = vld [vmem:[#allocation35_spill] sm:$0xff] }
 0x897   : > { %v8325_v36 = vsel %vm558_vm0, %v8282_v22, 0.0  ;;  %v8450_v45 = vmax.f32 %v8418_v51, 0.0  ;;  %v8388_v47 = vmul.f32 %v14303_v46, %v8282_v22  ;;  %v8245_v60 = vmul.f32 %v14291_v4, %v8103_v1  ;;  %v15099_v51 = vld [vmem:[#allocation38_spill] sm:$0xff] }
 0x898   : > { %8483 = vst.msk [vmem:[%s14324_s25 + $0x58] sm:$0xff] %vm558_vm0, %v8451_v42  ;;  %v8285_v6 = vadd.f32 %v14296_v35, %v8246_v41  ;;  %v8421_v61 = vadd.f32 %v8389_v43, %v15093_v44  ;;  %v8326_v58 = vadd.f32 %v8325_v36, %v8324_v33  ;;  %v8327_v52 = vsel %vm558_vm0, %v8283_v32, 0.0  ;;  %v15100_v44 = vld [vmem:[#allocation37_spill] sm:$0xff] }
 0x899   : > { %v10835_v56 = vpop.f32.mrb[20].mxu0  ;;  %8482 = vst.msk [vmem:[%s14324_s25 + $0x50] sm:$0xff] %vm558_vm0, %v8450_v45  ;;  %v8420_v50 = vadd.f32 %v8388_v47, %v15094_v0  ;;  %v8284_v3 = vadd.f32 %v14296_v35, %v8245_v60 }
 0x89a   : > { %v8391_v5 = vmul.f32 %v14303_v46, %v8285_v6  ;;  %v8113_v49 = vpop.f32.mrb[21].mxu0  ;;  %v8453_v54 = vmax.f32 %v8421_v61, 0.0  ;;  %v8328_v2 = vadd.f32 %v8327_v52, %v8326_v58  ;;  %v8248_v30 = vmul.f32 %v10835_v56, %v14291_v4 }
 0x89b   : > { %v8247_v39 = vmul.f32 %v14291_v4, %v8113_v49  ;;  %v8452_v40 = vmax.f32 %v8420_v50, 0.0  ;;  %v8329_v63 = vsel %vm558_vm0, %v8284_v3, 0.0  ;;  %v8390_v37 = vmul.f32 %v14303_v46, %v8284_v3 }
 0x89c   : > { %v8423_v62 = vadd.f32 %v8391_v5, %v15095_v53  ;;  %8485 = vst.msk [vmem:[%s14324_s25 + $0x68] sm:$0xff] %vm558_vm0, %v8453_v54  ;;  %v8330_v38 = vadd.f32 %v8329_v63, %v8328_v2  ;;  %v8287_v13 = vadd.f32 %v14296_v35, %v8248_v30  ;;  %v8331_v14 = vsel %vm558_vm0, %v8285_v6, 0.0  ;;  %v15101_v2 = vld [vmem:[#allocation40_spill] sm:$0xff] }
 0x89d   : > { %v8286_v57 = vadd.f32 %v14296_v35, %v8247_v39  ;;  %v10838_v9 = vpop.f32.mrb[22].mxu0  ;;  %8484 = vst.msk [vmem:[%s14324_s25 + $0x60] sm:$0xff] %vm558_vm0, %v8452_v40  ;;  %v8422_v55 = vadd.f32 %v8390_v37, %v15096_v59 }
 0x89e   : > { %v8455_v18 = vmax.f32 %v8423_v62, 0.0  ;;  %v8250_v16 = vmul.f32 %v10838_v9, %v14291_v4  ;;  %v8123_v12 = vpop.f32.mrb[23].mxu0  ;;  %v8393_v7 = vmul.f32 %v14303_v46, %v8287_v13  ;;  %v8332_v8 = vadd.f32 %v8331_v14, %v8330_v38  ;;  %v15102_v62 = vld [vmem:[#allocation39_spill] sm:$0xff] }
 0x89f   : > { %v8333_v10 = vsel %vm558_vm0, %v8286_v57, 0.0  ;;  %v8454_v11 = vmax.f32 %v8422_v55, 0.0  ;;  %v8392_v15 = vmul.f32 %v14303_v46, %v8286_v57  ;;  %v8249_v19 = vmul.f32 %v14291_v4, %v8123_v12  ;;  %v15103_v55 = vld [vmem:[#allocation42_spill] sm:$0xff] }
 0x8a0   : > { %8487 = vst.msk [vmem:[%s14324_s25 + $0x78] sm:$0xff] %vm558_vm0, %v8455_v18  ;;  %v8289_v17 = vadd.f32 %v14296_v35, %v8250_v16  ;;  %v8425_v21 = vadd.f32 %v8393_v7, %v15097_v20  ;;  %v8334_v23 = vadd.f32 %v8333_v10, %v8332_v8  ;;  %v8335_v25 = vsel %vm558_vm0, %v8287_v13, 0.0  ;;  %v15104_v20 = vld [vmem:[#allocation41_spill] sm:$0xff] }
 0x8a1   : > { %v10841_v24 = vpop.f32.mrb[24].mxu0  ;;  %8486 = vst.msk [vmem:[%s14324_s25 + $0x70] sm:$0xff] %vm558_vm0, %v8454_v11  ;;  %v8424_v28 = vadd.f32 %v8392_v15, %v15098_v27  ;;  %v8288_v31 = vadd.f32 %v14296_v35, %v8249_v19 }
 0x8a2   : > { %v8395_v29 = vmul.f32 %v14303_v46, %v8289_v17  ;;  %v8133_v32 = vpop.f32.mrb[25].mxu0  ;;  %v8457_v22 = vmax.f32 %v8425_v21, 0.0  ;;  %v8336_v26 = vadd.f32 %v8335_v25, %v8334_v23  ;;  %v8252_v34 = vmul.f32 %v10841_v24, %v14291_v4 }
 0x8a3   : > { %v8251_v42 = vmul.f32 %v14291_v4, %v8133_v32  ;;  %v8456_v48 = vmax.f32 %v8424_v28, 0.0  ;;  %v8337_v1 = vsel %vm558_vm0, %v8288_v31, 0.0  ;;  %v8394_v43 = vmul.f32 %v14303_v46, %v8288_v31 }
 0x8a4   : > { %v8427_v41 = vadd.f32 %v8395_v29, %v15099_v51  ;;  %8489 = vst.msk [vmem:[%s14324_s25 + $0x88] sm:$0xff] %vm558_vm0, %v8457_v22  ;;  %v8338_v33 = vadd.f32 %v8337_v1, %v8336_v26  ;;  %v8291_v36 = vadd.f32 %v14296_v35, %v8252_v34  ;;  %v8339_v6 = vsel %vm558_vm0, %v8289_v17, 0.0  ;;  %v15105_v26 = vld [vmem:[#allocation44_spill] sm:$0xff] }
 0x8a5   : > { %v8290_v45 = vadd.f32 %v14296_v35, %v8251_v42  ;;  %v10844_v47 = vpop.f32.mrb[26].mxu0  ;;  %8488 = vst.msk [vmem:[%s14324_s25 + $0x80] sm:$0xff] %vm558_vm0, %v8456_v48  ;;  %v8426_v61 = vadd.f32 %v8394_v43, %v15100_v44 }
 0x8a6   : > { %v8459_v60 = vmax.f32 %v8427_v41, 0.0  ;;  %v8254_v58 = vmul.f32 %v10844_v47, %v14291_v4  ;;  %v8143_v56 = vpop.f32.mrb[27].mxu0  ;;  %v8397_v52 = vmul.f32 %v14303_v46, %v8291_v36  ;;  %v8340_v0 = vadd.f32 %v8339_v6, %v8338_v33  ;;  %v15106_v41 = vld [vmem:[#allocation43_spill] sm:$0xff] }
 0x8a7   : > { %v8341_v50 = vsel %vm558_vm0, %v8290_v45, 0.0  ;;  %v8458_v5 = vmax.f32 %v8426_v61, 0.0  ;;  %v8396_v3 = vmul.f32 %v14303_v46, %v8290_v45  ;;  %v8253_v54 = vmul.f32 %v14291_v4, %v8143_v56  ;;  %v15107_v61 = vld [vmem:[#allocation46_spill] sm:$0xff] }
 0x8a8   : > { %8491 = vst.msk [vmem:[%s14324_s25 + $0x98] sm:$0xff] %vm558_vm0, %v8459_v60  ;;  %v8293_v49 = vadd.f32 %v14296_v35, %v8254_v58  ;;  %v8429_v30 = vadd.f32 %v8397_v52, %v15101_v2  ;;  %v8342_v39 = vadd.f32 %v8341_v50, %v8340_v0  ;;  %v8343_v53 = vsel %vm558_vm0, %v8291_v36, 0.0  ;;  %v15108_v2 = vld [vmem:[#allocation45_spill] sm:$0xff] }
 0x8a9   : > { %v10847_v40 = vpop.f32.mrb[28].mxu0  ;;  %8490 = vst.msk [vmem:[%s14324_s25 + $0x90] sm:$0xff] %vm558_vm0, %v8458_v5  ;;  %v8428_v63 = vadd.f32 %v8396_v3, %v15102_v62  ;;  %v8292_v38 = vadd.f32 %v14296_v35, %v8253_v54 }
 0x8aa   : > { %v8399_v37 = vmul.f32 %v14303_v46, %v8293_v49  ;;  %v8153_v13 = vpop.f32.mrb[29].mxu0  ;;  %v8461_v57 = vmax.f32 %v8429_v30, 0.0  ;;  %v8344_v9 = vadd.f32 %v8343_v53, %v8342_v39  ;;  %v8256_v14 = vmul.f32 %v10847_v40, %v14291_v4 }
 0x8ab   : > { %v8255_v18 = vmul.f32 %v14291_v4, %v8153_v13  ;;  %v8460_v59 = vmax.f32 %v8428_v63, 0.0  ;;  %v8345_v12 = vsel %vm558_vm0, %v8292_v38, 0.0  ;;  %v8398_v7 = vmul.f32 %v14303_v46, %v8292_v38 }
 0x8ac   : > { %v8431_v16 = vadd.f32 %v8399_v37, %v15103_v55  ;;  %8493 = vst.msk [vmem:[%s14324_s25 + $0xa8] sm:$0xff] %vm558_vm0, %v8461_v57  ;;  %v8346_v8 = vadd.f32 %v8345_v12, %v8344_v9  ;;  %v8295_v10 = vadd.f32 %v14296_v35, %v8256_v14  ;;  %v8347_v17 = vsel %vm558_vm0, %v8293_v49, 0.0  ;;  %v15109_v9 = vld [vmem:[#allocation48_spill] sm:$0xff]  ;;  %v15110_v55 = vld [vmem:[#allocation47_spill] sm:$0xff] }
 0x8ad   : > { %v8294_v11 = vadd.f32 %v14296_v35, %v8255_v18  ;;  %v10850_v15 = vpop.f32.mrb[30].mxu0  ;;  %8492 = vst.msk [vmem:[%s14324_s25 + $0xa0] sm:$0xff] %vm558_vm0, %v8460_v59  ;;  %v8430_v21 = vadd.f32 %v8398_v7, %v15104_v20 }
 0x8ae   : > { %v8463_v19 = vmax.f32 %v8431_v16, 0.0  ;;  %v8258_v23 = vmul.f32 %v10850_v15, %v14291_v4  ;;  %v8163_v24 = vpop.f32.mrb[31].mxu0  ;;  %v8401_v25 = vmul.f32 %v14303_v46, %v8295_v10  ;;  %v8348_v27 = vadd.f32 %v8347_v17, %v8346_v8 }
 0x8af   : > { %v8349_v28 = vsel %vm558_vm0, %v8294_v11, 0.0  ;;  %v8462_v29 = vmax.f32 %v8430_v21, 0.0  ;;  %v8400_v31 = vmul.f32 %v14303_v46, %v8294_v11  ;;  %v8257_v22 = vmul.f32 %v14291_v4, %v8163_v24 }
 0x8b0   : > { %8495 = vst.msk [vmem:[%s14324_s25 + $0xb8] sm:$0xff] %vm558_vm0, %v8463_v19  ;;  %v8297_v32 = vadd.f32 %v14296_v35, %v8258_v23  ;;  %v8433_v34 = vadd.f32 %v8401_v25, %v15105_v26  ;;  %v8350_v42 = vadd.f32 %v8349_v28, %v8348_v27  ;;  %v8351_v51 = vsel %vm558_vm0, %v8295_v10, 0.0  ;;  %v15112_v23 = vld [vmem:[#allocation49_spill] sm:$0xff] }
 0x8b1   : > { %v10853_v48 = vpop.f32.mrb[32].mxu0  ;;  %8494 = vst.msk [vmem:[%s14324_s25 + $0xb0] sm:$0xff] %vm558_vm0, %v8462_v29  ;;  %v8432_v1 = vadd.f32 %v8400_v31, %v15106_v41  ;;  %v8296_v33 = vadd.f32 %v14296_v35, %v8257_v22 }
 0x8b2   : > { %v8403_v43 = vmul.f32 %v14303_v46, %v8297_v32  ;;  %v8173_v36 = vpop.f32.mrb[33].mxu0  ;;  %v8465_v45 = vmax.f32 %v8433_v34, 0.0  ;;  %v8352_v47 = vadd.f32 %v8351_v51, %v8350_v42  ;;  %v8260_v6 = vmul.f32 %v10853_v48, %v14291_v4 }
 0x8b3   : > { %v8259_v60 = vmul.f32 %v14291_v4, %v8173_v36  ;;  %v8464_v44 = vmax.f32 %v8432_v1, 0.0  ;;  %v8353_v56 = vsel %vm558_vm0, %v8296_v33, 0.0  ;;  %v8402_v52 = vmul.f32 %v14303_v46, %v8296_v33 }
 0x8b4   : > { %v8435_v58 = vadd.f32 %v8403_v43, %v15107_v61  ;;  %8497 = vst.msk [vmem:[%s14324_s25 + $0xc8] sm:$0xff] %vm558_vm0, %v8465_v45  ;;  %v8354_v0 = vadd.f32 %v8353_v56, %v8352_v47  ;;  %v8299_v50 = vadd.f32 %v14296_v35, %v8260_v6  ;;  %v8355_v49 = vsel %vm558_vm0, %v8297_v32, 0.0 }
 0x8b5   : > { %v8298_v5 = vadd.f32 %v14296_v35, %v8259_v60  ;;  %v10856_v3 = vpop.f32.mrb[34].mxu0  ;;  %8496 = vst.msk [vmem:[%s14324_s25 + $0xc0] sm:$0xff] %vm558_vm0, %v8464_v44  ;;  %v8434_v30 = vadd.f32 %v8402_v52, %v15108_v2 }
 0x8b6   : > { %v8467_v54 = vmax.f32 %v8435_v58, 0.0  ;;  %v8262_v39 = vmul.f32 %v10856_v3, %v14291_v4  ;;  %v8183_v40 = vpop.f32.mrb[35].mxu0  ;;  %v8405_v53 = vmul.f32 %v14303_v46, %v8299_v50  ;;  %v8356_v62 = vadd.f32 %v8355_v49, %v8354_v0 }
 0x8b7   : > { %v8357_v63 = vsel %vm558_vm0, %v8298_v5, 0.0  ;;  %v8466_v37 = vmax.f32 %v8434_v30, 0.0  ;;  %v8404_v38 = vmul.f32 %v14303_v46, %v8298_v5  ;;  %v8261_v57 = vmul.f32 %v14291_v4, %v8183_v40  ;;  %v15111_v4 = vld [vmem:[#allocation50_spill] sm:$0xff] }
 0x8b8   : > { %8499 = vst.msk [vmem:[%s14324_s25 + $0xd8] sm:$0xff] %vm558_vm0, %v8467_v54  ;;  %v8301_v13 = vadd.f32 %v14296_v35, %v8262_v39  ;;  %v8437_v14 = vadd.f32 %v8405_v53, %v15109_v9  ;;  %v8358_v18 = vadd.f32 %v8357_v63, %v8356_v62  ;;  %v8359_v59 = vsel %vm558_vm0, %v8299_v50, 0.0 }
 0x8b9   : > { %8498 = vst.msk [vmem:[%s14324_s25 + $0xd0] sm:$0xff] %vm558_vm0, %v8466_v37  ;;  %v8436_v16 = vadd.f32 %v8404_v38, %v15110_v55  ;;  %v8300_v7 = vadd.f32 %v14296_v35, %v8261_v57 }
 0x8ba   : > { %v8407_v12 = vmul.f32 %v14303_v46, %v8301_v13  ;;  %v8469_v8 = vmax.f32 %v8437_v14, 0.0  ;;  %v8360_v10 = vadd.f32 %v8359_v59, %v8358_v18  ;;  %v8363_v35 = vsel %vm558_vm0, %v8301_v13, 0.0 }
 0x8bb   : > { %v8468_v11 = vmax.f32 %v8436_v16, 0.0  ;;  %v8361_v17 = vsel %vm558_vm0, %v8300_v7, 0.0  ;;  %v8406_v19 = vmul.f32 %v14303_v46, %v8300_v7 }
 0x8bc   : > { %v8439_v15 = vadd.f32 %v8407_v12, %v15111_v4  ;;  %8501 = vst.msk [vmem:[%s14324_s25 + $0xe8] sm:$0xff] %vm558_vm0, %v8469_v8  ;;  %v8362_v20 = vadd.f32 %v8361_v17, %v8360_v10 }
 0x8bd   : > { %8500 = vst.msk [vmem:[%s14324_s25 + $0xe0] sm:$0xff] %vm558_vm0, %v8468_v11  ;;  %v8438_v24 = vadd.f32 %v8406_v19, %v15112_v23 }
 0x8be   : > { %v8471_v21 = vmax.f32 %v8439_v15, 0.0  ;;  %v8364_v25 = vadd.f32 %v8363_v35, %v8362_v20 }
 0x8bf   : > { %v8470_v46 = vmax.f32 %v8438_v24, 0.0 }
 0x8c0   : > { %8503 = vst.msk [vmem:[%s14324_s25 + $0xf8] sm:$0xff] %vm558_vm0, %v8471_v21  ;;  %v8365_v27 = vrot.slane %v8364_v25, 4 }
 0x8c1   : > { %8502 = vst.msk [vmem:[%s14324_s25 + $0xf0] sm:$0xff] %vm558_vm0, %v8470_v46 }
 0x8c2   : > { %v8366_v28 = vadd.f32 %v8365_v27, %v8364_v25 }
 0x8c3   : > { %11625 = shalt.err (!%p11622_p1)
}
 0x8c4   : > { %s11626_s25 = scalar_lea.hbm %s14532_s14, 4096  ;;  %s11630_s26 = scalar_lea.hbm %s15113_s21, 8192 }
 0x8c5   : > { %p11627_p13 = scmp.ne.s32.totalorder %s14532_s14, %s11626_s25  ;;  %p11631_p4 = scmp.lt.u32.totalorder %s14532_s14, %s15113_s21 }
 0x8c6   : > { %p11632_p5 = scmp.lt.u32.totalorder %s11630_s26, %s11626_s25  ;;  %p11634_p11 = scmp.lt.u32.totalorder %s11626_s25, %s14532_s14 }
 0x8c7   : > { %p11628_p6 = pnand %p11627_p13, %p15114_p0 }
 0x8c8   : > { %p11633_p8 = por %p11632_p5, %p11631_p4 }
 0x8c9   : > { %p11629_p10 = pneg %p11628_p6 }
 0x8ca   : > { %p11635_p2 = por %p11634_p11, %p11633_p8 }
 0x8cc   : > { %p11636_p3 = pnand %p11635_p2, %p11629_p10 }
 0x8ce   : > { %11639 = shalt.err (!%p11636_p3)
}
 0x8cf   : > { %s11725_s20 = smov 128   ;;  %s11726_s18 = smov 8   ;;  %v8367_v29 = vrot.slane %v8366_v28, 2 }
 0x8d0   : > { %s15115_s5 = scalar_lea.sflag [#allocation6], %s11984_s6  ;;  %s9270_s25 = sshll.u32 %s11824_s17, 7 }
 0x8d1   : > { %11457 = dma.vmem_to_hbm [thread:$0]  (%p15114_p0), %s14534_s22, 4096, %s14532_s14, %s15115_s5, %s11725_s20, %s11725_s20, %s11726_s18   ;;  %v8368_v31 = vadd.f32 %v8367_v29, %v8366_v28 }
 0x8d2   : > { %s8547_s24 = sshll.u32 %s12696_s29, 4  ;;  %s15116_s23 = sld [smem:[#allocation96_spill]]  ;;  %s14571_s24 = int_to_ptr.vmem [resolvable:$true] %s8547_s24 }
 0x8d3   : > { %v8369_v32 = vrot.slane %v8368_v31, 1  ;;  %s8518_s22 = scalar_lea.sflag [#allocation12], %s11984_s6  ;;  %s11640_s14 = scalar_lea.vmem %s14571_s24, 128 }
 0x8d4   : > { %p11641_p7 = scmp.ne.s32.totalorder %s14571_s24, %s11640_s14  ;;  %s11727_s17 = smov [#allocation11]  }
 0x8d5   : > { %v8370_v22 = vadd.f32 %v8369_v32, %v8368_v31  ;;  %s11644_s20 = sshll.u32 %s11727_s17, 4  ;;  %s11645_s20 = int_to_ptr.vmem [resolvable:$false] %s11644_s20 }
 0x8d6   : > { %p11642_p9 = pnand %p11641_p7, %p15114_p0  ;;  %s11646_s18 = scalar_lea.vmem %s11645_s20, 256 }
 0x8d7   : > { %v8371_v26 = vmul.f32 0.00390625, %v8370_v22  ;;  %p11647_p1 = scmp.lt.s32.totalorder %s14571_s24, %s11645_s20  ;;  %p11648_p13 = scmp.lt.s32.totalorder %s11646_s18, %s11640_s14 }
 0x8d8   : > { %s14569_s0 = scalar_lea.hbm %s15116_s23, %s9270_s25  ;;  %p11643_p12 = pneg %p11642_p9 }
 0x8d9   : > { %8511 = vst.msk [vmem:[%s12696_s29 + $0x5] sm:$0x1] %vm8505_vm3, %v8371_v26  ;;  %p11649_p6 = por %p11648_p13, %p11647_p1 }
 0x8db   : > { %p11650_p10 = pnand %p11649_p6, %p11643_p12 }
 0x8dd   : > { %11653 = shalt.err (!%p11650_p10)
}
 0x8de   : > { %s11654_s6 = scalar_lea.hbm %s14569_s0, 128  ;;  %s11658_s25 = scalar_lea.hbm %s15116_s23, 256 }
 0x8df   : > { %p11655_p4 = scmp.ne.s32.totalorder %s14569_s0, %s11654_s6  ;;  %p11659_p11 = scmp.lt.u32.totalorder %s14569_s0, %s15116_s23 }
 0x8e0   : > { %p11660_p2 = scmp.lt.u32.totalorder %s11658_s25, %s11654_s6  ;;  %p11662_p7 = scmp.lt.u32.totalorder %s11654_s6, %s14569_s0 }
 0x8e1   : > { %p11656_p5 = pnand %p11655_p4, %p15114_p0 }
 0x8e2   : > { %p11661_p3 = por %p11660_p2, %p11659_p11 }
 0x8e3   : > { %p11657_p8 = pneg %p11656_p5 }
 0x8e4   : > { %p11663_p9 = por %p11662_p7, %p11661_p3 }
 0x8e6   : > { %p11664_p12 = pnand %p11663_p9, %p11657_p8 }
 0x8e8   : > { %11667 = shalt.err (!%p11664_p12)
}
 0x8e9   : > { %11458 = dma.vmem_to_hbm [thread:$0]  (%p15114_p0), %s14571_s24, 128, %s14569_s0, %s8518_s22  }
 0x8ea PF: > { %s15117_s14 = sld [smem:[#allocation17_spill]]  ;;  %s15118_s17 = sld [smem:[#allocation18_spill]] }
 0x8eb   : > { %p15120_p13 = scmp.ge.s32.totalorder %s11714_s16, 2 }
 0x8f0   : > { %s8559_s20 = sand.u32 1, %s15117_s14   ;;  %p15119_p1 = scmp.ne.s32.totalorder %s15118_s17, 0 }
 0x8f1   : > { %s8560_s18 = scalar_lea.sflag [#allocation6], %s8559_s20 }
 0x8f2   : > { %p11473_p6 = pnand %p15120_p13, %p15119_p1 }
 0x8f4   : > { %11693 = dma.done.wait (!%p11473_p6), %s8560_s18, 4096  }
 0x8f5   : > { %11695 = vsyncadd (!%p11473_p6), %s8560_s18, 4294963200  ;;  %s8569_s6 = scalar_lea.sflag [#allocation12], %s8559_s20 }
 0x8f6   : > { %11697 = dma.done.wait (!%p11473_p6), %s8569_s6, 128  }
 0x8f7   : > { %11699 = vsyncadd (!%p11473_p6), %s8569_s6, 4294967168  ;;  %p32_p0 = scmp.ge.s32.totalorder %s11919_s13, 4   ;;  %s15121_s29 = smov %s11706_s30 }
 0x8f8   : > { %s15122_s30 = smov %s11710_s15  ;;  %s15123_s15 = smov %s11935_s28 }
 0x8f9   : > { %s15124_s16 = smov %s11919_s13  ;;  %34 = sbr.rel (!%p32_p0) target bundleno = 14 (0xe), region = 162 }
 0x900   :  { %8574 = vsyncpa [#allocation5], 1 }
 0x901   :  { %8576 = vsyncpa [#allocation5 + $0x1], 1 }
 0x902   :  { %8577 = vsyncpa [#allocation8], 1 }
 0x903   :  { %8578 = vsyncpa [#allocation6], 1 }
 0x904   :  { %8580 = vsyncpa [#allocation6 + $0x1], 1 }
 0x905   :  { %8581 = vsyncpa [#allocation12], 1 }
 0x906   :  { %8583 = vsyncpa [#allocation12 + $0x1], 1 }

</bundles_post_ra>
